<compile_context>
chip_gen: v7x
topology: tpu7x:2x2x1
jax: 0.10.0
libtpu: 0.0.40
codegen_flags: <defaults>
</compile_context>

<pallas_src>
import functools

import jax
import jax.numpy as jnp
from jax.experimental import pallas as pl
from jax.experimental.pallas import tpu as pltpu

KSIZE = 7
PAD = (KSIZE - 1) // 2
NTAPS = KSIZE * KSIZE


def _spatial_gate_kernel(x_ref, wm_ref, bn_ref, o_ref, *, H, W):
    # x_ref:  (Bn, C, H*W)      VMEM   lane-dense block of input samples
    # wm_ref: (2*49, H*W)       VMEM   per-tap conv-weight * validity rows
    # bn_ref: (4,)              SMEM   gamma, beta, running_mean, running_var
    # o_ref:  (Bn, C, H*W)      VMEM
    HW = H * W
    C = x_ref.shape[1]

    xv = x_ref[...]                                    # (Bn, C, HW) native dtype
    # ChannelPool: max + mean over channels -> lane-dense (Bn, HW) maps.
    mx = jnp.max(xv, axis=1).astype(jnp.float32)
    mn = jnp.sum(xv, axis=1).astype(jnp.float32) * jnp.float32(1.0 / C)
    lane_axis = mx.ndim - 1                            # pltpu.roll needs axis >= 0

    # 7x7 conv via 49 static lane rotations of the flattened pooled maps.
    # Boundary zero-padding is baked into wm_ref (weight * valid mask per tap),
    # which also masks any roll wrap-around.
    acc = jnp.zeros(mx.shape, jnp.float32)
    for kh in range(KSIZE):
        for kw in range(KSIZE):
            t = kh * KSIZE + kw
            sh = (kh - PAD) * W + (kw - PAD)           # static flat shift
            shift = (-sh) % HW                         # non-negative rotate
            if shift == 0:
                rmx, rmn = mx, mn
            else:
                rmx = pltpu.roll(mx, shift, lane_axis)  # XLU, off the VPU path
                rmn = pltpu.roll(mn, shift, lane_axis)
            acc = (acc
                   + wm_ref[t:t + 1, :] * rmx
                   + wm_ref[NTAPS + t:NTAPS + t + 1, :] * rmn)

    # BatchNorm2d(1), eval mode (running stats), affine; then sigmoid.
    gamma, beta, mu, var = bn_ref[0], bn_ref[1], bn_ref[2], bn_ref[3]
    bnv = (acc - mu) * jax.lax.rsqrt(var + jnp.float32(1e-5)) * gamma + beta
    scale = jax.nn.sigmoid(bnv)                        # (Bn, HW) f32

    # Lane-dense output store; multiply in the input dtype (no f32 temp of x).
    o_ref[...] = (xv * scale[:, None, :].astype(xv.dtype)).astype(o_ref.dtype)


def _conv_weight_masks(conv_w, H, W):
    """(1, 2, 7, 7) conv weight -> (2*49, H*W) f32 rows of weight * validity.

    Row t (t = kh*7+kw) applies to the max map, row 49+t to the mean map.
    """
    HW = H * W
    pos = jnp.arange(HW, dtype=jnp.int32)
    i = pos // W
    j = pos % W
    rows = []
    for c in range(2):                                 # 0: max map, 1: mean map
        for kh in range(KSIZE):
            for kw in range(KSIZE):
                dh, dw = kh - PAD, kw - PAD
                valid = ((i + dh >= 0) & (i + dh < H)
                         & (j + dw >= 0) & (j + dw < W)).astype(jnp.float32)
                rows.append(conv_w[0, c, kh, kw].astype(jnp.float32) * valid)
    return jnp.stack(rows, axis=0)                     # (98, HW)


def spatial_gate(x, conv_w, bn_params):
    """x: (N, C, H, W); conv_w: (1, 2, 7, 7); bn_params: (4,) [g, b, mu, var]."""
    N, C, H, W = x.shape
    HW = H * W
    x2 = x.reshape(N, C, HW)                           # lane-dense view (free)
    wm = _conv_weight_masks(conv_w, H, W)
    bnp = bn_params.astype(jnp.float32)

    # Samples per grid step: amortize per-step overhead for small samples.
    per_sample = C * HW * x.dtype.itemsize
    bs = 1
    for d in range(1, N + 1):
        if N % d == 0 and d * per_sample <= (2 << 20):
            bs = d

    # VMEM budget: double-buffered in/out x blocks + resident weight-mask rows.
    vmem_need = 4 * bs * per_sample + 2 * (2 * NTAPS * HW * 4) + (2 << 20)
    vmem_limit = int(min(max(vmem_need, 32 * 1024 * 1024), 60 * 1024 * 1024))

    kernel = functools.partial(_spatial_gate_kernel, H=H, W=W)
    out = pl.pallas_call(
        kernel,
        out_shape=jax.ShapeDtypeStruct((N, C, HW), x.dtype),
        grid_spec=pltpu.PrefetchScalarGridSpec(
            num_scalar_prefetch=0,
            grid=(N // bs,),
            in_specs=[
                pl.BlockSpec((bs, C, HW), lambda n: (n, 0, 0)),
                pl.BlockSpec((2 * NTAPS, HW), lambda n: (0, 0)),
                pl.BlockSpec(memory_space=pltpu.MemorySpace.SMEM),
            ],
            out_specs=pl.BlockSpec((bs, C, HW), lambda n: (n, 0, 0)),
        ),
        compiler_params=pltpu.CompilerParams(
            dimension_semantics=("parallel",),
            vmem_limit_bytes=vmem_limit,
        ),
    )(x2, wm, bnp)
    return out.reshape(N, C, H, W)


def ref_spatial_gate(x, conv_w, bn_params):
    """Pure-JAX reference for correctness checking."""
    mx = jnp.max(x, axis=1, keepdims=True)
    mn = jnp.mean(x, axis=1, keepdims=True)
    pooled = jnp.concatenate([mx, mn], axis=1)         # (N, 2, H, W)
    y = jax.lax.conv_general_dilated(
        pooled, conv_w, window_strides=(1, 1),
        padding=((PAD, PAD), (PAD, PAD)),
        dimension_numbers=("NCHW", "OIHW", "NCHW"))
    gamma, beta, mu, var = bn_params
    y = (y - mu) * jax.lax.rsqrt(var + 1e-5) * gamma + beta
    return x * jax.nn.sigmoid(y)


if __name__ == "__main__":
    key = jax.random.PRNGKey(0)
    kx, kw = jax.random.split(key)

    N, C, H, W = 2, 4, 16, 16
    x = jax.random.normal(kx, (N, C, H, W), jnp.float32)

    # Deterministic synthetic parameters:
    #   Conv2d(2, 1, kernel_size=7, padding=3, bias=False) weight
    #   BatchNorm2d(1): gamma=1, beta=0, running_mean=0, running_var=1
    conv_w = jax.random.normal(kw, (1, 2, KSIZE, KSIZE), jnp.float32) * 0.1
    bn_params = jnp.array([1.0, 0.0, 0.0, 1.0], jnp.float32)

    out = spatial_gate(x, conv_w, bn_params)
    out = jax.block_until_ready(out)

    ref = ref_spatial_gate(x, conv_w, bn_params)
    max_err = float(jnp.max(jnp.abs(out - ref)))
    assert jnp.allclose(out, ref, atol=1e-4, rtol=1e-4), f"max_err={max_err}"

    print("KERNEL_OK")
</pallas_src>

<mosaic_0001>
module attributes {stable_mosaic.version = 11 : i64} {
  func.func @_spatial_gate_kernel(%arg0: i32, %arg1: memref<2x4x256xf32, #tpu.memory_space<vmem>>, %arg2: memref<98x256xf32, #tpu.memory_space<vmem>>, %arg3: memref<4xf32, #tpu.memory_space<smem>>, %arg4: memref<2x4x256xf32, #tpu.memory_space<vmem>>) attributes {dimension_semantics = [#tpu.dimension_semantics<parallel>], iteration_bounds = array<i64: 1>, scalar_prefetch = 0 : i64, scratch_operands = 0 : i64, tpu.core_type = #tpu.core_type<tc>, window_params = [{transform_indices = @transform_0, window_bounds = array<i64: 2, 4, 256>}, {pipeline_mode = #tpu.pipeline_mode<synchronous>, transform_indices = @transform_1, window_bounds = array<i64: 98, 256>}, {transform_indices = @transform_2, window_bounds = array<i64: 4>}, {transform_indices = @transform_3, window_bounds = array<i64: 2, 4, 256>}]} {
    %c0 = arith.constant 0 : index
    %c0_0 = arith.constant 0 : index
    %c0_1 = arith.constant 0 : index
    %0 = vector.load %arg1[%c0, %c0_0, %c0_1] : memref<2x4x256xf32, #tpu.memory_space<vmem>>, vector<2x4x256xf32>
    %cst = arith.constant dense<0xFF800000> : vector<2x256xf32>
    %1 = vector.multi_reduction <maximumf>, %0, %cst [1] : vector<2x4x256xf32> to vector<2x256xf32>
    %cst_2 = arith.constant dense<0.000000e+00> : vector<2x256xf32>
    %2 = vector.multi_reduction <add>, %0, %cst_2 [1] : vector<2x4x256xf32> to vector<2x256xf32>
    %cst_3 = arith.constant 2.500000e-01 : f32
    %3 = vector.broadcast %cst_3 : f32 to vector<2x256xf32>
    %4 = arith.mulf %2, %3 : vector<2x256xf32>
    %cst_4 = arith.constant 0.000000e+00 : f32
    %5 = vector.broadcast %cst_4 : f32 to vector<2x256xf32>
    %c51_i32 = arith.constant 51 : i32
    %6 = tpu.dynamic_rotate %1 by %c51_i32 dim 1 : vector<2x256xf32>, i32 -> vector<2x256xf32>
    %c51_i32_5 = arith.constant 51 : i32
    %7 = tpu.dynamic_rotate %4 by %c51_i32_5 dim 1 : vector<2x256xf32>, i32 -> vector<2x256xf32>
    %c0_6 = arith.constant 0 : index
    %c0_7 = arith.constant 0 : index
    %8 = vector.load %arg2[%c0_6, %c0_7] : memref<98x256xf32, #tpu.memory_space<vmem>>, vector<1x256xf32>
    %9 = vector.broadcast %8 : vector<1x256xf32> to vector<2x256xf32>
    %10 = arith.mulf %9, %6 : vector<2x256xf32>
    %11 = arith.addf %5, %10 : vector<2x256xf32>
    %c49 = arith.constant 49 : index
    %c0_8 = arith.constant 0 : index
    %12 = vector.load %arg2[%c49, %c0_8] : memref<98x256xf32, #tpu.memory_space<vmem>>, vector<1x256xf32>
    %13 = vector.broadcast %12 : vector<1x256xf32> to vector<2x256xf32>
    %14 = arith.mulf %13, %7 : vector<2x256xf32>
    %15 = arith.addf %11, %14 : vector<2x256xf32>
    %c50_i32 = arith.constant 50 : i32
    %16 = tpu.dynamic_rotate %1 by %c50_i32 dim 1 : vector<2x256xf32>, i32 -> vector<2x256xf32>
    %c50_i32_9 = arith.constant 50 : i32
    %17 = tpu.dynamic_rotate %4 by %c50_i32_9 dim 1 : vector<2x256xf32>, i32 -> vector<2x256xf32>
    %c1 = arith.constant 1 : index
    %c0_10 = arith.constant 0 : index
    %18 = vector.load %arg2[%c1, %c0_10] : memref<98x256xf32, #tpu.memory_space<vmem>>, vector<1x256xf32>
    %19 = vector.broadcast %18 : vector<1x256xf32> to vector<2x256xf32>
    %20 = arith.mulf %19, %16 : vector<2x256xf32>
    %21 = arith.addf %15, %20 : vector<2x256xf32>
    %c50 = arith.constant 50 : index
    %c0_11 = arith.constant 0 : index
    %22 = vector.load %arg2[%c50, %c0_11] : memref<98x256xf32, #tpu.memory_space<vmem>>, vector<1x256xf32>
    %23 = vector.broadcast %22 : vector<1x256xf32> to vector<2x256xf32>
    %24 = arith.mulf %23, %17 : vector<2x256xf32>
    %25 = arith.addf %21, %24 : vector<2x256xf32>
    %c49_i32 = arith.constant 49 : i32
    %26 = tpu.dynamic_rotate %1 by %c49_i32 dim 1 : vector<2x256xf32>, i32 -> vector<2x256xf32>
    %c49_i32_12 = arith.constant 49 : i32
    %27 = tpu.dynamic_rotate %4 by %c49_i32_12 dim 1 : vector<2x256xf32>, i32 -> vector<2x256xf32>
    %c2 = arith.constant 2 : index
    %c0_13 = arith.constant 0 : index
    %28 = vector.load %arg2[%c2, %c0_13] : memref<98x256xf32, #tpu.memory_space<vmem>>, vector<1x256xf32>
    %29 = vector.broadcast %28 : vector<1x256xf32> to vector<2x256xf32>
    %30 = arith.mulf %29, %26 : vector<2x256xf32>
    %31 = arith.addf %25, %30 : vector<2x256xf32>
    %c51 = arith.constant 51 : index
    %c0_14 = arith.constant 0 : index
    %32 = vector.load %arg2[%c51, %c0_14] : memref<98x256xf32, #tpu.memory_space<vmem>>, vector<1x256xf32>
    %33 = vector.broadcast %32 : vector<1x256xf32> to vector<2x256xf32>
    %34 = arith.mulf %33, %27 : vector<2x256xf32>
    %35 = arith.addf %31, %34 : vector<2x256xf32>
    %c48_i32 = arith.constant 48 : i32
    %36 = tpu.dynamic_rotate %1 by %c48_i32 dim 1 : vector<2x256xf32>, i32 -> vector<2x256xf32>
    %c48_i32_15 = arith.constant 48 : i32
    %37 = tpu.dynamic_rotate %4 by %c48_i32_15 dim 1 : vector<2x256xf32>, i32 -> vector<2x256xf32>
    %c3 = arith.constant 3 : index
    %c0_16 = arith.constant 0 : index
    %38 = vector.load %arg2[%c3, %c0_16] : memref<98x256xf32, #tpu.memory_space<vmem>>, vector<1x256xf32>
    %39 = vector.broadcast %38 : vector<1x256xf32> to vector<2x256xf32>
    %40 = arith.mulf %39, %36 : vector<2x256xf32>
    %41 = arith.addf %35, %40 : vector<2x256xf32>
    %c52 = arith.constant 52 : index
    %c0_17 = arith.constant 0 : index
    %42 = vector.load %arg2[%c52, %c0_17] : memref<98x256xf32, #tpu.memory_space<vmem>>, vector<1x256xf32>
    %43 = vector.broadcast %42 : vector<1x256xf32> to vector<2x256xf32>
    %44 = arith.mulf %43, %37 : vector<2x256xf32>
    %45 = arith.addf %41, %44 : vector<2x256xf32>
    %c47_i32 = arith.constant 47 : i32
    %46 = tpu.dynamic_rotate %1 by %c47_i32 dim 1 : vector<2x256xf32>, i32 -> vector<2x256xf32>
    %c47_i32_18 = arith.constant 47 : i32
    %47 = tpu.dynamic_rotate %4 by %c47_i32_18 dim 1 : vector<2x256xf32>, i32 -> vector<2x256xf32>
    %c4 = arith.constant 4 : index
    %c0_19 = arith.constant 0 : index
    %48 = vector.load %arg2[%c4, %c0_19] : memref<98x256xf32, #tpu.memory_space<vmem>>, vector<1x256xf32>
    %49 = vector.broadcast %48 : vector<1x256xf32> to vector<2x256xf32>
    %50 = arith.mulf %49, %46 : vector<2x256xf32>
    %51 = arith.addf %45, %50 : vector<2x256xf32>
    %c53 = arith.constant 53 : index
    %c0_20 = arith.constant 0 : index
    %52 = vector.load %arg2[%c53, %c0_20] : memref<98x256xf32, #tpu.memory_space<vmem>>, vector<1x256xf32>
    %53 = vector.broadcast %52 : vector<1x256xf32> to vector<2x256xf32>
    %54 = arith.mulf %53, %47 : vector<2x256xf32>
    %55 = arith.addf %51, %54 : vector<2x256xf32>
    %c46_i32 = arith.constant 46 : i32
    %56 = tpu.dynamic_rotate %1 by %c46_i32 dim 1 : vector<2x256xf32>, i32 -> vector<2x256xf32>
    %c46_i32_21 = arith.constant 46 : i32
    %57 = tpu.dynamic_rotate %4 by %c46_i32_21 dim 1 : vector<2x256xf32>, i32 -> vector<2x256xf32>
    %c5 = arith.constant 5 : index
    %c0_22 = arith.constant 0 : index
    %58 = vector.load %arg2[%c5, %c0_22] : memref<98x256xf32, #tpu.memory_space<vmem>>, vector<1x256xf32>
    %59 = vector.broadcast %58 : vector<1x256xf32> to vector<2x256xf32>
    %60 = arith.mulf %59, %56 : vector<2x256xf32>
    %61 = arith.addf %55, %60 : vector<2x256xf32>
    %c54 = arith.constant 54 : index
    %c0_23 = arith.constant 0 : index
    %62 = vector.load %arg2[%c54, %c0_23] : memref<98x256xf32, #tpu.memory_space<vmem>>, vector<1x256xf32>
    %63 = vector.broadcast %62 : vector<1x256xf32> to vector<2x256xf32>
    %64 = arith.mulf %63, %57 : vector<2x256xf32>
    %65 = arith.addf %61, %64 : vector<2x256xf32>
    %c45_i32 = arith.constant 45 : i32
    %66 = tpu.dynamic_rotate %1 by %c45_i32 dim 1 : vector<2x256xf32>, i32 -> vector<2x256xf32>
    %c45_i32_24 = arith.constant 45 : i32
    %67 = tpu.dynamic_rotate %4 by %c45_i32_24 dim 1 : vector<2x256xf32>, i32 -> vector<2x256xf32>
    %c6 = arith.constant 6 : index
    %c0_25 = arith.constant 0 : index
    %68 = vector.load %arg2[%c6, %c0_25] : memref<98x256xf32, #tpu.memory_space<vmem>>, vector<1x256xf32>
    %69 = vector.broadcast %68 : vector<1x256xf32> to vector<2x256xf32>
    %70 = arith.mulf %69, %66 : vector<2x256xf32>
    %71 = arith.addf %65, %70 : vector<2x256xf32>
    %c55 = arith.constant 55 : index
    %c0_26 = arith.constant 0 : index
    %72 = vector.load %arg2[%c55, %c0_26] : memref<98x256xf32, #tpu.memory_space<vmem>>, vector<1x256xf32>
    %73 = vector.broadcast %72 : vector<1x256xf32> to vector<2x256xf32>
    %74 = arith.mulf %73, %67 : vector<2x256xf32>
    %75 = arith.addf %71, %74 : vector<2x256xf32>
    %c35_i32 = arith.constant 35 : i32
    %76 = tpu.dynamic_rotate %1 by %c35_i32 dim 1 : vector<2x256xf32>, i32 -> vector<2x256xf32>
    %c35_i32_27 = arith.constant 35 : i32
    %77 = tpu.dynamic_rotate %4 by %c35_i32_27 dim 1 : vector<2x256xf32>, i32 -> vector<2x256xf32>
    %c7 = arith.constant 7 : index
    %c0_28 = arith.constant 0 : index
    %78 = vector.load %arg2[%c7, %c0_28] : memref<98x256xf32, #tpu.memory_space<vmem>>, vector<1x256xf32>
    %79 = vector.broadcast %78 : vector<1x256xf32> to vector<2x256xf32>
    %80 = arith.mulf %79, %76 : vector<2x256xf32>
    %81 = arith.addf %75, %80 : vector<2x256xf32>
    %c56 = arith.constant 56 : index
    %c0_29 = arith.constant 0 : index
    %82 = vector.load %arg2[%c56, %c0_29] : memref<98x256xf32, #tpu.memory_space<vmem>>, vector<1x256xf32>
    %83 = vector.broadcast %82 : vector<1x256xf32> to vector<2x256xf32>
    %84 = arith.mulf %83, %77 : vector<2x256xf32>
    %85 = arith.addf %81, %84 : vector<2x256xf32>
    %c34_i32 = arith.constant 34 : i32
    %86 = tpu.dynamic_rotate %1 by %c34_i32 dim 1 : vector<2x256xf32>, i32 -> vector<2x256xf32>
    %c34_i32_30 = arith.constant 34 : i32
    %87 = tpu.dynamic_rotate %4 by %c34_i32_30 dim 1 : vector<2x256xf32>, i32 -> vector<2x256xf32>
    %c8 = arith.constant 8 : index
    %c0_31 = arith.constant 0 : index
    %88 = vector.load %arg2[%c8, %c0_31] : memref<98x256xf32, #tpu.memory_space<vmem>>, vector<1x256xf32>
    %89 = vector.broadcast %88 : vector<1x256xf32> to vector<2x256xf32>
    %90 = arith.mulf %89, %86 : vector<2x256xf32>
    %91 = arith.addf %85, %90 : vector<2x256xf32>
    %c57 = arith.constant 57 : index
    %c0_32 = arith.constant 0 : index
    %92 = vector.load %arg2[%c57, %c0_32] : memref<98x256xf32, #tpu.memory_space<vmem>>, vector<1x256xf32>
    %93 = vector.broadcast %92 : vector<1x256xf32> to vector<2x256xf32>
    %94 = arith.mulf %93, %87 : vector<2x256xf32>
    %95 = arith.addf %91, %94 : vector<2x256xf32>
    %c33_i32 = arith.constant 33 : i32
    %96 = tpu.dynamic_rotate %1 by %c33_i32 dim 1 : vector<2x256xf32>, i32 -> vector<2x256xf32>
    %c33_i32_33 = arith.constant 33 : i32
    %97 = tpu.dynamic_rotate %4 by %c33_i32_33 dim 1 : vector<2x256xf32>, i32 -> vector<2x256xf32>
    %c9 = arith.constant 9 : index
    %c0_34 = arith.constant 0 : index
    %98 = vector.load %arg2[%c9, %c0_34] : memref<98x256xf32, #tpu.memory_space<vmem>>, vector<1x256xf32>
    %99 = vector.broadcast %98 : vector<1x256xf32> to vector<2x256xf32>
    %100 = arith.mulf %99, %96 : vector<2x256xf32>
    %101 = arith.addf %95, %100 : vector<2x256xf32>
    %c58 = arith.constant 58 : index
    %c0_35 = arith.constant 0 : index
    %102 = vector.load %arg2[%c58, %c0_35] : memref<98x256xf32, #tpu.memory_space<vmem>>, vector<1x256xf32>
    %103 = vector.broadcast %102 : vector<1x256xf32> to vector<2x256xf32>
    %104 = arith.mulf %103, %97 : vector<2x256xf32>
    %105 = arith.addf %101, %104 : vector<2x256xf32>
    %c32_i32 = arith.constant 32 : i32
    %106 = tpu.dynamic_rotate %1 by %c32_i32 dim 1 : vector<2x256xf32>, i32 -> vector<2x256xf32>
    %c32_i32_36 = arith.constant 32 : i32
    %107 = tpu.dynamic_rotate %4 by %c32_i32_36 dim 1 : vector<2x256xf32>, i32 -> vector<2x256xf32>
    %c10 = arith.constant 10 : index
    %c0_37 = arith.constant 0 : index
    %108 = vector.load %arg2[%c10, %c0_37] : memref<98x256xf32, #tpu.memory_space<vmem>>, vector<1x256xf32>
    %109 = vector.broadcast %108 : vector<1x256xf32> to vector<2x256xf32>
    %110 = arith.mulf %109, %106 : vector<2x256xf32>
    %111 = arith.addf %105, %110 : vector<2x256xf32>
    %c59 = arith.constant 59 : index
    %c0_38 = arith.constant 0 : index
    %112 = vector.load %arg2[%c59, %c0_38] : memref<98x256xf32, #tpu.memory_space<vmem>>, vector<1x256xf32>
    %113 = vector.broadcast %112 : vector<1x256xf32> to vector<2x256xf32>
    %114 = arith.mulf %113, %107 : vector<2x256xf32>
    %115 = arith.addf %111, %114 : vector<2x256xf32>
    %c31_i32 = arith.constant 31 : i32
    %116 = tpu.dynamic_rotate %1 by %c31_i32 dim 1 : vector<2x256xf32>, i32 -> vector<2x256xf32>
    %c31_i32_39 = arith.constant 31 : i32
    %117 = tpu.dynamic_rotate %4 by %c31_i32_39 dim 1 : vector<2x256xf32>, i32 -> vector<2x256xf32>
    %c11 = arith.constant 11 : index
    %c0_40 = arith.constant 0 : index
    %118 = vector.load %arg2[%c11, %c0_40] : memref<98x256xf32, #tpu.memory_space<vmem>>, vector<1x256xf32>
    %119 = vector.broadcast %118 : vector<1x256xf32> to vector<2x256xf32>
    %120 = arith.mulf %119, %116 : vector<2x256xf32>
    %121 = arith.addf %115, %120 : vector<2x256xf32>
    %c60 = arith.constant 60 : index
    %c0_41 = arith.constant 0 : index
    %122 = vector.load %arg2[%c60, %c0_41] : memref<98x256xf32, #tpu.memory_space<vmem>>, vector<1x256xf32>
    %123 = vector.broadcast %122 : vector<1x256xf32> to vector<2x256xf32>
    %124 = arith.mulf %123, %117 : vector<2x256xf32>
    %125 = arith.addf %121, %124 : vector<2x256xf32>
    %c30_i32 = arith.constant 30 : i32
    %126 = tpu.dynamic_rotate %1 by %c30_i32 dim 1 : vector<2x256xf32>, i32 -> vector<2x256xf32>
    %c30_i32_42 = arith.constant 30 : i32
    %127 = tpu.dynamic_rotate %4 by %c30_i32_42 dim 1 : vector<2x256xf32>, i32 -> vector<2x256xf32>
    %c12 = arith.constant 12 : index
    %c0_43 = arith.constant 0 : index
    %128 = vector.load %arg2[%c12, %c0_43] : memref<98x256xf32, #tpu.memory_space<vmem>>, vector<1x256xf32>
    %129 = vector.broadcast %128 : vector<1x256xf32> to vector<2x256xf32>
    %130 = arith.mulf %129, %126 : vector<2x256xf32>
    %131 = arith.addf %125, %130 : vector<2x256xf32>
    %c61 = arith.constant 61 : index
    %c0_44 = arith.constant 0 : index
    %132 = vector.load %arg2[%c61, %c0_44] : memref<98x256xf32, #tpu.memory_space<vmem>>, vector<1x256xf32>
    %133 = vector.broadcast %132 : vector<1x256xf32> to vector<2x256xf32>
    %134 = arith.mulf %133, %127 : vector<2x256xf32>
    %135 = arith.addf %131, %134 : vector<2x256xf32>
    %c29_i32 = arith.constant 29 : i32
    %136 = tpu.dynamic_rotate %1 by %c29_i32 dim 1 : vector<2x256xf32>, i32 -> vector<2x256xf32>
    %c29_i32_45 = arith.constant 29 : i32
    %137 = tpu.dynamic_rotate %4 by %c29_i32_45 dim 1 : vector<2x256xf32>, i32 -> vector<2x256xf32>
    %c13 = arith.constant 13 : index
    %c0_46 = arith.constant 0 : index
    %138 = vector.load %arg2[%c13, %c0_46] : memref<98x256xf32, #tpu.memory_space<vmem>>, vector<1x256xf32>
    %139 = vector.broadcast %138 : vector<1x256xf32> to vector<2x256xf32>
    %140 = arith.mulf %139, %136 : vector<2x256xf32>
    %141 = arith.addf %135, %140 : vector<2x256xf32>
    %c62 = arith.constant 62 : index
    %c0_47 = arith.constant 0 : index
    %142 = vector.load %arg2[%c62, %c0_47] : memref<98x256xf32, #tpu.memory_space<vmem>>, vector<1x256xf32>
    %143 = vector.broadcast %142 : vector<1x256xf32> to vector<2x256xf32>
    %144 = arith.mulf %143, %137 : vector<2x256xf32>
    %145 = arith.addf %141, %144 : vector<2x256xf32>
    %c19_i32 = arith.constant 19 : i32
    %146 = tpu.dynamic_rotate %1 by %c19_i32 dim 1 : vector<2x256xf32>, i32 -> vector<2x256xf32>
    %c19_i32_48 = arith.constant 19 : i32
    %147 = tpu.dynamic_rotate %4 by %c19_i32_48 dim 1 : vector<2x256xf32>, i32 -> vector<2x256xf32>
    %c14 = arith.constant 14 : index
    %c0_49 = arith.constant 0 : index
    %148 = vector.load %arg2[%c14, %c0_49] : memref<98x256xf32, #tpu.memory_space<vmem>>, vector<1x256xf32>
    %149 = vector.broadcast %148 : vector<1x256xf32> to vector<2x256xf32>
    %150 = arith.mulf %149, %146 : vector<2x256xf32>
    %151 = arith.addf %145, %150 : vector<2x256xf32>
    %c63 = arith.constant 63 : index
    %c0_50 = arith.constant 0 : index
    %152 = vector.load %arg2[%c63, %c0_50] : memref<98x256xf32, #tpu.memory_space<vmem>>, vector<1x256xf32>
    %153 = vector.broadcast %152 : vector<1x256xf32> to vector<2x256xf32>
    %154 = arith.mulf %153, %147 : vector<2x256xf32>
    %155 = arith.addf %151, %154 : vector<2x256xf32>
    %c18_i32 = arith.constant 18 : i32
    %156 = tpu.dynamic_rotate %1 by %c18_i32 dim 1 : vector<2x256xf32>, i32 -> vector<2x256xf32>
    %c18_i32_51 = arith.constant 18 : i32
    %157 = tpu.dynamic_rotate %4 by %c18_i32_51 dim 1 : vector<2x256xf32>, i32 -> vector<2x256xf32>
    %c15 = arith.constant 15 : index
    %c0_52 = arith.constant 0 : index
    %158 = vector.load %arg2[%c15, %c0_52] : memref<98x256xf32, #tpu.memory_space<vmem>>, vector<1x256xf32>
    %159 = vector.broadcast %158 : vector<1x256xf32> to vector<2x256xf32>
    %160 = arith.mulf %159, %156 : vector<2x256xf32>
    %161 = arith.addf %155, %160 : vector<2x256xf32>
    %c64 = arith.constant 64 : index
    %c0_53 = arith.constant 0 : index
    %162 = vector.load %arg2[%c64, %c0_53] : memref<98x256xf32, #tpu.memory_space<vmem>>, vector<1x256xf32>
    %163 = vector.broadcast %162 : vector<1x256xf32> to vector<2x256xf32>
    %164 = arith.mulf %163, %157 : vector<2x256xf32>
    %165 = arith.addf %161, %164 : vector<2x256xf32>
    %c17_i32 = arith.constant 17 : i32
    %166 = tpu.dynamic_rotate %1 by %c17_i32 dim 1 : vector<2x256xf32>, i32 -> vector<2x256xf32>
    %c17_i32_54 = arith.constant 17 : i32
    %167 = tpu.dynamic_rotate %4 by %c17_i32_54 dim 1 : vector<2x256xf32>, i32 -> vector<2x256xf32>
    %c16 = arith.constant 16 : index
    %c0_55 = arith.constant 0 : index
    %168 = vector.load %arg2[%c16, %c0_55] : memref<98x256xf32, #tpu.memory_space<vmem>>, vector<1x256xf32>
    %169 = vector.broadcast %168 : vector<1x256xf32> to vector<2x256xf32>
    %170 = arith.mulf %169, %166 : vector<2x256xf32>
    %171 = arith.addf %165, %170 : vector<2x256xf32>
    %c65 = arith.constant 65 : index
    %c0_56 = arith.constant 0 : index
    %172 = vector.load %arg2[%c65, %c0_56] : memref<98x256xf32, #tpu.memory_space<vmem>>, vector<1x256xf32>
    %173 = vector.broadcast %172 : vector<1x256xf32> to vector<2x256xf32>
    %174 = arith.mulf %173, %167 : vector<2x256xf32>
    %175 = arith.addf %171, %174 : vector<2x256xf32>
    %c16_i32 = arith.constant 16 : i32
    %176 = tpu.dynamic_rotate %1 by %c16_i32 dim 1 : vector<2x256xf32>, i32 -> vector<2x256xf32>
    %c16_i32_57 = arith.constant 16 : i32
    %177 = tpu.dynamic_rotate %4 by %c16_i32_57 dim 1 : vector<2x256xf32>, i32 -> vector<2x256xf32>
    %c17 = arith.constant 17 : index
    %c0_58 = arith.constant 0 : index
    %178 = vector.load %arg2[%c17, %c0_58] : memref<98x256xf32, #tpu.memory_space<vmem>>, vector<1x256xf32>
    %179 = vector.broadcast %178 : vector<1x256xf32> to vector<2x256xf32>
    %180 = arith.mulf %179, %176 : vector<2x256xf32>
    %181 = arith.addf %175, %180 : vector<2x256xf32>
    %c66 = arith.constant 66 : index
    %c0_59 = arith.constant 0 : index
    %182 = vector.load %arg2[%c66, %c0_59] : memref<98x256xf32, #tpu.memory_space<vmem>>, vector<1x256xf32>
    %183 = vector.broadcast %182 : vector<1x256xf32> to vector<2x256xf32>
    %184 = arith.mulf %183, %177 : vector<2x256xf32>
    %185 = arith.addf %181, %184 : vector<2x256xf32>
    %c15_i32 = arith.constant 15 : i32
    %186 = tpu.dynamic_rotate %1 by %c15_i32 dim 1 : vector<2x256xf32>, i32 -> vector<2x256xf32>
    %c15_i32_60 = arith.constant 15 : i32
    %187 = tpu.dynamic_rotate %4 by %c15_i32_60 dim 1 : vector<2x256xf32>, i32 -> vector<2x256xf32>
    %c18 = arith.constant 18 : index
    %c0_61 = arith.constant 0 : index
    %188 = vector.load %arg2[%c18, %c0_61] : memref<98x256xf32, #tpu.memory_space<vmem>>, vector<1x256xf32>
    %189 = vector.broadcast %188 : vector<1x256xf32> to vector<2x256xf32>
    %190 = arith.mulf %189, %186 : vector<2x256xf32>
    %191 = arith.addf %185, %190 : vector<2x256xf32>
    %c67 = arith.constant 67 : index
    %c0_62 = arith.constant 0 : index
    %192 = vector.load %arg2[%c67, %c0_62] : memref<98x256xf32, #tpu.memory_space<vmem>>, vector<1x256xf32>
    %193 = vector.broadcast %192 : vector<1x256xf32> to vector<2x256xf32>
    %194 = arith.mulf %193, %187 : vector<2x256xf32>
    %195 = arith.addf %191, %194 : vector<2x256xf32>
    %c14_i32 = arith.constant 14 : i32
    %196 = tpu.dynamic_rotate %1 by %c14_i32 dim 1 : vector<2x256xf32>, i32 -> vector<2x256xf32>
    %c14_i32_63 = arith.constant 14 : i32
    %197 = tpu.dynamic_rotate %4 by %c14_i32_63 dim 1 : vector<2x256xf32>, i32 -> vector<2x256xf32>
    %c19 = arith.constant 19 : index
    %c0_64 = arith.constant 0 : index
    %198 = vector.load %arg2[%c19, %c0_64] : memref<98x256xf32, #tpu.memory_space<vmem>>, vector<1x256xf32>
    %199 = vector.broadcast %198 : vector<1x256xf32> to vector<2x256xf32>
    %200 = arith.mulf %199, %196 : vector<2x256xf32>
    %201 = arith.addf %195, %200 : vector<2x256xf32>
    %c68 = arith.constant 68 : index
    %c0_65 = arith.constant 0 : index
    %202 = vector.load %arg2[%c68, %c0_65] : memref<98x256xf32, #tpu.memory_space<vmem>>, vector<1x256xf32>
    %203 = vector.broadcast %202 : vector<1x256xf32> to vector<2x256xf32>
    %204 = arith.mulf %203, %197 : vector<2x256xf32>
    %205 = arith.addf %201, %204 : vector<2x256xf32>
    %c13_i32 = arith.constant 13 : i32
    %206 = tpu.dynamic_rotate %1 by %c13_i32 dim 1 : vector<2x256xf32>, i32 -> vector<2x256xf32>
    %c13_i32_66 = arith.constant 13 : i32
    %207 = tpu.dynamic_rotate %4 by %c13_i32_66 dim 1 : vector<2x256xf32>, i32 -> vector<2x256xf32>
    %c20 = arith.constant 20 : index
    %c0_67 = arith.constant 0 : index
    %208 = vector.load %arg2[%c20, %c0_67] : memref<98x256xf32, #tpu.memory_space<vmem>>, vector<1x256xf32>
    %209 = vector.broadcast %208 : vector<1x256xf32> to vector<2x256xf32>
    %210 = arith.mulf %209, %206 : vector<2x256xf32>
    %211 = arith.addf %205, %210 : vector<2x256xf32>
    %c69 = arith.constant 69 : index
    %c0_68 = arith.constant 0 : index
    %212 = vector.load %arg2[%c69, %c0_68] : memref<98x256xf32, #tpu.memory_space<vmem>>, vector<1x256xf32>
    %213 = vector.broadcast %212 : vector<1x256xf32> to vector<2x256xf32>
    %214 = arith.mulf %213, %207 : vector<2x256xf32>
    %215 = arith.addf %211, %214 : vector<2x256xf32>
    %c3_i32 = arith.constant 3 : i32
    %216 = tpu.dynamic_rotate %1 by %c3_i32 dim 1 : vector<2x256xf32>, i32 -> vector<2x256xf32>
    %c3_i32_69 = arith.constant 3 : i32
    %217 = tpu.dynamic_rotate %4 by %c3_i32_69 dim 1 : vector<2x256xf32>, i32 -> vector<2x256xf32>
    %c21 = arith.constant 21 : index
    %c0_70 = arith.constant 0 : index
    %218 = vector.load %arg2[%c21, %c0_70] : memref<98x256xf32, #tpu.memory_space<vmem>>, vector<1x256xf32>
    %219 = vector.broadcast %218 : vector<1x256xf32> to vector<2x256xf32>
    %220 = arith.mulf %219, %216 : vector<2x256xf32>
    %221 = arith.addf %215, %220 : vector<2x256xf32>
    %c70 = arith.constant 70 : index
    %c0_71 = arith.constant 0 : index
    %222 = vector.load %arg2[%c70, %c0_71] : memref<98x256xf32, #tpu.memory_space<vmem>>, vector<1x256xf32>
    %223 = vector.broadcast %222 : vector<1x256xf32> to vector<2x256xf32>
    %224 = arith.mulf %223, %217 : vector<2x256xf32>
    %225 = arith.addf %221, %224 : vector<2x256xf32>
    %c2_i32 = arith.constant 2 : i32
    %226 = tpu.dynamic_rotate %1 by %c2_i32 dim 1 : vector<2x256xf32>, i32 -> vector<2x256xf32>
    %c2_i32_72 = arith.constant 2 : i32
    %227 = tpu.dynamic_rotate %4 by %c2_i32_72 dim 1 : vector<2x256xf32>, i32 -> vector<2x256xf32>
    %c22 = arith.constant 22 : index
    %c0_73 = arith.constant 0 : index
    %228 = vector.load %arg2[%c22, %c0_73] : memref<98x256xf32, #tpu.memory_space<vmem>>, vector<1x256xf32>
    %229 = vector.broadcast %228 : vector<1x256xf32> to vector<2x256xf32>
    %230 = arith.mulf %229, %226 : vector<2x256xf32>
    %231 = arith.addf %225, %230 : vector<2x256xf32>
    %c71 = arith.constant 71 : index
    %c0_74 = arith.constant 0 : index
    %232 = vector.load %arg2[%c71, %c0_74] : memref<98x256xf32, #tpu.memory_space<vmem>>, vector<1x256xf32>
    %233 = vector.broadcast %232 : vector<1x256xf32> to vector<2x256xf32>
    %234 = arith.mulf %233, %227 : vector<2x256xf32>
    %235 = arith.addf %231, %234 : vector<2x256xf32>
    %c1_i32 = arith.constant 1 : i32
    %236 = tpu.dynamic_rotate %1 by %c1_i32 dim 1 : vector<2x256xf32>, i32 -> vector<2x256xf32>
    %c1_i32_75 = arith.constant 1 : i32
    %237 = tpu.dynamic_rotate %4 by %c1_i32_75 dim 1 : vector<2x256xf32>, i32 -> vector<2x256xf32>
    %c23 = arith.constant 23 : index
    %c0_76 = arith.constant 0 : index
    %238 = vector.load %arg2[%c23, %c0_76] : memref<98x256xf32, #tpu.memory_space<vmem>>, vector<1x256xf32>
    %239 = vector.broadcast %238 : vector<1x256xf32> to vector<2x256xf32>
    %240 = arith.mulf %239, %236 : vector<2x256xf32>
    %241 = arith.addf %235, %240 : vector<2x256xf32>
    %c72 = arith.constant 72 : index
    %c0_77 = arith.constant 0 : index
    %242 = vector.load %arg2[%c72, %c0_77] : memref<98x256xf32, #tpu.memory_space<vmem>>, vector<1x256xf32>
    %243 = vector.broadcast %242 : vector<1x256xf32> to vector<2x256xf32>
    %244 = arith.mulf %243, %237 : vector<2x256xf32>
    %245 = arith.addf %241, %244 : vector<2x256xf32>
    %c24 = arith.constant 24 : index
    %c0_78 = arith.constant 0 : index
    %246 = vector.load %arg2[%c24, %c0_78] : memref<98x256xf32, #tpu.memory_space<vmem>>, vector<1x256xf32>
    %247 = vector.broadcast %246 : vector<1x256xf32> to vector<2x256xf32>
    %248 = arith.mulf %247, %1 : vector<2x256xf32>
    %249 = arith.addf %245, %248 : vector<2x256xf32>
    %c73 = arith.constant 73 : index
    %c0_79 = arith.constant 0 : index
    %250 = vector.load %arg2[%c73, %c0_79] : memref<98x256xf32, #tpu.memory_space<vmem>>, vector<1x256xf32>
    %251 = vector.broadcast %250 : vector<1x256xf32> to vector<2x256xf32>
    %252 = arith.mulf %251, %4 : vector<2x256xf32>
    %253 = arith.addf %249, %252 : vector<2x256xf32>
    %c255_i32 = arith.constant 255 : i32
    %254 = tpu.dynamic_rotate %1 by %c255_i32 dim 1 : vector<2x256xf32>, i32 -> vector<2x256xf32>
    %c255_i32_80 = arith.constant 255 : i32
    %255 = tpu.dynamic_rotate %4 by %c255_i32_80 dim 1 : vector<2x256xf32>, i32 -> vector<2x256xf32>
    %c25 = arith.constant 25 : index
    %c0_81 = arith.constant 0 : index
    %256 = vector.load %arg2[%c25, %c0_81] : memref<98x256xf32, #tpu.memory_space<vmem>>, vector<1x256xf32>
    %257 = vector.broadcast %256 : vector<1x256xf32> to vector<2x256xf32>
    %258 = arith.mulf %257, %254 : vector<2x256xf32>
    %259 = arith.addf %253, %258 : vector<2x256xf32>
    %c74 = arith.constant 74 : index
    %c0_82 = arith.constant 0 : index
    %260 = vector.load %arg2[%c74, %c0_82] : memref<98x256xf32, #tpu.memory_space<vmem>>, vector<1x256xf32>
    %261 = vector.broadcast %260 : vector<1x256xf32> to vector<2x256xf32>
    %262 = arith.mulf %261, %255 : vector<2x256xf32>
    %263 = arith.addf %259, %262 : vector<2x256xf32>
    %c254_i32 = arith.constant 254 : i32
    %264 = tpu.dynamic_rotate %1 by %c254_i32 dim 1 : vector<2x256xf32>, i32 -> vector<2x256xf32>
    %c254_i32_83 = arith.constant 254 : i32
    %265 = tpu.dynamic_rotate %4 by %c254_i32_83 dim 1 : vector<2x256xf32>, i32 -> vector<2x256xf32>
    %c26 = arith.constant 26 : index
    %c0_84 = arith.constant 0 : index
    %266 = vector.load %arg2[%c26, %c0_84] : memref<98x256xf32, #tpu.memory_space<vmem>>, vector<1x256xf32>
    %267 = vector.broadcast %266 : vector<1x256xf32> to vector<2x256xf32>
    %268 = arith.mulf %267, %264 : vector<2x256xf32>
    %269 = arith.addf %263, %268 : vector<2x256xf32>
    %c75 = arith.constant 75 : index
    %c0_85 = arith.constant 0 : index
    %270 = vector.load %arg2[%c75, %c0_85] : memref<98x256xf32, #tpu.memory_space<vmem>>, vector<1x256xf32>
    %271 = vector.broadcast %270 : vector<1x256xf32> to vector<2x256xf32>
    %272 = arith.mulf %271, %265 : vector<2x256xf32>
    %273 = arith.addf %269, %272 : vector<2x256xf32>
    %c253_i32 = arith.constant 253 : i32
    %274 = tpu.dynamic_rotate %1 by %c253_i32 dim 1 : vector<2x256xf32>, i32 -> vector<2x256xf32>
    %c253_i32_86 = arith.constant 253 : i32
    %275 = tpu.dynamic_rotate %4 by %c253_i32_86 dim 1 : vector<2x256xf32>, i32 -> vector<2x256xf32>
    %c27 = arith.constant 27 : index
    %c0_87 = arith.constant 0 : index
    %276 = vector.load %arg2[%c27, %c0_87] : memref<98x256xf32, #tpu.memory_space<vmem>>, vector<1x256xf32>
    %277 = vector.broadcast %276 : vector<1x256xf32> to vector<2x256xf32>
    %278 = arith.mulf %277, %274 : vector<2x256xf32>
    %279 = arith.addf %273, %278 : vector<2x256xf32>
    %c76 = arith.constant 76 : index
    %c0_88 = arith.constant 0 : index
    %280 = vector.load %arg2[%c76, %c0_88] : memref<98x256xf32, #tpu.memory_space<vmem>>, vector<1x256xf32>
    %281 = vector.broadcast %280 : vector<1x256xf32> to vector<2x256xf32>
    %282 = arith.mulf %281, %275 : vector<2x256xf32>
    %283 = arith.addf %279, %282 : vector<2x256xf32>
    %c243_i32 = arith.constant 243 : i32
    %284 = tpu.dynamic_rotate %1 by %c243_i32 dim 1 : vector<2x256xf32>, i32 -> vector<2x256xf32>
    %c243_i32_89 = arith.constant 243 : i32
    %285 = tpu.dynamic_rotate %4 by %c243_i32_89 dim 1 : vector<2x256xf32>, i32 -> vector<2x256xf32>
    %c28 = arith.constant 28 : index
    %c0_90 = arith.constant 0 : index
    %286 = vector.load %arg2[%c28, %c0_90] : memref<98x256xf32, #tpu.memory_space<vmem>>, vector<1x256xf32>
    %287 = vector.broadcast %286 : vector<1x256xf32> to vector<2x256xf32>
    %288 = arith.mulf %287, %284 : vector<2x256xf32>
    %289 = arith.addf %283, %288 : vector<2x256xf32>
    %c77 = arith.constant 77 : index
    %c0_91 = arith.constant 0 : index
    %290 = vector.load %arg2[%c77, %c0_91] : memref<98x256xf32, #tpu.memory_space<vmem>>, vector<1x256xf32>
    %291 = vector.broadcast %290 : vector<1x256xf32> to vector<2x256xf32>
    %292 = arith.mulf %291, %285 : vector<2x256xf32>
    %293 = arith.addf %289, %292 : vector<2x256xf32>
    %c242_i32 = arith.constant 242 : i32
    %294 = tpu.dynamic_rotate %1 by %c242_i32 dim 1 : vector<2x256xf32>, i32 -> vector<2x256xf32>
    %c242_i32_92 = arith.constant 242 : i32
    %295 = tpu.dynamic_rotate %4 by %c242_i32_92 dim 1 : vector<2x256xf32>, i32 -> vector<2x256xf32>
    %c29 = arith.constant 29 : index
    %c0_93 = arith.constant 0 : index
    %296 = vector.load %arg2[%c29, %c0_93] : memref<98x256xf32, #tpu.memory_space<vmem>>, vector<1x256xf32>
    %297 = vector.broadcast %296 : vector<1x256xf32> to vector<2x256xf32>
    %298 = arith.mulf %297, %294 : vector<2x256xf32>
    %299 = arith.addf %293, %298 : vector<2x256xf32>
    %c78 = arith.constant 78 : index
    %c0_94 = arith.constant 0 : index
    %300 = vector.load %arg2[%c78, %c0_94] : memref<98x256xf32, #tpu.memory_space<vmem>>, vector<1x256xf32>
    %301 = vector.broadcast %300 : vector<1x256xf32> to vector<2x256xf32>
    %302 = arith.mulf %301, %295 : vector<2x256xf32>
    %303 = arith.addf %299, %302 : vector<2x256xf32>
    %c241_i32 = arith.constant 241 : i32
    %304 = tpu.dynamic_rotate %1 by %c241_i32 dim 1 : vector<2x256xf32>, i32 -> vector<2x256xf32>
    %c241_i32_95 = arith.constant 241 : i32
    %305 = tpu.dynamic_rotate %4 by %c241_i32_95 dim 1 : vector<2x256xf32>, i32 -> vector<2x256xf32>
    %c30 = arith.constant 30 : index
    %c0_96 = arith.constant 0 : index
    %306 = vector.load %arg2[%c30, %c0_96] : memref<98x256xf32, #tpu.memory_space<vmem>>, vector<1x256xf32>
    %307 = vector.broadcast %306 : vector<1x256xf32> to vector<2x256xf32>
    %308 = arith.mulf %307, %304 : vector<2x256xf32>
    %309 = arith.addf %303, %308 : vector<2x256xf32>
    %c79 = arith.constant 79 : index
    %c0_97 = arith.constant 0 : index
    %310 = vector.load %arg2[%c79, %c0_97] : memref<98x256xf32, #tpu.memory_space<vmem>>, vector<1x256xf32>
    %311 = vector.broadcast %310 : vector<1x256xf32> to vector<2x256xf32>
    %312 = arith.mulf %311, %305 : vector<2x256xf32>
    %313 = arith.addf %309, %312 : vector<2x256xf32>
    %c240_i32 = arith.constant 240 : i32
    %314 = tpu.dynamic_rotate %1 by %c240_i32 dim 1 : vector<2x256xf32>, i32 -> vector<2x256xf32>
    %c240_i32_98 = arith.constant 240 : i32
    %315 = tpu.dynamic_rotate %4 by %c240_i32_98 dim 1 : vector<2x256xf32>, i32 -> vector<2x256xf32>
    %c31 = arith.constant 31 : index
    %c0_99 = arith.constant 0 : index
    %316 = vector.load %arg2[%c31, %c0_99] : memref<98x256xf32, #tpu.memory_space<vmem>>, vector<1x256xf32>
    %317 = vector.broadcast %316 : vector<1x256xf32> to vector<2x256xf32>
    %318 = arith.mulf %317, %314 : vector<2x256xf32>
    %319 = arith.addf %313, %318 : vector<2x256xf32>
    %c80 = arith.constant 80 : index
    %c0_100 = arith.constant 0 : index
    %320 = vector.load %arg2[%c80, %c0_100] : memref<98x256xf32, #tpu.memory_space<vmem>>, vector<1x256xf32>
    %321 = vector.broadcast %320 : vector<1x256xf32> to vector<2x256xf32>
    %322 = arith.mulf %321, %315 : vector<2x256xf32>
    %323 = arith.addf %319, %322 : vector<2x256xf32>
    %c239_i32 = arith.constant 239 : i32
    %324 = tpu.dynamic_rotate %1 by %c239_i32 dim 1 : vector<2x256xf32>, i32 -> vector<2x256xf32>
    %c239_i32_101 = arith.constant 239 : i32
    %325 = tpu.dynamic_rotate %4 by %c239_i32_101 dim 1 : vector<2x256xf32>, i32 -> vector<2x256xf32>
    %c32 = arith.constant 32 : index
    %c0_102 = arith.constant 0 : index
    %326 = vector.load %arg2[%c32, %c0_102] : memref<98x256xf32, #tpu.memory_space<vmem>>, vector<1x256xf32>
    %327 = vector.broadcast %326 : vector<1x256xf32> to vector<2x256xf32>
    %328 = arith.mulf %327, %324 : vector<2x256xf32>
    %329 = arith.addf %323, %328 : vector<2x256xf32>
    %c81 = arith.constant 81 : index
    %c0_103 = arith.constant 0 : index
    %330 = vector.load %arg2[%c81, %c0_103] : memref<98x256xf32, #tpu.memory_space<vmem>>, vector<1x256xf32>
    %331 = vector.broadcast %330 : vector<1x256xf32> to vector<2x256xf32>
    %332 = arith.mulf %331, %325 : vector<2x256xf32>
    %333 = arith.addf %329, %332 : vector<2x256xf32>
    %c238_i32 = arith.constant 238 : i32
    %334 = tpu.dynamic_rotate %1 by %c238_i32 dim 1 : vector<2x256xf32>, i32 -> vector<2x256xf32>
    %c238_i32_104 = arith.constant 238 : i32
    %335 = tpu.dynamic_rotate %4 by %c238_i32_104 dim 1 : vector<2x256xf32>, i32 -> vector<2x256xf32>
    %c33 = arith.constant 33 : index
    %c0_105 = arith.constant 0 : index
    %336 = vector.load %arg2[%c33, %c0_105] : memref<98x256xf32, #tpu.memory_space<vmem>>, vector<1x256xf32>
    %337 = vector.broadcast %336 : vector<1x256xf32> to vector<2x256xf32>
    %338 = arith.mulf %337, %334 : vector<2x256xf32>
    %339 = arith.addf %333, %338 : vector<2x256xf32>
    %c82 = arith.constant 82 : index
    %c0_106 = arith.constant 0 : index
    %340 = vector.load %arg2[%c82, %c0_106] : memref<98x256xf32, #tpu.memory_space<vmem>>, vector<1x256xf32>
    %341 = vector.broadcast %340 : vector<1x256xf32> to vector<2x256xf32>
    %342 = arith.mulf %341, %335 : vector<2x256xf32>
    %343 = arith.addf %339, %342 : vector<2x256xf32>
    %c237_i32 = arith.constant 237 : i32
    %344 = tpu.dynamic_rotate %1 by %c237_i32 dim 1 : vector<2x256xf32>, i32 -> vector<2x256xf32>
    %c237_i32_107 = arith.constant 237 : i32
    %345 = tpu.dynamic_rotate %4 by %c237_i32_107 dim 1 : vector<2x256xf32>, i32 -> vector<2x256xf32>
    %c34 = arith.constant 34 : index
    %c0_108 = arith.constant 0 : index
    %346 = vector.load %arg2[%c34, %c0_108] : memref<98x256xf32, #tpu.memory_space<vmem>>, vector<1x256xf32>
    %347 = vector.broadcast %346 : vector<1x256xf32> to vector<2x256xf32>
    %348 = arith.mulf %347, %344 : vector<2x256xf32>
    %349 = arith.addf %343, %348 : vector<2x256xf32>
    %c83 = arith.constant 83 : index
    %c0_109 = arith.constant 0 : index
    %350 = vector.load %arg2[%c83, %c0_109] : memref<98x256xf32, #tpu.memory_space<vmem>>, vector<1x256xf32>
    %351 = vector.broadcast %350 : vector<1x256xf32> to vector<2x256xf32>
    %352 = arith.mulf %351, %345 : vector<2x256xf32>
    %353 = arith.addf %349, %352 : vector<2x256xf32>
    %c227_i32 = arith.constant 227 : i32
    %354 = tpu.dynamic_rotate %1 by %c227_i32 dim 1 : vector<2x256xf32>, i32 -> vector<2x256xf32>
    %c227_i32_110 = arith.constant 227 : i32
    %355 = tpu.dynamic_rotate %4 by %c227_i32_110 dim 1 : vector<2x256xf32>, i32 -> vector<2x256xf32>
    %c35 = arith.constant 35 : index
    %c0_111 = arith.constant 0 : index
    %356 = vector.load %arg2[%c35, %c0_111] : memref<98x256xf32, #tpu.memory_space<vmem>>, vector<1x256xf32>
    %357 = vector.broadcast %356 : vector<1x256xf32> to vector<2x256xf32>
    %358 = arith.mulf %357, %354 : vector<2x256xf32>
    %359 = arith.addf %353, %358 : vector<2x256xf32>
    %c84 = arith.constant 84 : index
    %c0_112 = arith.constant 0 : index
    %360 = vector.load %arg2[%c84, %c0_112] : memref<98x256xf32, #tpu.memory_space<vmem>>, vector<1x256xf32>
    %361 = vector.broadcast %360 : vector<1x256xf32> to vector<2x256xf32>
    %362 = arith.mulf %361, %355 : vector<2x256xf32>
    %363 = arith.addf %359, %362 : vector<2x256xf32>
    %c226_i32 = arith.constant 226 : i32
    %364 = tpu.dynamic_rotate %1 by %c226_i32 dim 1 : vector<2x256xf32>, i32 -> vector<2x256xf32>
    %c226_i32_113 = arith.constant 226 : i32
    %365 = tpu.dynamic_rotate %4 by %c226_i32_113 dim 1 : vector<2x256xf32>, i32 -> vector<2x256xf32>
    %c36 = arith.constant 36 : index
    %c0_114 = arith.constant 0 : index
    %366 = vector.load %arg2[%c36, %c0_114] : memref<98x256xf32, #tpu.memory_space<vmem>>, vector<1x256xf32>
    %367 = vector.broadcast %366 : vector<1x256xf32> to vector<2x256xf32>
    %368 = arith.mulf %367, %364 : vector<2x256xf32>
    %369 = arith.addf %363, %368 : vector<2x256xf32>
    %c85 = arith.constant 85 : index
    %c0_115 = arith.constant 0 : index
    %370 = vector.load %arg2[%c85, %c0_115] : memref<98x256xf32, #tpu.memory_space<vmem>>, vector<1x256xf32>
    %371 = vector.broadcast %370 : vector<1x256xf32> to vector<2x256xf32>
    %372 = arith.mulf %371, %365 : vector<2x256xf32>
    %373 = arith.addf %369, %372 : vector<2x256xf32>
    %c225_i32 = arith.constant 225 : i32
    %374 = tpu.dynamic_rotate %1 by %c225_i32 dim 1 : vector<2x256xf32>, i32 -> vector<2x256xf32>
    %c225_i32_116 = arith.constant 225 : i32
    %375 = tpu.dynamic_rotate %4 by %c225_i32_116 dim 1 : vector<2x256xf32>, i32 -> vector<2x256xf32>
    %c37 = arith.constant 37 : index
    %c0_117 = arith.constant 0 : index
    %376 = vector.load %arg2[%c37, %c0_117] : memref<98x256xf32, #tpu.memory_space<vmem>>, vector<1x256xf32>
    %377 = vector.broadcast %376 : vector<1x256xf32> to vector<2x256xf32>
    %378 = arith.mulf %377, %374 : vector<2x256xf32>
    %379 = arith.addf %373, %378 : vector<2x256xf32>
    %c86 = arith.constant 86 : index
    %c0_118 = arith.constant 0 : index
    %380 = vector.load %arg2[%c86, %c0_118] : memref<98x256xf32, #tpu.memory_space<vmem>>, vector<1x256xf32>
    %381 = vector.broadcast %380 : vector<1x256xf32> to vector<2x256xf32>
    %382 = arith.mulf %381, %375 : vector<2x256xf32>
    %383 = arith.addf %379, %382 : vector<2x256xf32>
    %c224_i32 = arith.constant 224 : i32
    %384 = tpu.dynamic_rotate %1 by %c224_i32 dim 1 : vector<2x256xf32>, i32 -> vector<2x256xf32>
    %c224_i32_119 = arith.constant 224 : i32
    %385 = tpu.dynamic_rotate %4 by %c224_i32_119 dim 1 : vector<2x256xf32>, i32 -> vector<2x256xf32>
    %c38 = arith.constant 38 : index
    %c0_120 = arith.constant 0 : index
    %386 = vector.load %arg2[%c38, %c0_120] : memref<98x256xf32, #tpu.memory_space<vmem>>, vector<1x256xf32>
    %387 = vector.broadcast %386 : vector<1x256xf32> to vector<2x256xf32>
    %388 = arith.mulf %387, %384 : vector<2x256xf32>
    %389 = arith.addf %383, %388 : vector<2x256xf32>
    %c87 = arith.constant 87 : index
    %c0_121 = arith.constant 0 : index
    %390 = vector.load %arg2[%c87, %c0_121] : memref<98x256xf32, #tpu.memory_space<vmem>>, vector<1x256xf32>
    %391 = vector.broadcast %390 : vector<1x256xf32> to vector<2x256xf32>
    %392 = arith.mulf %391, %385 : vector<2x256xf32>
    %393 = arith.addf %389, %392 : vector<2x256xf32>
    %c223_i32 = arith.constant 223 : i32
    %394 = tpu.dynamic_rotate %1 by %c223_i32 dim 1 : vector<2x256xf32>, i32 -> vector<2x256xf32>
    %c223_i32_122 = arith.constant 223 : i32
    %395 = tpu.dynamic_rotate %4 by %c223_i32_122 dim 1 : vector<2x256xf32>, i32 -> vector<2x256xf32>
    %c39 = arith.constant 39 : index
    %c0_123 = arith.constant 0 : index
    %396 = vector.load %arg2[%c39, %c0_123] : memref<98x256xf32, #tpu.memory_space<vmem>>, vector<1x256xf32>
    %397 = vector.broadcast %396 : vector<1x256xf32> to vector<2x256xf32>
    %398 = arith.mulf %397, %394 : vector<2x256xf32>
    %399 = arith.addf %393, %398 : vector<2x256xf32>
    %c88 = arith.constant 88 : index
    %c0_124 = arith.constant 0 : index
    %400 = vector.load %arg2[%c88, %c0_124] : memref<98x256xf32, #tpu.memory_space<vmem>>, vector<1x256xf32>
    %401 = vector.broadcast %400 : vector<1x256xf32> to vector<2x256xf32>
    %402 = arith.mulf %401, %395 : vector<2x256xf32>
    %403 = arith.addf %399, %402 : vector<2x256xf32>
    %c222_i32 = arith.constant 222 : i32
    %404 = tpu.dynamic_rotate %1 by %c222_i32 dim 1 : vector<2x256xf32>, i32 -> vector<2x256xf32>
    %c222_i32_125 = arith.constant 222 : i32
    %405 = tpu.dynamic_rotate %4 by %c222_i32_125 dim 1 : vector<2x256xf32>, i32 -> vector<2x256xf32>
    %c40 = arith.constant 40 : index
    %c0_126 = arith.constant 0 : index
    %406 = vector.load %arg2[%c40, %c0_126] : memref<98x256xf32, #tpu.memory_space<vmem>>, vector<1x256xf32>
    %407 = vector.broadcast %406 : vector<1x256xf32> to vector<2x256xf32>
    %408 = arith.mulf %407, %404 : vector<2x256xf32>
    %409 = arith.addf %403, %408 : vector<2x256xf32>
    %c89 = arith.constant 89 : index
    %c0_127 = arith.constant 0 : index
    %410 = vector.load %arg2[%c89, %c0_127] : memref<98x256xf32, #tpu.memory_space<vmem>>, vector<1x256xf32>
    %411 = vector.broadcast %410 : vector<1x256xf32> to vector<2x256xf32>
    %412 = arith.mulf %411, %405 : vector<2x256xf32>
    %413 = arith.addf %409, %412 : vector<2x256xf32>
    %c221_i32 = arith.constant 221 : i32
    %414 = tpu.dynamic_rotate %1 by %c221_i32 dim 1 : vector<2x256xf32>, i32 -> vector<2x256xf32>
    %c221_i32_128 = arith.constant 221 : i32
    %415 = tpu.dynamic_rotate %4 by %c221_i32_128 dim 1 : vector<2x256xf32>, i32 -> vector<2x256xf32>
    %c41 = arith.constant 41 : index
    %c0_129 = arith.constant 0 : index
    %416 = vector.load %arg2[%c41, %c0_129] : memref<98x256xf32, #tpu.memory_space<vmem>>, vector<1x256xf32>
    %417 = vector.broadcast %416 : vector<1x256xf32> to vector<2x256xf32>
    %418 = arith.mulf %417, %414 : vector<2x256xf32>
    %419 = arith.addf %413, %418 : vector<2x256xf32>
    %c90 = arith.constant 90 : index
    %c0_130 = arith.constant 0 : index
    %420 = vector.load %arg2[%c90, %c0_130] : memref<98x256xf32, #tpu.memory_space<vmem>>, vector<1x256xf32>
    %421 = vector.broadcast %420 : vector<1x256xf32> to vector<2x256xf32>
    %422 = arith.mulf %421, %415 : vector<2x256xf32>
    %423 = arith.addf %419, %422 : vector<2x256xf32>
    %c211_i32 = arith.constant 211 : i32
    %424 = tpu.dynamic_rotate %1 by %c211_i32 dim 1 : vector<2x256xf32>, i32 -> vector<2x256xf32>
    %c211_i32_131 = arith.constant 211 : i32
    %425 = tpu.dynamic_rotate %4 by %c211_i32_131 dim 1 : vector<2x256xf32>, i32 -> vector<2x256xf32>
    %c42 = arith.constant 42 : index
    %c0_132 = arith.constant 0 : index
    %426 = vector.load %arg2[%c42, %c0_132] : memref<98x256xf32, #tpu.memory_space<vmem>>, vector<1x256xf32>
    %427 = vector.broadcast %426 : vector<1x256xf32> to vector<2x256xf32>
    %428 = arith.mulf %427, %424 : vector<2x256xf32>
    %429 = arith.addf %423, %428 : vector<2x256xf32>
    %c91 = arith.constant 91 : index
    %c0_133 = arith.constant 0 : index
    %430 = vector.load %arg2[%c91, %c0_133] : memref<98x256xf32, #tpu.memory_space<vmem>>, vector<1x256xf32>
    %431 = vector.broadcast %430 : vector<1x256xf32> to vector<2x256xf32>
    %432 = arith.mulf %431, %425 : vector<2x256xf32>
    %433 = arith.addf %429, %432 : vector<2x256xf32>
    %c210_i32 = arith.constant 210 : i32
    %434 = tpu.dynamic_rotate %1 by %c210_i32 dim 1 : vector<2x256xf32>, i32 -> vector<2x256xf32>
    %c210_i32_134 = arith.constant 210 : i32
    %435 = tpu.dynamic_rotate %4 by %c210_i32_134 dim 1 : vector<2x256xf32>, i32 -> vector<2x256xf32>
    %c43 = arith.constant 43 : index
    %c0_135 = arith.constant 0 : index
    %436 = vector.load %arg2[%c43, %c0_135] : memref<98x256xf32, #tpu.memory_space<vmem>>, vector<1x256xf32>
    %437 = vector.broadcast %436 : vector<1x256xf32> to vector<2x256xf32>
    %438 = arith.mulf %437, %434 : vector<2x256xf32>
    %439 = arith.addf %433, %438 : vector<2x256xf32>
    %c92 = arith.constant 92 : index
    %c0_136 = arith.constant 0 : index
    %440 = vector.load %arg2[%c92, %c0_136] : memref<98x256xf32, #tpu.memory_space<vmem>>, vector<1x256xf32>
    %441 = vector.broadcast %440 : vector<1x256xf32> to vector<2x256xf32>
    %442 = arith.mulf %441, %435 : vector<2x256xf32>
    %443 = arith.addf %439, %442 : vector<2x256xf32>
    %c209_i32 = arith.constant 209 : i32
    %444 = tpu.dynamic_rotate %1 by %c209_i32 dim 1 : vector<2x256xf32>, i32 -> vector<2x256xf32>
    %c209_i32_137 = arith.constant 209 : i32
    %445 = tpu.dynamic_rotate %4 by %c209_i32_137 dim 1 : vector<2x256xf32>, i32 -> vector<2x256xf32>
    %c44 = arith.constant 44 : index
    %c0_138 = arith.constant 0 : index
    %446 = vector.load %arg2[%c44, %c0_138] : memref<98x256xf32, #tpu.memory_space<vmem>>, vector<1x256xf32>
    %447 = vector.broadcast %446 : vector<1x256xf32> to vector<2x256xf32>
    %448 = arith.mulf %447, %444 : vector<2x256xf32>
    %449 = arith.addf %443, %448 : vector<2x256xf32>
    %c93 = arith.constant 93 : index
    %c0_139 = arith.constant 0 : index
    %450 = vector.load %arg2[%c93, %c0_139] : memref<98x256xf32, #tpu.memory_space<vmem>>, vector<1x256xf32>
    %451 = vector.broadcast %450 : vector<1x256xf32> to vector<2x256xf32>
    %452 = arith.mulf %451, %445 : vector<2x256xf32>
    %453 = arith.addf %449, %452 : vector<2x256xf32>
    %c208_i32 = arith.constant 208 : i32
    %454 = tpu.dynamic_rotate %1 by %c208_i32 dim 1 : vector<2x256xf32>, i32 -> vector<2x256xf32>
    %c208_i32_140 = arith.constant 208 : i32
    %455 = tpu.dynamic_rotate %4 by %c208_i32_140 dim 1 : vector<2x256xf32>, i32 -> vector<2x256xf32>
    %c45 = arith.constant 45 : index
    %c0_141 = arith.constant 0 : index
    %456 = vector.load %arg2[%c45, %c0_141] : memref<98x256xf32, #tpu.memory_space<vmem>>, vector<1x256xf32>
    %457 = vector.broadcast %456 : vector<1x256xf32> to vector<2x256xf32>
    %458 = arith.mulf %457, %454 : vector<2x256xf32>
    %459 = arith.addf %453, %458 : vector<2x256xf32>
    %c94 = arith.constant 94 : index
    %c0_142 = arith.constant 0 : index
    %460 = vector.load %arg2[%c94, %c0_142] : memref<98x256xf32, #tpu.memory_space<vmem>>, vector<1x256xf32>
    %461 = vector.broadcast %460 : vector<1x256xf32> to vector<2x256xf32>
    %462 = arith.mulf %461, %455 : vector<2x256xf32>
    %463 = arith.addf %459, %462 : vector<2x256xf32>
    %c207_i32 = arith.constant 207 : i32
    %464 = tpu.dynamic_rotate %1 by %c207_i32 dim 1 : vector<2x256xf32>, i32 -> vector<2x256xf32>
    %c207_i32_143 = arith.constant 207 : i32
    %465 = tpu.dynamic_rotate %4 by %c207_i32_143 dim 1 : vector<2x256xf32>, i32 -> vector<2x256xf32>
    %c46 = arith.constant 46 : index
    %c0_144 = arith.constant 0 : index
    %466 = vector.load %arg2[%c46, %c0_144] : memref<98x256xf32, #tpu.memory_space<vmem>>, vector<1x256xf32>
    %467 = vector.broadcast %466 : vector<1x256xf32> to vector<2x256xf32>
    %468 = arith.mulf %467, %464 : vector<2x256xf32>
    %469 = arith.addf %463, %468 : vector<2x256xf32>
    %c95 = arith.constant 95 : index
    %c0_145 = arith.constant 0 : index
    %470 = vector.load %arg2[%c95, %c0_145] : memref<98x256xf32, #tpu.memory_space<vmem>>, vector<1x256xf32>
    %471 = vector.broadcast %470 : vector<1x256xf32> to vector<2x256xf32>
    %472 = arith.mulf %471, %465 : vector<2x256xf32>
    %473 = arith.addf %469, %472 : vector<2x256xf32>
    %c206_i32 = arith.constant 206 : i32
    %474 = tpu.dynamic_rotate %1 by %c206_i32 dim 1 : vector<2x256xf32>, i32 -> vector<2x256xf32>
    %c206_i32_146 = arith.constant 206 : i32
    %475 = tpu.dynamic_rotate %4 by %c206_i32_146 dim 1 : vector<2x256xf32>, i32 -> vector<2x256xf32>
    %c47 = arith.constant 47 : index
    %c0_147 = arith.constant 0 : index
    %476 = vector.load %arg2[%c47, %c0_147] : memref<98x256xf32, #tpu.memory_space<vmem>>, vector<1x256xf32>
    %477 = vector.broadcast %476 : vector<1x256xf32> to vector<2x256xf32>
    %478 = arith.mulf %477, %474 : vector<2x256xf32>
    %479 = arith.addf %473, %478 : vector<2x256xf32>
    %c96 = arith.constant 96 : index
    %c0_148 = arith.constant 0 : index
    %480 = vector.load %arg2[%c96, %c0_148] : memref<98x256xf32, #tpu.memory_space<vmem>>, vector<1x256xf32>
    %481 = vector.broadcast %480 : vector<1x256xf32> to vector<2x256xf32>
    %482 = arith.mulf %481, %475 : vector<2x256xf32>
    %483 = arith.addf %479, %482 : vector<2x256xf32>
    %c205_i32 = arith.constant 205 : i32
    %484 = tpu.dynamic_rotate %1 by %c205_i32 dim 1 : vector<2x256xf32>, i32 -> vector<2x256xf32>
    %c205_i32_149 = arith.constant 205 : i32
    %485 = tpu.dynamic_rotate %4 by %c205_i32_149 dim 1 : vector<2x256xf32>, i32 -> vector<2x256xf32>
    %c48 = arith.constant 48 : index
    %c0_150 = arith.constant 0 : index
    %486 = vector.load %arg2[%c48, %c0_150] : memref<98x256xf32, #tpu.memory_space<vmem>>, vector<1x256xf32>
    %487 = vector.broadcast %486 : vector<1x256xf32> to vector<2x256xf32>
    %488 = arith.mulf %487, %484 : vector<2x256xf32>
    %489 = arith.addf %483, %488 : vector<2x256xf32>
    %c97 = arith.constant 97 : index
    %c0_151 = arith.constant 0 : index
    %490 = vector.load %arg2[%c97, %c0_151] : memref<98x256xf32, #tpu.memory_space<vmem>>, vector<1x256xf32>
    %491 = vector.broadcast %490 : vector<1x256xf32> to vector<2x256xf32>
    %492 = arith.mulf %491, %485 : vector<2x256xf32>
    %493 = arith.addf %489, %492 : vector<2x256xf32>
    %c0_152 = arith.constant 0 : index
    %494 = memref.load %arg3[%c0_152] : memref<4xf32, #tpu.memory_space<smem>>
    %c1_153 = arith.constant 1 : index
    %495 = memref.load %arg3[%c1_153] : memref<4xf32, #tpu.memory_space<smem>>
    %c2_154 = arith.constant 2 : index
    %496 = memref.load %arg3[%c2_154] : memref<4xf32, #tpu.memory_space<smem>>
    %c3_155 = arith.constant 3 : index
    %497 = memref.load %arg3[%c3_155] : memref<4xf32, #tpu.memory_space<smem>>
    %498 = vector.broadcast %496 : f32 to vector<2x256xf32>
    %499 = arith.subf %493, %498 : vector<2x256xf32>
    %cst_156 = arith.constant 9.99999974E-6 : f32
    %500 = arith.addf %497, %cst_156 : f32
    %501 = math.rsqrt %500 : f32
    %502 = vector.broadcast %501 : f32 to vector<2x256xf32>
    %503 = arith.mulf %499, %502 : vector<2x256xf32>
    %504 = vector.broadcast %494 : f32 to vector<2x256xf32>
    %505 = arith.mulf %503, %504 : vector<2x256xf32>
    %506 = vector.broadcast %495 : f32 to vector<2x256xf32>
    %507 = arith.addf %505, %506 : vector<2x256xf32>
    %508 = arith.negf %507 : vector<2x256xf32>
    %509 = math.exp %508 : vector<2x256xf32>
    %cst_157 = arith.constant 1.000000e+00 : f32
    %510 = vector.broadcast %cst_157 : f32 to vector<2x256xf32>
    %511 = arith.addf %510, %509 : vector<2x256xf32>
    %512 = arith.divf %510, %511 : vector<2x256xf32>
    %513 = vector.shape_cast %512 : vector<2x256xf32> to vector<2x1x256xf32>
    %514 = vector.broadcast %513 : vector<2x1x256xf32> to vector<2x4x256xf32>
    %515 = arith.mulf %0, %514 : vector<2x4x256xf32>
    %c0_158 = arith.constant 0 : index
    %c0_159 = arith.constant 0 : index
    %c0_160 = arith.constant 0 : index
    %516 = vector.load %arg4[%c0_158, %c0_159, %c0_160] : memref<2x4x256xf32, #tpu.memory_space<vmem>>, vector<2x4x256xf32>
    tpu.vector_store %arg4[%c0_158, %c0_159, %c0_160], %515 {strides = array<i32>} : memref<2x4x256xf32, #tpu.memory_space<vmem>>, vector<2x4x256xf32>,
    return
  }
  func.func @transform_0(%arg0: i32) -> (i32, i32, i32) {
    %c0_i32 = arith.constant 0 : i32
    %c0_i32_0 = arith.constant 0 : i32
    %c0_i32_1 = arith.constant 0 : i32
    return %arg0, %c0_i32, %c0_i32_0 : i32, i32, i32
  }
  func.func @transform_1(%arg0: i32) -> (i32, i32) {
    %c0_i32 = arith.constant 0 : i32
    %c0_i32_0 = arith.constant 0 : i32
    %c0_i32_1 = arith.constant 0 : i32
    return %c0_i32, %c0_i32_0 : i32, i32
  }
  func.func @transform_2(%arg0: i32) -> i32 {
    %c0_i32 = arith.constant 0 : i32
    %c0_i32_0 = arith.constant 0 : i32
    return %c0_i32 : i32
  }
  func.func @transform_3(%arg0: i32) -> (i32, i32, i32) {
    %c0_i32 = arith.constant 0 : i32
    %c0_i32_0 = arith.constant 0 : i32
    %c0_i32_1 = arith.constant 0 : i32
    return %arg0, %c0_i32, %c0_i32_0 : i32, i32, i32
  }
}

</mosaic_0001>

<bundles_post_ra>
// kernel: tpu_custom_call.1
= control target key start
LH: loop header
LB: loop body
LE: loop exit
PB: predicated region body
PF: predicated region fallthrough
CT: control target
= control target key end

     0   :  { %8 = vsyncpa [#allocation3], 0  ;;  %s4629_s0 = inlined_call_operand.hbm [shape: f32[2,4,256], index: 0, kind: input, shape index: {}]   ;;  %s4630_s1 = inlined_call_operand.hbm [shape: f32[98,256], index: 1, kind: input, shape index: {}]   ;;  %s4631_s2 = inlined_call_operand.vmem [shape: f32[4], index: 2, kind: input, shape index: {}]   ;;  %s4632_s3 = inlined_call_operand.hbm [shape: f32[2,4,256], index: 3, kind: output, shape index: {}]  }
   0x1   :  { %9 = vsyncpa [#allocation7], 0 }
   0x2   :  { %10 = vsyncpa [#allocation5], 0 }
   0x3   :  { %11 = vsyncpa [#allocation4], 0  ;;  %s2696_s12 = smov [#allocation2]   ;;  %s2610_s16 = scalar_lea.hbm %s4629_s0, 256 }
   0x4   :  { %s17_s13 = sshll.u32 %s2696_s12, 4  ;;  %p2611_p0 = scmp.ne.s32.totalorder %s4629_s0, %s2610_s16  ;;  %s18_s13 = int_to_ptr.vmem [resolvable:$true] %s17_s13 }
   0x5   :  { %p2614_p1 = scmp.lt.u32.totalorder %s2610_s16, %s4629_s0 }
   0x7   :  { %p2616_p2 = pnand %p2614_p1, %p2611_p0 }
   0x9   :  { %2619 = shalt.err (!%p2616_p2)
}
   0xa   :  { %s2620_s21 = scalar_lea.vmem %s18_s13, 256  ;;  %p2625_p4 = scmp.lt.s32.totalorder %s18_s13, %s18_s13 }
   0xb   :  { %p2621_p3 = scmp.ne.s32.totalorder %s18_s13, %s2620_s21  ;;  %p2626_p5 = scmp.lt.s32.totalorder %s2620_s21, %s2620_s21 }
   0xd   :  { %p2627_p6 = por %p2626_p5, %p2625_p4 }
   0xf   :  { %p2628_p7 = pnand %p2627_p6, %p2621_p3 }
  0x11   :  { %2631 = shalt.err (!%p2628_p7)
}
  0x12   :  { %s2697_s22 = smov 128   ;;  %s2698_s23 = smov 8  }
  0x13   :  { %23 = dma.hbm_to_vmem [thread:$0]  %s4629_s0, 256, %s18_s13, [#allocation3], %s2697_s22, %s2697_s22, %s2698_s23  }
  0x14   :  { %s2699_s26 = smov [#allocation6]   ;;  %s2632_s30 = scalar_lea.hbm %s4630_s1, 3328 }
  0x15   :  { %s29_s27 = sshll.u32 %s2699_s26, 4  ;;  %p2633_p8 = scmp.ne.s32.totalorder %s4630_s1, %s2632_s30  ;;  %s30_s27 = int_to_ptr.vmem [resolvable:$true] %s29_s27 }
  0x16   :  { %p2636_p9 = scmp.lt.u32.totalorder %s2632_s30, %s4630_s1 }
  0x18   :  { %p2638_p10 = pnand %p2636_p9, %p2633_p8 }
  0x1a   :  { %2641 = shalt.err (!%p2638_p10)
}
  0x1b   :  { %s2642_s8 = scalar_lea.vmem %s30_s27, 3328  ;;  %p2647_p12 = scmp.lt.s32.totalorder %s30_s27, %s30_s27 }
  0x1c   :  { %p2643_p11 = scmp.ne.s32.totalorder %s30_s27, %s2642_s8  ;;  %p2648_p13 = scmp.lt.s32.totalorder %s2642_s8, %s2642_s8 }
  0x1e   :  { %p2649_p0 = por %p2648_p13, %p2647_p12 }
  0x20   :  { %p2650_p1 = pnand %p2649_p0, %p2643_p11 }
  0x22   :  { %2653 = shalt.err (!%p2650_p1)
}
  0x23   :  { %s2700_s0 = smov 256   ;;  %s2701_s9 = smov 16  }
  0x24   :  { %35 = dma.hbm_to_vmem [thread:$0]  %s4630_s1, 3328, %s30_s27, [#allocation7], %s2700_s0, %s2700_s0, %s2701_s9  }
  0x25   :  { %s42_s14 = sshll.u32 %s4631_s2, 4  ;;  %s43_s14 = int_to_ptr.vmem [resolvable:$true] %s42_s14 }
  0x26   :  { %s2654_s15 = scalar_lea.vmem %s43_s14, 16  ;;  %p2659_p3 = scmp.lt.s32.totalorder %s43_s14, %s43_s14 }
  0x27   :  { %p2655_p2 = scmp.ne.s32.totalorder %s43_s14, %s2654_s15  ;;  %p2660_p4 = scmp.lt.s32.totalorder %s2654_s15, %s2654_s15 }
  0x29   :  { %p2661_p5 = por %p2660_p4, %p2659_p3 }
  0x2b   :  { %p2662_p6 = pnand %p2661_p5, %p2655_p2 }
  0x2d   :  { %2665 = shalt.err (!%p2662_p6)
}
  0x2e   :  { %s2702_s16 = smov [#allocation8]  }
  0x2f   :  { %45 = dma.vmem_to_smem %s43_s14, 16, %s2702_s16, [#allocation5]  }
  0x30   :  { %2688 = dma.done.wait [#allocation3], 256  }
  0x31   :  { %2689 = vsyncadd [#allocation3], 4294967040 }
  0x32   :  { %2690 = dma.done.wait [#allocation7], 3328  }
  0x33   :  { %2691 = vsyncadd [#allocation7], 4294963968 }
  0x34   :  { %2692 = dma.done.wait [#allocation5], 16  }
  0x35   :  { %2693 = vsyncadd [#allocation5], 4294967280 }
  0x36   :  { %55 = sfence }
  0x37   :  { %v56_v0 = vld [vmem:[#allocation2] sm:$0xff]  ;;  %v57_v1 = vld [vmem:[#allocation2 + $0x8] sm:$0xff]  ;;  %vm64_vm0 = vcmask 1043456   ;;  %vm129_vm1 = vcmask 1041409   ;;  %s2703_s1 = smov 51   ;;  %s2704_s2 = smov 50  }
  0x38   :  { %v65_v2 = vsel %vm64_vm0, %v56_v0, -inf  ;;  %v79_v3 = vsel %vm64_vm0, %v57_v1, -inf  ;;  %v93_v4 = vsel %vm64_vm0, %v56_v0, 0.0  ;;  %v107_v5 = vsel %vm64_vm0, %v57_v1, 0.0  ;;  %s2705_s17 = smov 49   ;;  %s2706_s18 = smov 48  }
  0x39   :  { %v66_v6 = vrot.slane %v65_v2, 4  ;;  %v80_v7 = vrot.slane %v79_v3, 4  ;;  %v94_v8 = vrot.slane %v93_v4, 4  ;;  %v108_v9 = vrot.slane %v107_v5, 4  ;;  %s2707_s19 = smov 47   ;;  %s2708_s20 = smov 46  }
  0x3a   :  { %v60_v10 = vcombine.high %v56_v0, %v56_v0  ;;  %v61_v11 = vcombine.high %v57_v1, %v57_v1  ;;  %s2709_s21 = smov 45   ;;  %s2710_s24 = smov 35  }
  0x3b   :  { %v67_v12 = vmax.f32 %v65_v2, %v66_v6  ;;  %v81_v13 = vmax.f32 %v79_v3, %v80_v7  ;;  %v95_v14 = vadd.f32 %v94_v8, %v93_v4  ;;  %v109_v15 = vadd.f32 %v108_v9, %v107_v5  ;;  %s2711_s25 = smov 34   ;;  %s2712_s26 = smov 33  }
  0x3c   :  { %v72_v16 = vsel %vm64_vm0, %v60_v10, -inf  ;;  %v86_v17 = vsel %vm64_vm0, %v61_v11, -inf  ;;  %v100_v18 = vsel %vm64_vm0, %v60_v10, 0.0  ;;  %v114_v19 = vsel %vm64_vm0, %v61_v11, 0.0  ;;  %s2713_s27 = smov 32   ;;  %s2714_s28 = smov 31  }
  0x3d   :  { %v68_v20 = vrot.slane %v67_v12, 2  ;;  %v82_v21 = vrot.slane %v81_v13, 2  ;;  %v96_v22 = vrot.slane %v95_v14, 2  ;;  %v110_v23 = vrot.slane %v109_v15, 2  ;;  %s2715_s29 = smov 30   ;;  %s2716_s30 = smov 29  }
  0x3e   :  { %v73_v24 = vrot.slane %v72_v16, 4  ;;  %v87_v25 = vrot.slane %v86_v17, 4  ;;  %v101_v26 = vrot.slane %v100_v18, 4  ;;  %v115_v27 = vrot.slane %v114_v19, 4  ;;  %s2717_s4 = smov 19   ;;  %s2718_s5 = smov 18  }
  0x3f   :  { %v69_v28 = vmax.f32 %v67_v12, %v68_v20  ;;  %v83_v29 = vmax.f32 %v81_v13, %v82_v21  ;;  %v97_v30 = vadd.f32 %v96_v22, %v95_v14  ;;  %v111_v31 = vadd.f32 %v110_v23, %v109_v15  ;;  %s2719_s6 = smov 17   ;;  %s2720_s7 = smov 15  }
  0x40   :  { %v74_v32 = vmax.f32 %v72_v16, %v73_v24  ;;  %v88_v33 = vmax.f32 %v86_v17, %v87_v25  ;;  %v102_v34 = vadd.f32 %v101_v26, %v100_v18  ;;  %v116_v35 = vadd.f32 %v115_v27, %v114_v19  ;;  %s2721_s8 = smov 14   ;;  %s2722_s0 = smov 13  }
  0x41   :  { %v70_v36 = vrot.slane %v69_v28, 1  ;;  %v84_v37 = vrot.slane %v83_v29, 1  ;;  %v98_v38 = vrot.slane %v97_v30, 1  ;;  %v112_v39 = vrot.slane %v111_v31, 1  ;;  %s2724_s10 = smov 2   ;;  %s2725_s11 = smov 1  }
  0x42   :  { %v75_v40 = vrot.slane %v74_v32, 2  ;;  %v89_v41 = vrot.slane %v88_v33, 2  ;;  %v103_v42 = vrot.slane %v102_v34, 2  ;;  %v117_v43 = vrot.slane %v116_v35, 2  ;;  %s2726_s12 = smov 127   ;;  %s2727_s13 = smov 126  }
  0x43   :  { %v71_v44 = vmax.f32 %v69_v28, %v70_v36  ;;  %v85_v45 = vmax.f32 %v83_v29, %v84_v37  ;;  %v99_v46 = vadd.f32 %v98_v38, %v97_v30  ;;  %v113_v47 = vadd.f32 %v112_v39, %v111_v31  ;;  %s2728_s14 = smov 125   ;;  %s2729_s15 = smov 115  }
  0x44   :  { %v76_v48 = vmax.f32 %v74_v32, %v75_v40  ;;  %v90_v49 = vmax.f32 %v88_v33, %v89_v41  ;;  %v104_v50 = vadd.f32 %v103_v42, %v102_v34  ;;  %v118_v51 = vadd.f32 %v117_v43, %v116_v35  ;;  %s2730_s16 = smov 114  }
  0x45   :  { %v2812_v52 = vsel %vm129_vm1, %v85_v45, %v71_v44  ;;  %v121_v53 = vmul.f32 0.25, %v99_v46  ;;  %v123_v54 = vmul.f32 0.25, %v113_v47  ;;  %v138_v42 = vlaneseq }
  0x46   :  { %134 = vrot.lane.b32.xlu0 %v2812_v52, %s2703_s1  ;;  %v77_v55 = vrot.slane %v76_v48, 1  ;;  %v91_v56 = vrot.slane %v90_v49, 1  ;;  %v105_v57 = vrot.slane %v104_v50, 1  ;;  %v119_v58 = vrot.slane %v118_v51, 1 }
  0x47   :  { %v2816_v59 = vsel %vm129_vm1, %v123_v54, %v121_v53  ;;  %v3004_v45 = vshrl.u32 %v138_v42, 7  ;;  %v157_v54 = vld [vmem:[#allocation6] ss:$8 sm:$0x3] }
  0x48   :  { %151 = vrot.lane.b32.xlu1 %v2816_v59, %s2703_s1  ;;  %v78_v60 = vmax.f32 %v76_v48, %v77_v55  ;;  %v92_v61 = vmax.f32 %v90_v49, %v91_v56  ;;  %v106_v62 = vadd.f32 %v105_v57, %v104_v50  ;;  %v120_v63 = vadd.f32 %v119_v58, %v118_v51  ;;  %v174_v48 = vld [vmem:[#allocation6 + $0x61] ss:$8 sm:$0x3] }
  0x49   :  { %4647 = vst [vmem:[#allocation14_spill] sm:$0xff] %v3004_v45  ;;  %v3012_v49 = vand.u32 127, %v138_v42  ;;  %v3015_v50 = vsub.s32 0, %v3004_v45  ;;  %v3018_v51 = vsub.s32 1, %v3004_v45 }
  0x4a   :  { %190 = vrot.lane.b32.xlu0 %v2812_v52, %s2704_s2  ;;  %v2821_v0 = vsel %vm129_vm1, %v92_v61, %v78_v60  ;;  %v122_v1 = vmul.f32 0.25, %v106_v62  ;;  %v124_v2 = vmul.f32 0.25, %v120_v63 }
  0x4b   :  { %vm140_vm2 = vcmp.lt.s32.totalorder %v3012_v49, 51  ;;  %v179_v55 = vrot.slane %v174_v48, %v3015_v50  ;;  %v183_v56 = vrot.slane %v174_v48, %v3018_v51  ;;  %v162_v61 = vrot.slane %v157_v54, %v3015_v50 }
  0x4c   :  { %192 = vrot.lane.b32.xlu1 %v2821_v0, %s2704_s2  ;;  %v2827_v3 = vsel %vm129_vm1, %v124_v2, %v122_v1  ;;  %v166_v62 = vrot.slane %v157_v54, %v3018_v51  ;;  %v204_v1 = vld [vmem:[#allocation6 + $0x1] ss:$8 sm:$0x3]  ;;  %vm194_vm3 = vcmp.lt.s32.totalorder %v3012_v49, 50  ;;  %vm241_vm4 = vcmp.lt.s32.totalorder %v3012_v49, 49 }
  0x4d   :  { %v209_v54 = vrot.slane %v204_v1, %v3015_v50  ;;  %vm288_vm5 = vcmp.lt.s32.totalorder %v3012_v49, 48  ;;  %vm335_vm6 = vcmp.lt.s32.totalorder %v3012_v49, 47  ;;  %vm382_vm7 = vcmp.lt.s32.totalorder %v3012_v49, 46 }
  0x4e   :  { %237 = vrot.lane.b32.xlu0 %v2812_v52, %s2705_s17  ;;  %vm429_vm8 = vcmp.lt.s32.totalorder %v3012_v49, 45  ;;  %vm476_vm9 = vcmp.lt.s32.totalorder %v3012_v49, 35  ;;  %vm523_vm10 = vcmp.lt.s32.totalorder %v3012_v49, 34  ;;  %vm570_vm11 = vcmp.lt.s32.totalorder %v3012_v49, 33 }
  0x4f   :  { %vm617_vm12 = vcmp.lt.s32.totalorder %v3012_v49, 32  ;;  %vm664_vm13 = vcmp.lt.s32.totalorder %v3012_v49, 31  ;;  %vm711_vm14 = vcmp.lt.s32.totalorder %v3012_v49, 30  ;;  %vm758_vm15 = vcmp.lt.s32.totalorder %v3012_v49, 29 }
  0x50   :  { %239 = vrot.lane.b32.xlu1 %v2821_v0, %s2705_s17  ;;  %vm805_vm0 = vcmp.lt.s32.totalorder %v3012_v49, 19  ;;  %vm852_vm1 = vcmp.lt.s32.totalorder %v3012_v49, 18 }
  0x52   :  { %136 = vrot.lane.b32.xlu0 %v2821_v0, %s2703_s1 }
  0x54   :  { %153 = vrot.lane.b32.xlu1 %v2827_v3, %s2703_s1  ;;  %s2731_s1 = smov 113  }
  0x56   :  { %197 = vrot.lane.b32.xlu0 %v2816_v59, %s2704_s2 }
  0x58   :  { %199 = vrot.lane.b32.xlu1 %v2827_v3, %s2704_s2  ;;  %s2732_s2 = smov 112  }
  0x5a   :  { %244 = vrot.lane.b32.xlu0 %v2816_v59, %s2705_s17 }
  0x5c   :  { %246 = vrot.lane.b32.xlu1 %v2827_v3, %s2705_s17  ;;  %s2733_s17 = smov 111  }
  0x5e   :  { %284 = vrot.lane.b32.xlu0 %v2812_v52, %s2706_s18 }
  0x60   :  { %286 = vrot.lane.b32.xlu1 %v2821_v0, %s2706_s18 }
  0x62   :  { %291 = vrot.lane.b32.xlu0 %v2816_v59, %s2706_s18 }
  0x64   :  { %293 = vrot.lane.b32.xlu1 %v2827_v3, %s2706_s18  ;;  %s2734_s18 = smov 110  }
  0x66   :  { %331 = vrot.lane.b32.xlu0 %v2812_v52, %s2707_s19 }
  0x68   :  { %333 = vrot.lane.b32.xlu1 %v2821_v0, %s2707_s19 }
  0x6a   :  { %338 = vrot.lane.b32.xlu0 %v2816_v59, %s2707_s19 }
  0x6c   :  { %340 = vrot.lane.b32.xlu1 %v2827_v3, %s2707_s19  ;;  %s2735_s19 = smov 109  }
  0x6e   :  { %378 = vrot.lane.b32.xlu0 %v2812_v52, %s2708_s20 }
  0x70   :  { %380 = vrot.lane.b32.xlu1 %v2821_v0, %s2708_s20 }
  0x72   :  { %385 = vrot.lane.b32.xlu0 %v2816_v59, %s2708_s20 }
  0x74   :  { %387 = vrot.lane.b32.xlu1 %v2827_v3, %s2708_s20  ;;  %s2736_s20 = smov 99  }
  0x76   :  { %425 = vrot.lane.b32.xlu0 %v2812_v52, %s2709_s21 }
  0x78   :  { %427 = vrot.lane.b32.xlu1 %v2821_v0, %s2709_s21 }
  0x7a   :  { %432 = vrot.lane.b32.xlu0 %v2816_v59, %s2709_s21 }
  0x7c   :  { %434 = vrot.lane.b32.xlu1 %v2827_v3, %s2709_s21  ;;  %s2737_s21 = smov 98  }
  0x7e   :  { %472 = vrot.lane.b32.xlu0 %v2812_v52, %s2710_s24 }
  0x80   :  { %474 = vrot.lane.b32.xlu1 %v2821_v0, %s2710_s24 }
  0x82   :  { %479 = vrot.lane.b32.xlu0 %v2816_v59, %s2710_s24 }
  0x84   :  { %481 = vrot.lane.b32.xlu1 %v2827_v3, %s2710_s24  ;;  %s2738_s24 = smov 97  }
  0x86   :  { %519 = vrot.lane.b32.xlu0 %v2812_v52, %s2711_s25 }
  0x88   :  { %521 = vrot.lane.b32.xlu1 %v2821_v0, %s2711_s25 }
  0x8a   :  { %526 = vrot.lane.b32.xlu0 %v2816_v59, %s2711_s25 }
  0x8c   :  { %528 = vrot.lane.b32.xlu1 %v2827_v3, %s2711_s25  ;;  %s2739_s25 = smov 96  }
  0x8e   :  { %566 = vrot.lane.b32.xlu0 %v2812_v52, %s2712_s26 }
  0x90   :  { %568 = vrot.lane.b32.xlu1 %v2821_v0, %s2712_s26 }
  0x92   :  { %573 = vrot.lane.b32.xlu0 %v2816_v59, %s2712_s26 }
  0x94   :  { %575 = vrot.lane.b32.xlu1 %v2827_v3, %s2712_s26  ;;  %s2740_s26 = smov 95  }
  0x96   :  { %613 = vrot.lane.b32.xlu0 %v2812_v52, %s2713_s27 }
  0x98   :  { %615 = vrot.lane.b32.xlu1 %v2821_v0, %s2713_s27 }
  0x9a   :  { %620 = vrot.lane.b32.xlu0 %v2816_v59, %s2713_s27 }
  0x9c   :  { %622 = vrot.lane.b32.xlu1 %v2827_v3, %s2713_s27  ;;  %s3947_s27 = sld [smem:[#allocation8 + $0x3]] }
  0x9e   :  { %660 = vrot.lane.b32.xlu0 %v2812_v52, %s2714_s28 }
  0xa0   :  { %662 = vrot.lane.b32.xlu1 %v2821_v0, %s2714_s28 }
  0xa2   :  { %667 = vrot.lane.b32.xlu0 %v2816_v59, %s2714_s28 }
  0xa4   :  { %669 = vrot.lane.b32.xlu1 %v2827_v3, %s2714_s28  ;;  %s2440_s28 = sadd.f32 1e-05, %s3947_s27 }
  0xa6   :  { %707 = vrot.lane.b32.xlu0 %v2812_v52, %s2715_s29 }
  0xa8   :  { %709 = vrot.lane.b32.xlu1 %v2821_v0, %s2715_s29 }
  0xaa   :  { %714 = vrot.lane.b32.xlu0 %v2816_v59, %s2715_s29 }
  0xac   :  { %716 = vrot.lane.b32.xlu1 %v2827_v3, %s2715_s29  ;;  %s2741_s29 = smov 94  }
  0xae   :  { %754 = vrot.lane.b32.xlu0 %v2812_v52, %s2716_s30 }
  0xb0   :  { %756 = vrot.lane.b32.xlu1 %v2821_v0, %s2716_s30 }
  0xb2   :  { %761 = vrot.lane.b32.xlu0 %v2816_v59, %s2716_s30 }
  0xb4   :  { %763 = vrot.lane.b32.xlu1 %v2827_v3, %s2716_s30  ;;  %s2742_s30 = smov 93  }
  0xb6   :  { %801 = vrot.lane.b32.xlu0 %v2812_v52, %s2717_s4 }
  0xb8   :  { %v2880_v4 = vpop.permute.xlu0 %134  ;;  %803 = vrot.lane.b32.xlu1 %v2821_v0, %s2717_s4 }
  0xba   :  { %v2883_v5 = vpop.permute.xlu1 %151  ;;  %808 = vrot.lane.b32.xlu0 %v2816_v59, %s2717_s4 }
  0xbc   :  { %v2886_v6 = vpop.permute.xlu0 %190  ;;  %810 = vrot.lane.b32.xlu1 %v2827_v3, %s2717_s4  ;;  %s2743_s4 = smov 83  }
  0xbe   :  { %v2889_v7 = vpop.permute.xlu1 %192  ;;  %848 = vrot.lane.b32.xlu0 %v2812_v52, %s2718_s5 }
  0xc0   :  { %v2892_v8 = vpop.permute.xlu0 %237  ;;  %850 = vrot.lane.b32.xlu1 %v2821_v0, %s2718_s5 }
  0xc2   :  { %v2895_v9 = vpop.permute.xlu1 %239  ;;  %855 = vrot.lane.b32.xlu0 %v2816_v59, %s2718_s5 }
  0xc4   :  { %857 = vrot.lane.b32.xlu1 %v2827_v3, %s2718_s5  ;;  %v2899_v10 = vpop.permute.xlu0 %136  ;;  %s2744_s5 = smov 82  }
  0xc5   :  { %v141_v2 = vsel %vm140_vm2, %v2880_v4, %v2899_v10  ;;  %v142_v42 = vsel %vm140_vm2, %v2899_v10, %v2880_v4  ;;  %v195_v4 = vsel %vm194_vm3, %v2886_v6, %v2889_v7  ;;  %v196_v10 = vsel %vm194_vm3, %v2889_v7, %v2886_v6 }
  0xc6   :  { %v2901_v11 = vpop.permute.xlu1 %153  ;;  %895 = vrot.lane.b32.xlu0 %v2812_v52, %s2719_s6  ;;  %v216_v7 = vmul.f32 %v209_v54, %v196_v10 }
  0xc7   :  { %v155_v58 = vsel %vm140_vm2, %v2883_v5, %v2901_v11  ;;  %v156_v60 = vsel %vm140_vm2, %v2901_v11, %v2883_v5  ;;  %v221_v11 = vld [vmem:[#allocation6 + $0x62] ss:$8 sm:$0x3]  ;;  %vm899_vm2 = vcmp.lt.s32.totalorder %v3012_v49, 17 }
  0xc8   :  { %897 = vrot.lane.b32.xlu1 %v2821_v0, %s2719_s6  ;;  %v2905_v12 = vpop.permute.xlu0 %197  ;;  %v186_v48 = vmul.f32 %v179_v55, %v156_v60  ;;  %v187_v45 = vmul.f32 %v183_v56, %v155_v58  ;;  %v226_v58 = vrot.slane %v221_v11, %v3015_v50  ;;  %v230_v60 = vrot.slane %v221_v11, %v3018_v51 }
  0xca   :  { %v2907_v13 = vpop.permute.xlu1 %199  ;;  %902 = vrot.lane.b32.xlu0 %v2816_v59, %s2719_s6 }
  0xcb   :  { %v202_v6 = vsel %vm194_vm3, %v2907_v13, %v2905_v12 }
  0xcc   :  { %904 = vrot.lane.b32.xlu1 %v2827_v3, %s2719_s6  ;;  %v2911_v14 = vpop.permute.xlu0 %244  ;;  %s2745_s6 = smov 81  }
  0xce   :  { %v2913_v15 = vpop.permute.xlu1 %246  ;;  %942 = vrot.lane.b32.xlu0 %v2812_v52, %s2701_s9 }
  0xd0   :  { %944 = vrot.lane.b32.xlu1 %v2821_v0, %s2701_s9  ;;  %v2919_v16 = vpop.permute.xlu0 %284 }
  0xd2   :  { %v2921_v17 = vpop.permute.xlu1 %286  ;;  %949 = vrot.lane.b32.xlu0 %v2816_v59, %s2701_s9 }
  0xd4   :  { %951 = vrot.lane.b32.xlu1 %v2827_v3, %s2701_s9  ;;  %v2927_v18 = vpop.permute.xlu0 %291  ;;  %s2723_s9 = smov 3  }
  0xd6   :  { %v2929_v19 = vpop.permute.xlu1 %293  ;;  %989 = vrot.lane.b32.xlu0 %v2812_v52, %s2720_s7 }
  0xd8   :  { %991 = vrot.lane.b32.xlu1 %v2821_v0, %s2720_s7  ;;  %v2933_v20 = vpop.permute.xlu0 %331 }
  0xda   :  { %v2935_v21 = vpop.permute.xlu1 %333  ;;  %996 = vrot.lane.b32.xlu0 %v2816_v59, %s2720_s7 }
  0xdc   :  { %998 = vrot.lane.b32.xlu1 %v2827_v3, %s2720_s7  ;;  %v2939_v22 = vpop.permute.xlu0 %338  ;;  %s2746_s7 = smov 80  }
  0xde   :  { %v2941_v23 = vpop.permute.xlu1 %340  ;;  %1036 = vrot.lane.b32.xlu0 %v2812_v52, %s2721_s8 }
  0xe0   :  { %1038 = vrot.lane.b32.xlu1 %v2821_v0, %s2721_s8  ;;  %v2945_v24 = vpop.permute.xlu0 %378 }
  0xe2   :  { %v2947_v25 = vpop.permute.xlu1 %380  ;;  %1043 = vrot.lane.b32.xlu0 %v2816_v59, %s2721_s8 }
  0xe4   :  { %1045 = vrot.lane.b32.xlu1 %v2827_v3, %s2721_s8  ;;  %v2951_v26 = vpop.permute.xlu0 %385  ;;  %s2747_s8 = smov 79  }
  0xe6   :  { %v2953_v27 = vpop.permute.xlu1 %387  ;;  %1083 = vrot.lane.b32.xlu0 %v2812_v52, %s2722_s0 }
  0xe8   :  { %1085 = vrot.lane.b32.xlu1 %v2821_v0, %s2722_s0  ;;  %v2957_v28 = vpop.permute.xlu0 %425 }
  0xea   :  { %v2959_v29 = vpop.permute.xlu1 %427  ;;  %1090 = vrot.lane.b32.xlu0 %v2816_v59, %s2722_s0 }
  0xec   :  { %1092 = vrot.lane.b32.xlu1 %v2827_v3, %s2722_s0  ;;  %v2963_v30 = vpop.permute.xlu0 %432  ;;  %s2748_s0 = smov 78  }
  0xee   :  { %v2965_v31 = vpop.permute.xlu1 %434  ;;  %1130 = vrot.lane.b32.xlu0 %v2812_v52, %s2723_s9 }
  0xf0   :  { %1132 = vrot.lane.b32.xlu1 %v2821_v0, %s2723_s9  ;;  %v2969_v32 = vpop.permute.xlu0 %472 }
  0xf2   :  { %v2971_v33 = vpop.permute.xlu1 %474  ;;  %1137 = vrot.lane.b32.xlu0 %v2816_v59, %s2723_s9 }
  0xf4   :  { %1139 = vrot.lane.b32.xlu1 %v2827_v3, %s2723_s9  ;;  %v2975_v34 = vpop.permute.xlu0 %479  ;;  %s2749_s9 = smov 77  }
  0xf6   :  { %v2977_v35 = vpop.permute.xlu1 %481  ;;  %1177 = vrot.lane.b32.xlu0 %v2812_v52, %s2724_s10 }
  0xf8   :  { %1179 = vrot.lane.b32.xlu1 %v2821_v0, %s2724_s10  ;;  %v2981_v36 = vpop.permute.xlu0 %519 }
  0xfa   :  { %v2983_v37 = vpop.permute.xlu1 %521  ;;  %1184 = vrot.lane.b32.xlu0 %v2816_v59, %s2724_s10 }
  0xfc   :  { %1186 = vrot.lane.b32.xlu1 %v2827_v3, %s2724_s10  ;;  %v2987_v38 = vpop.permute.xlu0 %526  ;;  %s4596_s10 = sld [smem:[#allocation8 + $0x2]] }
  0xfe   :  { %v2989_v39 = vpop.permute.xlu1 %528  ;;  %1224 = vrot.lane.b32.xlu0 %v2812_v52, %s2725_s11 }
 0x100   :  { %1226 = vrot.lane.b32.xlu1 %v2821_v0, %s2725_s11  ;;  %v2993_v40 = vpop.permute.xlu0 %566 }
 0x102   :  { %v2995_v41 = vpop.permute.xlu1 %568  ;;  %1231 = vrot.lane.b32.xlu0 %v2816_v59, %s2725_s11 }
 0x104   :  { %1233 = vrot.lane.b32.xlu1 %v2827_v3, %s2725_s11  ;;  %v2999_v43 = vpop.permute.xlu0 %573  ;;  %s2433_s11 = sld [smem:[#allocation8]] }
 0x106   :  { %v3001_v44 = vpop.permute.xlu1 %575  ;;  %1305 = vrot.lane.b32.xlu0 %v2812_v52, %s2726_s12 }
 0x108   :  { %1307 = vrot.lane.b32.xlu1 %v2821_v0, %s2726_s12  ;;  %v3007_v46 = vpop.permute.xlu0 %613 }
 0x109   :  { %4648 = vst [vmem:[#allocation15_spill] sm:$0xff] %v3007_v46 }
 0x10a   :  { %v3009_v47 = vpop.permute.xlu1 %615  ;;  %1312 = vrot.lane.b32.xlu0 %v2816_v59, %s2726_s12 }
 0x10b   :  { %4649 = vst [vmem:[#allocation16_spill] sm:$0xff] %v3009_v47 }
 0x10c   :  { %1314 = vrot.lane.b32.xlu1 %v2827_v3, %s2726_s12  ;;  %v3021_v53 = vpop.permute.xlu0 %620  ;;  %s2533_s12 = sld [smem:[#allocation8 + $0x1]] }
 0x10d   :  { %4650 = vst [vmem:[#allocation17_spill] sm:$0xff] %v3021_v53  ;;  %v169_v53 = vmul.f32 %v162_v61, %v142_v42  ;;  %v3076_v42 = vld [vmem:[#allocation6 + $0x64] ss:$8 sm:$0x3] }
 0x10e   :  { %v3026_v57 = vpop.permute.xlu1 %622  ;;  %1352 = vrot.lane.b32.xlu0 %v2812_v52, %s2727_s13 }
 0x10f   :  { %4651 = vst [vmem:[#allocation18_spill] sm:$0xff] %v3026_v57  ;;  %v170_v57 = vmul.f32 %v166_v62, %v141_v2  ;;  %v188_v55 = vadd.f32 %v186_v48, %v169_v53  ;;  %v251_v62 = vld [vmem:[#allocation6 + $0x2] ss:$8 sm:$0x3] }
 0x110   :  { %1354 = vrot.lane.b32.xlu1 %v2821_v0, %s2727_s13  ;;  %v3036_v63 = vpop.permute.xlu0 %660  ;;  %v268_v53 = vld [vmem:[#allocation6 + $0x63] ss:$8 sm:$0x3] }
 0x111   :  { %4652 = vst [vmem:[#allocation19_spill] sm:$0xff] %v3036_v63  ;;  %v213_v63 = vrot.slane %v204_v1, %v3018_v51  ;;  %v189_v56 = vadd.f32 %v187_v45, %v170_v57  ;;  %v201_v1 = vsel %vm194_vm3, %v2905_v12, %v2907_v13  ;;  %v298_v2 = vld [vmem:[#allocation6 + $0x3] ss:$8 sm:$0x3]  ;;  %v218_v48 = vadd.f32 %v216_v7, %v188_v55 }
 0x112   :  { %v3043_v5 = vpop.permute.xlu1 %662  ;;  %1359 = vrot.lane.b32.xlu0 %v2816_v59, %s2727_s13  ;;  %v256_v12 = vrot.slane %v251_v62, %v3015_v50  ;;  %v260_v13 = vrot.slane %v251_v62, %v3018_v51  ;;  %v277_v54 = vrot.slane %v268_v53, %v3018_v51  ;;  %v303_v10 = vrot.slane %v298_v2, %v3015_v50  ;;  %v3108_v7 = vld [vmem:[#allocation6 + $0x5] ss:$8 sm:$0x3] }
 0x113   :  { %4653 = vst [vmem:[#allocation20_spill] sm:$0xff] %v3043_v5  ;;  %v217_v45 = vmul.f32 %v213_v63, %v195_v4  ;;  %v273_v63 = vrot.slane %v268_v53, %v3015_v50  ;;  %v3085_v4 = vld [vmem:[#allocation6 + $0x4] ss:$8 sm:$0x3]  ;;  %v307_v55 = vrot.slane %v298_v2, %v3018_v51  ;;  %v242_v62 = vsel %vm241_vm4, %v2892_v8, %v2895_v9 }
 0x114   :  { %1361 = vrot.lane.b32.xlu1 %v2827_v3, %s2727_s13  ;;  %v3049_v46 = vpop.permute.xlu0 %667  ;;  %v350_v2 = vrot.slane %v3085_v4, %v3015_v50  ;;  %vm946_vm3 = vcmp.lt.s32.totalorder %v3012_v49, 16 }
 0x115   :  { %4654 = vst [vmem:[#allocation21_spill] sm:$0xff] %v3049_v46  ;;  %v219_v11 = vadd.f32 %v217_v45, %v189_v56  ;;  %v233_v46 = vmul.f32 %v226_v58, %v202_v6  ;;  %v320_v56 = vrot.slane %v3076_v42, %v3015_v50  ;;  %v3092_v58 = vld [vmem:[#allocation6 + $0x65] ss:$8 sm:$0x3]  ;;  %v324_v6 = vrot.slane %v3076_v42, %v3018_v51 }
 0x116   :  { %v3061_v61 = vpop.permute.xlu1 %669  ;;  %1399 = vrot.lane.b32.xlu0 %v2812_v52, %s2728_s14 }
 0x117   :  { %4655 = vst [vmem:[#allocation22_spill] sm:$0xff] %v3061_v61  ;;  %v234_v61 = vmul.f32 %v230_v60, %v201_v1  ;;  %v243_v1 = vsel %vm241_vm4, %v2895_v9, %v2892_v8  ;;  %v235_v45 = vadd.f32 %v233_v46, %v218_v48  ;;  %v248_v8 = vsel %vm241_vm4, %v2911_v14, %v2913_v15 }
 0x118   :  { %1401 = vrot.lane.b32.xlu1 %v2821_v0, %s2728_s14  ;;  %v3074_v57 = vpop.permute.xlu0 %707  ;;  %v249_v9 = vsel %vm241_vm4, %v2913_v15, %v2911_v14  ;;  %v367_v46 = vrot.slane %v3092_v58, %v3015_v50  ;;  %v263_v42 = vmul.f32 %v256_v12, %v243_v1  ;;  %v264_v48 = vmul.f32 %v260_v13, %v242_v62 }
 0x119   :  { %4656 = vst [vmem:[#allocation23_spill] sm:$0xff] %v3074_v57  ;;  %v236_v53 = vadd.f32 %v234_v61, %v219_v11  ;;  %v3114_v57 = vld [vmem:[#allocation6 + $0x66] ss:$8 sm:$0x3]  ;;  %v371_v61 = vrot.slane %v3092_v58, %v3018_v51  ;;  %v289_v14 = vsel %vm288_vm5, %v2919_v16, %v2921_v17  ;;  %v290_v15 = vsel %vm288_vm5, %v2921_v17, %v2919_v16 }
 0x11a   :  { %v3078_v5 = vpop.permute.xlu1 %709  ;;  %1406 = vrot.lane.b32.xlu0 %v2816_v59, %s2728_s14  ;;  %v401_v12 = vrot.slane %v3108_v7, %v3018_v51  ;;  %v414_v13 = vrot.slane %v3114_v57, %v3015_v50  ;;  %v3151_v58 = vld [vmem:[#allocation6 + $0x6] ss:$8 sm:$0x3]  ;;  %v265_v62 = vadd.f32 %v263_v42, %v235_v45  ;;  %v280_v11 = vmul.f32 %v273_v63, %v249_v9  ;;  %v3174_v9 = vld [vmem:[#allocation6 + $0x7] ss:$8 sm:$0x3] }
 0x11b   :  { %4657 = vst [vmem:[#allocation24_spill] sm:$0xff] %v3078_v5  ;;  %v266_v1 = vadd.f32 %v264_v48, %v236_v53  ;;  %v295_v16 = vsel %vm288_vm5, %v2927_v18, %v2929_v19  ;;  %v296_v17 = vsel %vm288_vm5, %v2929_v19, %v2927_v18  ;;  %v311_v45 = vmul.f32 %v307_v55, %v289_v14  ;;  %v3193_v53 = vld [vmem:[#allocation6 + $0x70] ss:$8 sm:$0x3] }
 0x11c   :  { %1408 = vrot.lane.b32.xlu1 %v2827_v3, %s2728_s14  ;;  %v3095_v60 = vpop.permute.xlu0 %714  ;;  %v336_v18 = vsel %vm335_vm6, %v2933_v20, %v2935_v21  ;;  %v337_v19 = vsel %vm335_vm6, %v2935_v21, %v2933_v20  ;;  %v282_v48 = vadd.f32 %v280_v11, %v265_v62  ;;  %v342_v20 = vsel %vm335_vm6, %v2939_v22, %v2941_v23  ;;  %s2751_s14 = smov [#allocation9]  }
 0x11d   :  { %4658 = vst [vmem:[#allocation25_spill] sm:$0xff] %v3095_v60  ;;  %v354_v60 = vrot.slane %v3085_v4, %v3018_v51  ;;  %v343_v21 = vsel %vm335_vm6, %v2941_v23, %v2939_v22  ;;  %v357_v62 = vmul.f32 %v350_v2, %v337_v19  ;;  %v383_v22 = vsel %vm382_vm7, %v2945_v24, %v2947_v25 }
 0x11e   :  { %v3116_v5 = vpop.permute.xlu1 %716  ;;  %1446 = vrot.lane.b32.xlu0 %v2812_v52, %s2729_s15  ;;  %v384_v23 = vsel %vm382_vm7, %v2947_v25, %v2945_v24  ;;  %v512_v2 = vrot.slane %v3193_v53, %v3018_v51  ;;  %v375_v19 = vmul.f32 %v371_v61, %v342_v20  ;;  %v389_v24 = vsel %vm382_vm7, %v2951_v26, %v2953_v27 }
 0x11f   :  { %4659 = vst [vmem:[#allocation26_spill] sm:$0xff] %v3116_v5  ;;  %v3153_v5 = vld [vmem:[#allocation6 + $0x67] ss:$8 sm:$0x3]  ;;  %v390_v25 = vsel %vm382_vm7, %v2953_v27, %v2951_v26  ;;  %v4661_v20 = vrot.slane %v3108_v7, %v3015_v50  ;;  %v430_v27 = vsel %vm429_vm8, %v2957_v28, %v2959_v29  ;;  %vm993_vm4 = vcmp.lt.s32.totalorder %v3012_v49, 15 }
 0x120   :  { %1448 = vrot.lane.b32.xlu1 %v2821_v0, %s2729_s15  ;;  %v3137_v4 = vpop.permute.xlu0 %754  ;;  %v465_v55 = vrot.slane %v3153_v5, %v3018_v51  ;;  %vm1040_vm5 = vcmp.lt.s32.totalorder %v3012_v49, 14  ;;  %vm1087_vm6 = vcmp.lt.s32.totalorder %v3012_v49, 13  ;;  %vm1134_vm7 = vcmp.lt.s32.totalorder %v3012_v49, 3 }
 0x121   :  { %4660 = vst [vmem:[#allocation27_spill] sm:$0xff] %v3137_v4  ;;  %v281_v4 = vmul.f32 %v277_v54, %v248_v8  ;;  %v310_v54 = vmul.f32 %v303_v10, %v290_v15  ;;  %v461_v10 = vrot.slane %v3153_v5, %v3015_v50  ;;  %v327_v15 = vmul.f32 %v320_v56, %v296_v17 }
 0x122   :  { %v3155_v47 = vpop.permute.xlu1 %756  ;;  %1453 = vrot.lane.b32.xlu0 %v2816_v59, %s2729_s15  ;;  %v328_v8 = vmul.f32 %v324_v6, %v295_v16  ;;  %v491_v56 = vrot.slane %v3174_v9, %v3015_v50  ;;  %v495_v6 = vrot.slane %v3174_v9, %v3018_v51  ;;  %v3211_v16 = vld [vmem:[#allocation6 + $0x10] ss:$8 sm:$0x3]  ;;  %v484_v5 = vsel %vm476_vm9, %v2977_v35, %v2975_v34 }
 0x123   :  { %v283_v14 = vadd.f32 %v281_v4, %v266_v1  ;;  %v312_v11 = vadd.f32 %v310_v54, %v282_v48  ;;  %v358_v1 = vmul.f32 %v354_v60, %v336_v18  ;;  %v508_v60 = vrot.slane %v3193_v53, %v3015_v50  ;;  %v3230_v48 = vld [vmem:[#allocation6 + $0x71] ss:$8 sm:$0x3] }
 0x124   :  { %1455 = vrot.lane.b32.xlu1 %v2827_v3, %s2729_s15  ;;  %v3178_v42 = vpop.permute.xlu0 %761  ;;  %v374_v18 = vmul.f32 %v367_v46, %v343_v21  ;;  %v538_v46 = vrot.slane %v3211_v16, %v3015_v50  ;;  %v542_v61 = vrot.slane %v3211_v16, %v3018_v51  ;;  %v404_v21 = vmul.f32 %v4661_v20, %v384_v23  ;;  %v3279_v20 = vld [vmem:[#allocation6 + $0x72] ss:$8 sm:$0x3]  ;;  %s2519_s15 = sshll.u32 %s2751_s14, 4  ;;  %s2520_s15 = int_to_ptr.vmem [resolvable:$true] %s2519_s15 }
 0x125   :  { %v313_v4 = vadd.f32 %v311_v45, %v283_v14  ;;  %v329_v54 = vadd.f32 %v327_v15, %v312_v11  ;;  %v405_v11 = vmul.f32 %v401_v12, %v383_v22  ;;  %v555_v7 = vrot.slane %v3230_v48, %v3015_v50  ;;  %v3303_v12 = vld [vmem:[#allocation6 + $0x12] ss:$8 sm:$0x3]  ;;  %p2671_p8 = scmp.lt.s32.totalorder %s2520_s15, %s2520_s15 }
 0x126   :  { %v3195_v63 = vpop.permute.xlu1 %763  ;;  %1493 = vrot.lane.b32.xlu0 %v2812_v52, %s2730_s16  ;;  %v421_v23 = vmul.f32 %v414_v13, %v390_v25  ;;  %v4663_v25 = vrot.slane %v3151_v58, %v3015_v50  ;;  %v531_v53 = vsel %vm523_vm10, %v2989_v39, %v2987_v38 }
 0x127   :  { %v330_v45 = vadd.f32 %v328_v8, %v313_v4  ;;  %v359_v8 = vadd.f32 %v357_v62, %v329_v54  ;;  %v3254_v4 = vld [vmem:[#allocation6 + $0x11] ss:$8 sm:$0x3]  ;;  %v431_v62 = vsel %vm429_vm8, %v2959_v29, %v2957_v28  ;;  %v4662_v54 = vrot.slane %v3114_v57, %v3018_v51 }
 0x128   :  { %1495 = vrot.lane.b32.xlu1 %v2821_v0, %s2730_s16  ;;  %v3215_v17 = vpop.permute.xlu0 %801  ;;  %v436_v29 = vsel %vm429_vm8, %v2963_v30, %v2965_v31  ;;  %v437_v57 = vsel %vm429_vm8, %v2965_v31, %v2963_v30  ;;  %v585_v13 = vrot.slane %v3254_v4, %v3015_v50  ;;  %v477_v31 = vsel %vm476_vm9, %v2969_v32, %v2971_v33 }
 0x129   :  { %v360_v15 = vadd.f32 %v358_v1, %v330_v45  ;;  %v376_v1 = vadd.f32 %v374_v18, %v359_v8  ;;  %v422_v45 = vmul.f32 %v4662_v54, %v389_v24  ;;  %v589_v18 = vrot.slane %v3254_v4, %v3018_v51 }
 0x12a   :  { %v3232_v14 = vpop.permute.xlu1 %803  ;;  %1500 = vrot.lane.b32.xlu0 %v2816_v59, %s2730_s16  ;;  %v451_v8 = vmul.f32 %v4663_v25, %v431_v62  ;;  %v3328_v25 = vld [vmem:[#allocation6 + $0x73] ss:$8 sm:$0x3]  ;;  %vm1181_vm8 = vcmp.lt.s32.totalorder %v3012_v49, 2 }
 0x12b   :  { %v377_v22 = vadd.f32 %v375_v19, %v360_v15  ;;  %v406_v19 = vadd.f32 %v404_v21, %v376_v1  ;;  %v4664_v15 = vrot.slane %v3151_v58, %v3018_v51  ;;  %v478_v21 = vsel %vm476_vm9, %v2971_v33, %v2969_v32 }
 0x12c   :  { %1502 = vrot.lane.b32.xlu1 %v2827_v3, %s2730_s16  ;;  %v3258_v26 = vpop.permute.xlu0 %808  ;;  %v602_v58 = vrot.slane %v3279_v20, %v3015_v50  ;;  %v468_v1 = vmul.f32 %v461_v10, %v437_v57  ;;  %v483_v33 = vsel %vm476_vm9, %v2975_v34, %v2977_v35  ;;  %v632_v10 = vrot.slane %v3303_v12, %v3015_v50  ;;  %s2666_s16 = scalar_lea.vmem %s2520_s15, 256 }
 0x12d   :  { %v407_v24 = vadd.f32 %v405_v11, %v377_v22  ;;  %v452_v54 = vmul.f32 %v4664_v15, %v430_v27  ;;  %v606_v11 = vrot.slane %v3279_v20, %v3018_v51  ;;  %v423_v27 = vadd.f32 %v421_v23, %v406_v19  ;;  %v3352_v19 = vld [vmem:[#allocation6 + $0x13] ss:$8 sm:$0x3]  ;;  %p2667_p7 = scmp.ne.s32.totalorder %s2520_s15, %s2666_s16  ;;  %p2672_p9 = scmp.lt.s32.totalorder %s2666_s16, %s2666_s16 }
 0x12e   :  { %v3281_v28 = vpop.permute.xlu1 %810  ;;  %1540 = vrot.lane.b32.xlu0 %v2812_v52, %s2731_s1  ;;  %v469_v22 = vmul.f32 %v465_v55, %v436_v29  ;;  %v636_v55 = vrot.slane %v3303_v12, %v3018_v51  ;;  %v498_v29 = vmul.f32 %v491_v56, %v478_v21  ;;  %v499_v57 = vmul.f32 %v495_v6, %v477_v31  ;;  %v3377_v31 = vld [vmem:[#allocation6 + $0x74] ss:$8 sm:$0x3] }
 0x12f   :  { %v424_v62 = vadd.f32 %v422_v45, %v407_v24  ;;  %v453_v23 = vadd.f32 %v451_v8, %v423_v27  ;;  %v524_v35 = vsel %vm523_vm10, %v2981_v36, %v2983_v37  ;;  %v525_v56 = vsel %vm523_vm10, %v2983_v37, %v2981_v36  ;;  %p2673_p10 = por %p2672_p9, %p2671_p8 }
 0x130   :  { %1542 = vrot.lane.b32.xlu1 %v2821_v0, %s2731_s1  ;;  %v3307_v30 = vpop.permute.xlu0 %848  ;;  %v649_v9 = vrot.slane %v3328_v25, %v3015_v50  ;;  %v653_v6 = vrot.slane %v3328_v25, %v3018_v51  ;;  %v515_v15 = vmul.f32 %v508_v60, %v484_v5  ;;  %v530_v37 = vsel %vm523_vm10, %v2987_v38, %v2989_v39 }
 0x131   :  { %v454_v45 = vadd.f32 %v452_v54, %v424_v62  ;;  %v470_v24 = vadd.f32 %v468_v1, %v453_v23  ;;  %v516_v54 = vmul.f32 %v512_v2, %v483_v33  ;;  %v679_v60 = vrot.slane %v3352_v19, %v3015_v50  ;;  %p2674_p11 = pnand %p2673_p10, %p2667_p7 }
 0x132   :  { %v3330_v32 = vpop.permute.xlu1 %850  ;;  %1547 = vrot.lane.b32.xlu0 %v2816_v59, %s2731_s1  ;;  %v683_v2 = vrot.slane %v3352_v19, %v3018_v51  ;;  %v545_v62 = vmul.f32 %v538_v46, %v525_v56  ;;  %v546_v1 = vmul.f32 %v542_v61, %v524_v35  ;;  %v571_v39 = vsel %vm570_vm11, %v2993_v40, %v2995_v41 }
 0x133   :  { %v471_v8 = vadd.f32 %v469_v22, %v454_v45  ;;  %v500_v21 = vadd.f32 %v498_v29, %v470_v24  ;;  %v3401_v22 = vld [vmem:[#allocation6 + $0x14] ss:$8 sm:$0x3]  ;;  %v572_v46 = vsel %vm570_vm11, %v2995_v41, %v2993_v40  ;;  %v696_v16 = vrot.slane %v3377_v31, %v3015_v50 }
 0x134   :  { %1549 = vrot.lane.b32.xlu1 %v2827_v3, %s2731_s1  ;;  %v3356_v34 = vpop.permute.xlu0 %855  ;;  %v700_v61 = vrot.slane %v3377_v31, %v3018_v51  ;;  %v562_v23 = vmul.f32 %v555_v7, %v531_v53  ;;  %v4665_v45 = vrot.slane %v3230_v48, %v3018_v51  ;;  %v577_v41 = vsel %vm570_vm11, %v2999_v43, %v3001_v44 }
 0x135   :  { %v501_v27 = vadd.f32 %v499_v57, %v471_v8  ;;  %v517_v33 = vadd.f32 %v515_v15, %v500_v21  ;;  %v3426_v57 = vld [vmem:[#allocation6 + $0x75] ss:$8 sm:$0x3]  ;;  %v578_v48 = vsel %vm570_vm11, %v3001_v44, %v2999_v43  ;;  %v726_v7 = vrot.slane %v3401_v22, %v3015_v50 }
 0x136   :  { %v3379_v36 = vpop.permute.xlu1 %857  ;;  %1587 = vrot.lane.b32.xlu0 %v2812_v52, %s2732_s2  ;;  %v563_v29 = vmul.f32 %v4665_v45, %v530_v37  ;;  %v730_v35 = vrot.slane %v3401_v22, %v3018_v51  ;;  %v592_v8 = vmul.f32 %v585_v13, %v572_v46  ;;  %v593_v15 = vmul.f32 %v589_v18, %v571_v39  ;;  %v4666_v44 = vld [vmem:[#allocation16_spill] sm:$0xff]  ;;  %v4667_v37 = vld [vmem:[#allocation15_spill] sm:$0xff] }
 0x137   :  { %v518_v5 = vadd.f32 %v516_v54, %v501_v27  ;;  %v547_v56 = vadd.f32 %v545_v62, %v517_v33  ;;  %v3450_v54 = vld [vmem:[#allocation6 + $0x15] ss:$8 sm:$0x3]  ;;  %v618_v53 = vsel %vm617_vm12, %v4667_v37, %v4666_v44  ;;  %v619_v13 = vsel %vm617_vm12, %v4666_v44, %v4667_v37  ;;  %v3475_v39 = vld [vmem:[#allocation6 + $0x76] ss:$8 sm:$0x3] }
 0x138   :  { %1589 = vrot.lane.b32.xlu1 %v2821_v0, %s2732_s2  ;;  %v3405_v38 = vpop.permute.xlu0 %895  ;;  %v743_v4 = vrot.slane %v3426_v57, %v3015_v50  ;;  %v747_v18 = vrot.slane %v3426_v57, %v3018_v51  ;;  %v609_v62 = vmul.f32 %v602_v58, %v578_v48  ;;  %v4668_v33 = vld [vmem:[#allocation18_spill] sm:$0xff]  ;;  %v773_v58 = vrot.slane %v3450_v54, %v3015_v50  ;;  %v4670_v44 = vld [vmem:[#allocation20_spill] sm:$0xff]  ;;  %v4671_v37 = vld [vmem:[#allocation19_spill] sm:$0xff] }
 0x139   :  { %v548_v24 = vadd.f32 %v546_v1, %v518_v5  ;;  %v564_v21 = vadd.f32 %v562_v23, %v547_v56  ;;  %v610_v1 = vmul.f32 %v606_v11, %v577_v41  ;;  %v4669_v5 = vld [vmem:[#allocation17_spill] sm:$0xff]  ;;  %v777_v11 = vrot.slane %v3450_v54, %v3018_v51 }
 0x13a   :  { %v3428_v40 = vpop.permute.xlu1 %897  ;;  %1594 = vrot.lane.b32.xlu0 %v2816_v59, %s2732_s2  ;;  %v624_v23 = vsel %vm617_vm12, %v4669_v5, %v4668_v33  ;;  %v625_v20 = vsel %vm617_vm12, %v4668_v33, %v4669_v5  ;;  %v639_v41 = vmul.f32 %v632_v10, %v619_v13  ;;  %v640_v48 = vmul.f32 %v636_v55, %v618_v53  ;;  %v3499_v56 = vld [vmem:[#allocation6 + $0x16] ss:$8 sm:$0x3]  ;;  %v4672_v5 = vld [vmem:[#allocation22_spill] sm:$0xff] }
 0x13b   :  { %v565_v27 = vadd.f32 %v563_v29, %v548_v24  ;;  %v594_v45 = vadd.f32 %v592_v8, %v564_v21  ;;  %v665_v8 = vsel %vm664_vm13, %v4671_v37, %v4670_v44  ;;  %v666_v10 = vsel %vm664_vm13, %v4670_v44, %v4671_v37  ;;  %v3548_v44 = vld [vmem:[#allocation6 + $0x17] ss:$8 sm:$0x3] }
 0x13c   :  { %1596 = vrot.lane.b32.xlu1 %v2827_v3, %s2732_s2  ;;  %v3454_v43 = vpop.permute.xlu0 %902  ;;  %v790_v12 = vrot.slane %v3475_v39, %v3015_v50  ;;  %v794_v55 = vrot.slane %v3475_v39, %v3018_v51  ;;  %v656_v13 = vmul.f32 %v649_v9, %v625_v20  ;;  %v657_v21 = vmul.f32 %v653_v6, %v624_v23 }
 0x13d   :  { %v595_v29 = vadd.f32 %v593_v15, %v565_v27  ;;  %v611_v15 = vadd.f32 %v609_v62, %v594_v45  ;;  %v3524_v27 = vld [vmem:[#allocation6 + $0x77] ss:$8 sm:$0x3]  ;;  %v820_v9 = vrot.slane %v3499_v56, %v3015_v50  ;;  %v824_v6 = vrot.slane %v3499_v56, %v3018_v51 }
 0x13e   :  { %v3477_v46 = vpop.permute.xlu1 %904  ;;  %1634 = vrot.lane.b32.xlu0 %v2812_v52, %s2733_s17  ;;  %v4673_v62 = vld [vmem:[#allocation21_spill] sm:$0xff]  ;;  %v686_v45 = vmul.f32 %v679_v60, %v666_v10  ;;  %v837_v19 = vrot.slane %v3524_v27, %v3015_v50  ;;  %vm1228_vm9 = vcmp.lt.s32.totalorder %v3012_v49, 1  ;;  %vm1309_vm10 = vcmp.lt.s32.totalorder %v3012_v49, 127 }
 0x13f   :  { %v612_v53 = vadd.f32 %v610_v1, %v595_v29  ;;  %v671_v1 = vsel %vm664_vm13, %v4673_v62, %v4672_v5  ;;  %v672_v25 = vsel %vm664_vm13, %v4672_v5, %v4673_v62  ;;  %v641_v23 = vadd.f32 %v639_v41, %v611_v15  ;;  %v4674_v5 = vld [vmem:[#allocation24_spill] sm:$0xff]  ;;  %v4675_v62 = vld [vmem:[#allocation23_spill] sm:$0xff] }
 0x140   :  { %1636 = vrot.lane.b32.xlu1 %v2821_v0, %s2733_s17  ;;  %v3503_v24 = vpop.permute.xlu0 %942  ;;  %v687_v29 = vmul.f32 %v683_v2, %v665_v8  ;;  %v712_v41 = vsel %vm711_vm14, %v4675_v62, %v4674_v5  ;;  %v713_v60 = vsel %vm711_vm14, %v4674_v5, %v4675_v62  ;;  %v703_v10 = vmul.f32 %v696_v16, %v672_v25  ;;  %v3597_v2 = vld [vmem:[#allocation6 + $0x20] ss:$8 sm:$0x3] }
 0x141   :  { %v642_v20 = vadd.f32 %v640_v48, %v612_v53  ;;  %v658_v48 = vadd.f32 %v656_v13, %v641_v23  ;;  %v704_v15 = vmul.f32 %v700_v61, %v671_v1  ;;  %v3573_v53 = vld [vmem:[#allocation6 + $0x80] ss:$8 sm:$0x3]  ;;  %v867_v16 = vrot.slane %v3548_v44, %v3015_v50 }
 0x142   :  { %v3526_v33 = vpop.permute.xlu1 %944  ;;  %1641 = vrot.lane.b32.xlu0 %v2816_v59, %s2733_s17  ;;  %v4676_v13 = vld [vmem:[#allocation26_spill] sm:$0xff]  ;;  %v734_v62 = vmul.f32 %v730_v35, %v712_v41  ;;  %v884_v22 = vrot.slane %v3573_v53, %v3015_v50  ;;  %v888_v35 = vrot.slane %v3573_v53, %v3018_v51  ;;  %v914_v57 = vrot.slane %v3597_v2, %v3015_v50 }
 0x143   :  { %v659_v8 = vadd.f32 %v657_v21, %v642_v20  ;;  %v4677_v21 = vld [vmem:[#allocation25_spill] sm:$0xff]  ;;  %v688_v1 = vadd.f32 %v686_v45, %v658_v48  ;;  %v733_v20 = vmul.f32 %v726_v7, %v713_v60  ;;  %vm1356_vm11 = vcmp.lt.s32.totalorder %v3012_v49, 126 }
 0x144   :  { %1643 = vrot.lane.b32.xlu1 %v2827_v3, %s2733_s17  ;;  %v3552_v37 = vpop.permute.xlu0 %949  ;;  %v718_v23 = vsel %vm711_vm14, %v4677_v21, %v4676_v13  ;;  %v719_v31 = vsel %vm711_vm14, %v4676_v13, %v4677_v21  ;;  %v4678_v21 = vld [vmem:[#allocation27_spill] sm:$0xff]  ;;  %vm1403_vm12 = vcmp.lt.s32.totalorder %v3012_v49, 125  ;;  %vm1450_vm13 = vcmp.lt.s32.totalorder %v3012_v49, 115 }
 0x145   :  { %v689_v25 = vadd.f32 %v687_v29, %v659_v8  ;;  %v759_v45 = vsel %vm758_vm15, %v4678_v21, %v3155_v47  ;;  %v760_v7 = vsel %vm758_vm15, %v3155_v47, %v4678_v21  ;;  %v705_v29 = vadd.f32 %v703_v10, %v688_v1  ;;  %v3621_v8 = vld [vmem:[#allocation6 + $0x81] ss:$8 sm:$0x3] }
 0x146   :  { %v3575_v5 = vpop.permute.xlu1 %951  ;;  %1681 = vrot.lane.b32.xlu0 %v2812_v52, %s2734_s18  ;;  %v750_v60 = vmul.f32 %v743_v4, %v719_v31  ;;  %v751_v48 = vmul.f32 %v747_v18, %v718_v23  ;;  %v765_v47 = vsel %vm758_vm15, %v3178_v42, %v3195_v63  ;;  %v766_v4 = vsel %vm758_vm15, %v3195_v63, %v3178_v42 }
 0x147   :  { %v706_v41 = vadd.f32 %v704_v15, %v689_v25  ;;  %v735_v18 = vadd.f32 %v733_v20, %v705_v29  ;;  %v780_v15 = vmul.f32 %v773_v58, %v760_v7  ;;  %v781_v23 = vmul.f32 %v777_v11, %v759_v45  ;;  %v3689_v29 = vld [vmem:[#allocation6 + $0x82] ss:$8 sm:$0x3] }
 0x148   :  { %1683 = vrot.lane.b32.xlu1 %v2821_v0, %s2734_s18  ;;  %v3601_v13 = vpop.permute.xlu0 %989  ;;  %v806_v63 = vsel %vm805_vm0, %v3215_v17, %v3232_v14  ;;  %v807_v42 = vsel %vm805_vm0, %v3232_v14, %v3215_v17  ;;  %v918_v58 = vrot.slane %v3597_v2, %v3018_v51  ;;  %v931_v54 = vrot.slane %v3621_v8, %v3015_v50 }
 0x149   :  { %v736_v10 = vadd.f32 %v734_v62, %v706_v41  ;;  %v752_v11 = vadd.f32 %v750_v60, %v735_v18  ;;  %v797_v25 = vmul.f32 %v790_v12, %v766_v4  ;;  %v798_v20 = vmul.f32 %v794_v55, %v765_v47  ;;  %v3666_v62 = vld [vmem:[#allocation6 + $0x21] ss:$8 sm:$0x3]  ;;  %v3713_v18 = vld [vmem:[#allocation6 + $0x22] ss:$8 sm:$0x3] }
 0x14a   :  { %v3623_v61 = vpop.permute.xlu1 %991  ;;  %1688 = vrot.lane.b32.xlu0 %v2816_v59, %s2734_s18  ;;  %v812_v17 = vsel %vm805_vm0, %v3258_v26, %v3281_v28  ;;  %v813_v14 = vsel %vm805_vm0, %v3281_v28, %v3258_v26  ;;  %v935_v39 = vrot.slane %v3621_v8, %v3018_v51  ;;  %v827_v45 = vmul.f32 %v820_v9, %v807_v42 }
 0x14b   :  { %v753_v1 = vadd.f32 %v751_v48, %v736_v10  ;;  %v782_v12 = vadd.f32 %v780_v15, %v752_v11  ;;  %v828_v7 = vmul.f32 %v824_v6, %v806_v63  ;;  %v853_v28 = vsel %vm852_vm1, %v3307_v30, %v3330_v32 }
 0x14c   :  { %1690 = vrot.lane.b32.xlu1 %v2827_v3, %s2734_s18  ;;  %v3646_v31 = vpop.permute.xlu0 %996  ;;  %v854_v9 = vsel %vm852_vm1, %v3330_v32, %v3307_v30  ;;  %v961_v56 = vrot.slane %v3666_v62, %v3015_v50  ;;  %v965_v6 = vrot.slane %v3666_v62, %v3018_v51  ;;  %v844_v48 = vmul.f32 %v837_v19, %v813_v14 }
 0x14d   :  { %v783_v55 = vadd.f32 %v781_v23, %v753_v1  ;;  %v799_v41 = vadd.f32 %v797_v25, %v782_v12  ;;  %v4679_v47 = vrot.slane %v3524_v27, %v3018_v51  ;;  %v859_v30 = vsel %vm852_vm1, %v3356_v34, %v3379_v36  ;;  %v3737_v1 = vld [vmem:[#allocation6 + $0x83] ss:$8 sm:$0x3] }
 0x14e   :  { %v3668_v21 = vpop.permute.xlu1 %998  ;;  %1728 = vrot.lane.b32.xlu0 %v2812_v52, %s2735_s19  ;;  %v860_v32 = vsel %vm852_vm1, %v3379_v36, %v3356_v34  ;;  %v978_v27 = vrot.slane %v3689_v29, %v3015_v50  ;;  %v982_v19 = vrot.slane %v3689_v29, %v3018_v51  ;;  %v874_v63 = vmul.f32 %v867_v16, %v854_v9 }
 0x14f   :  { %v800_v60 = vadd.f32 %v798_v20, %v783_v55  ;;  %v845_v4 = vmul.f32 %v4679_v47, %v812_v17  ;;  %v829_v15 = vadd.f32 %v827_v45, %v799_v41  ;;  %v4680_v42 = vrot.slane %v3548_v44, %v3018_v51  ;;  %v3799_v41 = vld [vmem:[#allocation6 + $0x84] ss:$8 sm:$0x3] }
 0x150   :  { %1730 = vrot.lane.b32.xlu1 %v2821_v0, %s2735_s19  ;;  %v3693_v26 = vpop.permute.xlu0 %1036  ;;  %v900_v36 = vsel %vm899_vm2, %v3405_v38, %v3428_v40  ;;  %v901_v16 = vsel %vm899_vm2, %v3428_v40, %v3405_v38  ;;  %v1008_v44 = vrot.slane %v3713_v18, %v3015_v50  ;;  %v891_v62 = vmul.f32 %v884_v22, %v860_v32 }
 0x151   :  { %v830_v23 = vadd.f32 %v828_v7, %v800_v60  ;;  %v875_v11 = vmul.f32 %v4680_v42, %v853_v28  ;;  %v846_v25 = vadd.f32 %v844_v48, %v829_v15  ;;  %v892_v17 = vmul.f32 %v888_v35, %v859_v30  ;;  %v3779_v7 = vld [vmem:[#allocation6 + $0x23] ss:$8 sm:$0x3] }
 0x152   :  { %v3715_v10 = vpop.permute.xlu1 %1038  ;;  %1735 = vrot.lane.b32.xlu0 %v2816_v59, %s2735_s19  ;;  %v906_v38 = vsel %vm899_vm2, %v3454_v43, %v3477_v46  ;;  %v907_v40 = vsel %vm899_vm2, %v3477_v46, %v3454_v43  ;;  %v1012_v53 = vrot.slane %v3713_v18, %v3018_v51  ;;  %v1025_v22 = vrot.slane %v3737_v1, %v3015_v50  ;;  %v3815_v18 = vld [vmem:[#allocation6 + $0x24] ss:$8 sm:$0x3] }
 0x153   :  { %v847_v20 = vadd.f32 %v845_v4, %v830_v23  ;;  %v876_v35 = vadd.f32 %v874_v63, %v846_v25  ;;  %v921_v55 = vmul.f32 %v914_v57, %v901_v16  ;;  %v922_v45 = vmul.f32 %v918_v58, %v900_v36 }
 0x154   :  { %1737 = vrot.lane.b32.xlu1 %v2827_v3, %s2735_s19  ;;  %v3741_v34 = vpop.permute.xlu0 %1043  ;;  %v947_v43 = vsel %vm946_vm3, %v3503_v24, %v3526_v33  ;;  %v948_v46 = vsel %vm946_vm3, %v3526_v33, %v3503_v24  ;;  %v1029_v2 = vrot.slane %v3737_v1, %v3018_v51  ;;  %v938_v28 = vmul.f32 %v931_v54, %v907_v40 }
 0x155   :  { %v877_v12 = vadd.f32 %v875_v11, %v847_v20  ;;  %v893_v57 = vadd.f32 %v891_v62, %v876_v35  ;;  %v939_v9 = vmul.f32 %v935_v39, %v906_v38  ;;  %v953_v24 = vsel %vm946_vm3, %v3552_v37, %v3575_v5  ;;  %v3831_v11 = vld [vmem:[#allocation6 + $0x85] ss:$8 sm:$0x3] }
 0x156   :  { %v3760_v14 = vpop.permute.xlu1 %1045  ;;  %1775 = vrot.lane.b32.xlu0 %v2812_v52, %s2736_s20  ;;  %v954_v33 = vsel %vm946_vm3, %v3575_v5, %v3552_v37  ;;  %v1055_v8 = vrot.slane %v3779_v7, %v3015_v50  ;;  %v1059_v54 = vrot.slane %v3779_v7, %v3018_v51  ;;  %v968_v47 = vmul.f32 %v961_v56, %v948_v46  ;;  %v1144_v35 = vld [vmem:[#allocation6 + $0x25] ss:$8 sm:$0x3] }
 0x157   :  { %v894_v58 = vadd.f32 %v892_v17, %v877_v12  ;;  %v923_v39 = vadd.f32 %v921_v55, %v893_v57  ;;  %v969_v4 = vmul.f32 %v965_v6, %v947_v43  ;;  %v994_v37 = vsel %vm993_vm4, %v3601_v13, %v3623_v61  ;;  %v1161_v43 = vld [vmem:[#allocation6 + $0x86] ss:$8 sm:$0x3] }
 0x158   :  { %1777 = vrot.lane.b32.xlu1 %v2821_v0, %s2736_s20  ;;  %v3783_v29 = vpop.permute.xlu0 %1083  ;;  %v995_v5 = vsel %vm993_vm4, %v3623_v61, %v3601_v13  ;;  %v1072_v56 = vrot.slane %v3799_v41, %v3015_v50  ;;  %v1076_v6 = vrot.slane %v3799_v41, %v3018_v51  ;;  %v985_v23 = vmul.f32 %v978_v27, %v954_v33  ;;  %v1191_v33 = vld [vmem:[#allocation6 + $0x26] ss:$8 sm:$0x3] }
 0x159   :  { %v924_v48 = vadd.f32 %v922_v45, %v894_v58  ;;  %v940_v32 = vadd.f32 %v938_v28, %v923_v39  ;;  %v986_v63 = vmul.f32 %v982_v19, %v953_v24  ;;  %v1000_v61 = vsel %vm993_vm4, %v3646_v31, %v3668_v21 }
 0x15a   :  { %v1086_v60 = vpop.permute.xlu1 %1085  ;;  %1782 = vrot.lane.b32.xlu0 %v2816_v59, %s2736_s20  ;;  %v1001_v13 = vsel %vm993_vm4, %v3668_v21, %v3646_v31  ;;  %v1102_v27 = vrot.slane %v3815_v18, %v3015_v50  ;;  %v1015_v36 = vmul.f32 %v1008_v44, %v995_v5  ;;  %v1016_v16 = vmul.f32 %v1012_v53, %v994_v37  ;;  %v1208_v37 = vld [vmem:[#allocation6 + $0x87] ss:$8 sm:$0x3] }
 0x15b   :  { %v941_v15 = vadd.f32 %v939_v9, %v924_v48  ;;  %v970_v19 = vadd.f32 %v968_v47, %v940_v32  ;;  %v1041_v20 = vsel %vm1040_vm5, %v3693_v26, %v3715_v10  ;;  %v1042_v31 = vsel %vm1040_vm5, %v3715_v10, %v3693_v26 }
 0x15c   :  { %1784 = vrot.lane.b32.xlu1 %v2827_v3, %s2736_s20  ;;  %v1091_v30 = vpop.permute.xlu0 %1090  ;;  %v1106_v21 = vrot.slane %v3815_v18, %v3018_v51  ;;  %v1119_v44 = vrot.slane %v3831_v11, %v3015_v50  ;;  %v1032_v38 = vmul.f32 %v1025_v22, %v1001_v13  ;;  %v1033_v40 = vmul.f32 %v1029_v2, %v1000_v61 }
 0x15d   :  { %v971_v1 = vadd.f32 %v969_v4, %v941_v15  ;;  %v987_v62 = vadd.f32 %v985_v23, %v970_v19  ;;  %v1047_v26 = vsel %vm1040_vm5, %v3741_v34, %v3760_v14  ;;  %v1048_v10 = vsel %vm1040_vm5, %v3760_v14, %v3741_v34 }
 0x15e   :  { %v1093_v42 = vpop.permute.xlu1 %1092  ;;  %1822 = vrot.lane.b32.xlu0 %v2812_v52, %s2737_s21  ;;  %v1123_v12 = vrot.slane %v3831_v11, %v3018_v51  ;;  %v1062_v45 = vmul.f32 %v1055_v8, %v1042_v31  ;;  %v1063_v7 = vmul.f32 %v1059_v54, %v1041_v20  ;;  %v1088_v2 = vsel %vm1087_vm6, %v3783_v29, %v1086_v60 }
 0x15f   :  { %v988_v17 = vadd.f32 %v986_v63, %v971_v1  ;;  %v1017_v22 = vadd.f32 %v1015_v36, %v987_v62  ;;  %v1089_v34 = vsel %vm1087_vm6, %v1086_v60, %v3783_v29  ;;  %v1149_v14 = vrot.slane %v1144_v35, %v3015_v50 }
 0x160   :  { %1824 = vrot.lane.b32.xlu1 %v2821_v0, %s2737_s21  ;;  %v1131_v25 = vpop.permute.xlu0 %1130  ;;  %v1153_v57 = vrot.slane %v1144_v35, %v3018_v51  ;;  %v1079_v9 = vmul.f32 %v1072_v56, %v1048_v10  ;;  %v1080_v41 = vmul.f32 %v1076_v6, %v1047_v26  ;;  %v1094_v8 = vsel %vm1087_vm6, %v1091_v30, %v1093_v42  ;;  %v1272_v35 = vld [vmem:[#allocation6 + $0x30] ss:$8 sm:$0x3] }
 0x161   :  { %v1018_v55 = vadd.f32 %v1016_v16, %v988_v17  ;;  %v1034_v58 = vadd.f32 %v1032_v38, %v1017_v22  ;;  %v1095_v29 = vsel %vm1087_vm6, %v1093_v42, %v1091_v30  ;;  %v1166_v60 = vrot.slane %v1161_v43, %v3015_v50 }
 0x162   :  { %v1133_v53 = vpop.permute.xlu1 %1132  ;;  %1829 = vrot.lane.b32.xlu0 %v2816_v59, %s2737_s21  ;;  %v1170_v54 = vrot.slane %v1161_v43, %v3018_v51  ;;  %v1109_v47 = vmul.f32 %v1102_v27, %v1089_v34  ;;  %v1110_v4 = vmul.f32 %v1106_v21, %v1088_v2  ;;  %v1196_v30 = vrot.slane %v1191_v33, %v3015_v50 }
 0x163   :  { %v1035_v28 = vadd.f32 %v1033_v40, %v1018_v55  ;;  %v1064_v39 = vadd.f32 %v1062_v45, %v1034_v58  ;;  %v1135_v5 = vsel %vm1134_vm7, %v1131_v25, %v1133_v53  ;;  %v1136_v56 = vsel %vm1134_vm7, %v1133_v53, %v1131_v25  ;;  %v1238_v25 = vld [vmem:[#allocation6 + $0x27] ss:$8 sm:$0x3]  ;;  %v1255_v53 = vld [vmem:[#allocation6 + $0x90] ss:$8 sm:$0x3] }
 0x164   :  { %1831 = vrot.lane.b32.xlu1 %v2827_v3, %s2737_s21  ;;  %v1138_v46 = vpop.permute.xlu0 %1137  ;;  %v1126_v15 = vmul.f32 %v1119_v44, %v1095_v29  ;;  %v1127_v23 = vmul.f32 %v1123_v12, %v1094_v8  ;;  %v1200_v61 = vrot.slane %v1191_v33, %v3018_v51  ;;  %v1213_v13 = vrot.slane %v1208_v37, %v3015_v50 }
 0x165   :  { %v1065_v48 = vadd.f32 %v1063_v7, %v1035_v28  ;;  %v1081_v6 = vadd.f32 %v1079_v9, %v1064_v39  ;;  %v1156_v1 = vmul.f32 %v1149_v14, %v1136_v56  ;;  %v1157_v36 = vmul.f32 %v1153_v57, %v1135_v5 }
 0x166   :  { %v1140_v24 = vpop.permute.xlu1 %1139  ;;  %1869 = vrot.lane.b32.xlu0 %v2812_v52, %s2738_s24  ;;  %v1217_v21 = vrot.slane %v1208_v37, %v3018_v51  ;;  %v1243_v12 = vrot.slane %v1238_v25, %v3015_v50  ;;  %v1247_v22 = vrot.slane %v1238_v25, %v3018_v51  ;;  %v1260_v2 = vrot.slane %v1255_v53, %v3015_v50 }
 0x167   :  { %v1082_v32 = vadd.f32 %v1080_v41, %v1065_v48  ;;  %v1141_v42 = vsel %vm1134_vm7, %v1138_v46, %v1140_v24  ;;  %v1142_v11 = vsel %vm1134_vm7, %v1140_v24, %v1138_v46  ;;  %v1111_v27 = vadd.f32 %v1109_v47, %v1081_v6  ;;  %v1289_v41 = vld [vmem:[#allocation6 + $0x91] ss:$8 sm:$0x3] }
 0x168   :  { %1871 = vrot.lane.b32.xlu1 %v2821_v0, %s2738_s24  ;;  %v1178_v18 = vpop.permute.xlu0 %1177  ;;  %v1173_v17 = vmul.f32 %v1166_v60, %v1142_v11  ;;  %v1174_v38 = vmul.f32 %v1170_v54, %v1141_v42  ;;  %v1277_v34 = vrot.slane %v1272_v35, %v3015_v50  ;;  %v1264_v8 = vrot.slane %v1255_v53, %v3018_v51 }
 0x169   :  { %v1112_v19 = vadd.f32 %v1110_v4, %v1082_v32  ;;  %v1128_v44 = vadd.f32 %v1126_v15, %v1111_v27  ;;  %v1281_v29 = vrot.slane %v1272_v35, %v3018_v51  ;;  %v1294_v4 = vrot.slane %v1289_v41, %v3015_v50 }
 0x16a   :  { %v1180_v63 = vpop.permute.xlu1 %1179  ;;  %1876 = vrot.lane.b32.xlu0 %v2816_v59, %s2738_s24  ;;  %vm1497_vm14 = vcmp.lt.s32.totalorder %v3012_v49, 114  ;;  %vm1544_vm15 = vcmp.lt.s32.totalorder %v3012_v49, 113  ;;  %vm1591_vm0 = vcmp.lt.s32.totalorder %v3012_v49, 112  ;;  %vm1638_vm1 = vcmp.lt.s32.totalorder %v3012_v49, 111 }
 0x16b   :  { %v1182_v20 = vsel %vm1181_vm8, %v1178_v18, %v1180_v63  ;;  %v1183_v31 = vsel %vm1181_vm8, %v1180_v63, %v1178_v18  ;;  %v1129_v62 = vadd.f32 %v1127_v23, %v1112_v19  ;;  %v1158_v55 = vadd.f32 %v1156_v1, %v1128_v44  ;;  %v1319_v23 = vld [vmem:[#allocation6 + $0x31] ss:$8 sm:$0x3]  ;;  %v1336_v1 = vld [vmem:[#allocation6 + $0x92] ss:$8 sm:$0x3] }
 0x16c   :  { %1878 = vrot.lane.b32.xlu1 %v2827_v3, %s2738_s24  ;;  %v1185_v16 = vpop.permute.xlu0 %1184  ;;  %v1203_v7 = vmul.f32 %v1196_v30, %v1183_v31  ;;  %v1204_v43 = vmul.f32 %v1200_v61, %v1182_v20  ;;  %v1298_v18 = vrot.slane %v1289_v41, %v3018_v51  ;;  %v1284_v30 = vmul.f32 %v1277_v34, %v2812_v52 }
 0x16d   :  { %v1159_v45 = vadd.f32 %v1157_v36, %v1129_v62  ;;  %v1175_v14 = vadd.f32 %v1173_v17, %v1158_v55  ;;  %v1285_v15 = vmul.f32 %v1281_v29, %v2821_v0  ;;  %v1301_v27 = vmul.f32 %v1294_v4, %v2816_v59  ;;  %v1413_v4 = vld [vmem:[#allocation6 + $0x33] ss:$8 sm:$0x3] }
 0x16e   :  { %v1187_v40 = vpop.permute.xlu1 %1186  ;;  %1916 = vrot.lane.b32.xlu0 %v2812_v52, %s2739_s25  ;;  %v1302_v19 = vmul.f32 %v1298_v18, %v2827_v3  ;;  %v1324_v20 = vrot.slane %v1319_v23, %v3015_v50  ;;  %v1328_v31 = vrot.slane %v1319_v23, %v3018_v51  ;;  %v1345_v53 = vrot.slane %v1336_v1, %v3018_v51 }
 0x16f   :  { %v1188_v26 = vsel %vm1181_vm8, %v1185_v16, %v1187_v40  ;;  %v1189_v10 = vsel %vm1181_vm8, %v1187_v40, %v1185_v16  ;;  %v1176_v57 = vadd.f32 %v1174_v38, %v1159_v45  ;;  %v1205_v60 = vadd.f32 %v1203_v7, %v1175_v14 }
 0x170   :  { %1918 = vrot.lane.b32.xlu1 %v2821_v0, %s2739_s25  ;;  %v1225_v46 = vpop.permute.xlu0 %1224  ;;  %v1220_v58 = vmul.f32 %v1213_v13, %v1189_v10  ;;  %v1221_v28 = vmul.f32 %v1217_v21, %v1188_v26  ;;  %v1366_v21 = vld [vmem:[#allocation6 + $0x32] ss:$8 sm:$0x3]  ;;  %v1341_v40 = vrot.slane %v1336_v1, %v3015_v50  ;;  %v1422_v23 = vrot.slane %v1413_v4, %v3018_v51 }
 0x171   :  { %v1206_v54 = vadd.f32 %v1204_v43, %v1176_v57  ;;  %v1371_v26 = vrot.slane %v1366_v21, %v3015_v50  ;;  %vm1685_vm2 = vcmp.lt.s32.totalorder %v3012_v49, 110  ;;  %vm1732_vm3 = vcmp.lt.s32.totalorder %v3012_v49, 109 }
 0x172   :  { %v1227_v9 = vpop.permute.xlu1 %1226  ;;  %1923 = vrot.lane.b32.xlu0 %v2816_v59, %s2739_s25  ;;  %v1222_v37 = vadd.f32 %v1220_v58, %v1205_v60  ;;  %vm1779_vm4 = vcmp.lt.s32.totalorder %v3012_v49, 99  ;;  %vm1826_vm5 = vcmp.lt.s32.totalorder %v3012_v49, 98  ;;  %vm1873_vm6 = vcmp.lt.s32.totalorder %v3012_v49, 97 }
 0x173   :  { %v1229_v24 = vsel %vm1228_vm9, %v1225_v46, %v1227_v9  ;;  %v1230_v33 = vsel %vm1228_vm9, %v1227_v9, %v1225_v46  ;;  %v1223_v5 = vadd.f32 %v1221_v28, %v1206_v54  ;;  %v1375_v46 = vrot.slane %v1366_v21, %v3018_v51  ;;  %v1383_v9 = vld [vmem:[#allocation6 + $0x93] ss:$8 sm:$0x3]  ;;  %v1460_v21 = vld [vmem:[#allocation6 + $0x34] ss:$8 sm:$0x3] }
 0x174   :  { %v1250_v39 = vmul.f32 %v1243_v12, %v1230_v33  ;;  %v1251_v48 = vmul.f32 %v1247_v22, %v1229_v24  ;;  %1925 = vrot.lane.b32.xlu1 %v2827_v3, %s2739_s25  ;;  %v1232_v47 = vpop.permute.xlu0 %1231  ;;  %vm1920_vm7 = vcmp.lt.s32.totalorder %v3012_v49, 96  ;;  %vm1967_vm8 = vcmp.lt.s32.totalorder %v3012_v49, 95 }
 0x176   :  { %v1234_v56 = vpop.permute.xlu1 %1233  ;;  %1963 = vrot.lane.b32.xlu0 %v2812_v52, %s2740_s26  ;;  %v1252_v63 = vadd.f32 %v1250_v39, %v1222_v37  ;;  %v1253_v42 = vadd.f32 %v1251_v48, %v1223_v5  ;;  %v1388_v39 = vrot.slane %v1383_v9, %v3015_v50  ;;  %v1392_v48 = vrot.slane %v1383_v9, %v3018_v51 }
 0x177   :  { %v1235_v6 = vsel %vm1228_vm9, %v1232_v47, %v1234_v56  ;;  %v1236_v32 = vsel %vm1228_vm9, %v1234_v56, %v1232_v47  ;;  %vm2014_vm9 = vcmp.lt.s32.totalorder %v3012_v49, 94 }
 0x178   :  { %v1267_v11 = vmul.f32 %v1260_v2, %v1236_v32  ;;  %v1268_v61 = vmul.f32 %v1264_v8, %v1235_v6  ;;  %1965 = vrot.lane.b32.xlu1 %v2821_v0, %s2740_s26  ;;  %v1306_v13 = vpop.permute.xlu0 %1305  ;;  %v2441_v2 = vstv %s2440_s28 }
 0x179   :  { %2598 = vrsqrt.f32 %v2441_v2 }
 0x17a   :  { %v1269_v36 = vadd.f32 %v1267_v11, %v1252_v63  ;;  %v1270_v16 = vadd.f32 %v1268_v61, %v1253_v42  ;;  %v1308_v25 = vpop.permute.xlu1 %1307  ;;  %1970 = vrot.lane.b32.xlu0 %v2816_v59, %s2740_s26  ;;  %v1430_v42 = vld [vmem:[#allocation6 + $0x94] ss:$8 sm:$0x3] }
 0x17b   :  { %v1310_v44 = vsel %vm1309_vm10, %v1306_v13, %v1308_v25  ;;  %v1311_v62 = vsel %vm1309_vm10, %v1308_v25, %v1306_v13 }
 0x17c   :  { %v1286_v17 = vadd.f32 %v1284_v30, %v1269_v36  ;;  %v1287_v38 = vadd.f32 %v1285_v15, %v1270_v16  ;;  %1972 = vrot.lane.b32.xlu1 %v2827_v3, %s2740_s26  ;;  %v1313_v35 = vpop.permute.xlu0 %1312  ;;  %v1331_v22 = vmul.f32 %v1324_v20, %v1310_v44  ;;  %v1332_v55 = vmul.f32 %v1328_v31, %v1311_v62 }
 0x17d   :  { %v1418_v15 = vrot.slane %v1413_v4, %v3015_v50  ;;  %v1435_v36 = vrot.slane %v1430_v42, %v3015_v50  ;;  %v1439_v20 = vrot.slane %v1430_v42, %v3018_v51 }
 0x17e   :  { %v1303_v10 = vadd.f32 %v1301_v27, %v1286_v17  ;;  %v1304_v12 = vadd.f32 %v1302_v19, %v1287_v38  ;;  %v1315_v45 = vpop.permute.xlu1 %1314  ;;  %2010 = vrot.lane.b32.xlu0 %v2812_v52, %s2741_s29 }
 0x17f   :  { %v1316_v7 = vsel %vm1309_vm10, %v1313_v35, %v1315_v45  ;;  %v1317_v43 = vsel %vm1309_vm10, %v1315_v45, %v1313_v35  ;;  %vm2061_vm10 = vcmp.lt.s32.totalorder %v3012_v49, 93 }
 0x180   :  { %v1333_v34 = vadd.f32 %v1331_v22, %v1303_v10  ;;  %v1334_v14 = vadd.f32 %v1332_v55, %v1304_v12  ;;  %v1348_v57 = vmul.f32 %v1341_v40, %v1316_v7  ;;  %v1349_v58 = vmul.f32 %v1345_v53, %v1317_v43  ;;  %2012 = vrot.lane.b32.xlu1 %v2821_v0, %s2741_s29  ;;  %v1353_v28 = vpop.permute.xlu0 %1352  ;;  %v1477_v22 = vld [vmem:[#allocation6 + $0x95] ss:$8 sm:$0x3] }
 0x181   :  { %v1469_v10 = vrot.slane %v1460_v21, %v3018_v51 }
 0x182   :  { %v1350_v41 = vadd.f32 %v1348_v57, %v1333_v34  ;;  %v1351_v24 = vadd.f32 %v1349_v58, %v1334_v14  ;;  %v1355_v33 = vpop.permute.xlu1 %1354  ;;  %2017 = vrot.lane.b32.xlu0 %v2816_v59, %s2741_s29  ;;  %v1482_v14 = vrot.slane %v1477_v22, %v3015_v50  ;;  %v1486_v57 = vrot.slane %v1477_v22, %v3018_v51 }
 0x183   :  { %v1357_v8 = vsel %vm1356_vm11, %v1353_v28, %v1355_v33  ;;  %v1358_v29 = vsel %vm1356_vm11, %v1355_v33, %v1353_v28  ;;  %v2599_v27 = vpop.eup %2598  ;;  %v1507_v28 = vld [vmem:[#allocation6 + $0x35] ss:$8 sm:$0x3] }
 0x184   :  { %v1378_v60 = vmul.f32 %v1371_v26, %v1357_v8  ;;  %v1379_v54 = vmul.f32 %v1375_v46, %v1358_v29  ;;  %2019 = vrot.lane.b32.xlu1 %v2827_v3, %s2741_s29  ;;  %v1360_v47 = vpop.permute.xlu0 %1359  ;;  %2538 = vpush %v2599_v27  ;;  %v1465_v26 = vrot.slane %v1460_v21, %v3015_v50 }
 0x186   :  { %v1380_v18 = vadd.f32 %v1378_v60, %v1350_v41  ;;  %v1381_v37 = vadd.f32 %v1379_v54, %v1351_v24  ;;  %v1362_v5 = vpop.permute.xlu1 %1361  ;;  %2057 = vrot.lane.b32.xlu0 %v2812_v52, %s2742_s30  ;;  %v1512_v54 = vrot.slane %v1507_v28, %v3015_v50 }
 0x187   :  { %v1363_v56 = vsel %vm1356_vm11, %v1360_v47, %v1362_v5  ;;  %v1364_v30 = vsel %vm1356_vm11, %v1362_v5, %v1360_v47  ;;  %v1524_v47 = vld [vmem:[#allocation6 + $0x96] ss:$8 sm:$0x3]  ;;  %vm2108_vm11 = vcmp.lt.s32.totalorder %v3012_v49, 83 }
 0x188   :  { %v1395_v6 = vmul.f32 %v1388_v39, %v1363_v56  ;;  %v1396_v32 = vmul.f32 %v1392_v48, %v1364_v30  ;;  %2059 = vrot.lane.b32.xlu1 %v2821_v0, %s2742_s30  ;;  %v1400_v63 = vpop.permute.xlu0 %1399  ;;  %v1516_v39 = vrot.slane %v1507_v28, %v3018_v51 }
 0x18a   :  { %v1397_v11 = vadd.f32 %v1395_v6, %v1380_v18  ;;  %v1398_v61 = vadd.f32 %v1396_v32, %v1381_v37  ;;  %v1402_v13 = vpop.permute.xlu1 %1401  ;;  %2064 = vrot.lane.b32.xlu0 %v2816_v59, %s2742_s30  ;;  %v1529_v32 = vrot.slane %v1524_v47, %v3015_v50 }
 0x18b   :  { %v1404_v19 = vsel %vm1403_vm12, %v1400_v63, %v1402_v13  ;;  %v1405_v1 = vsel %vm1403_vm12, %v1402_v13, %v1400_v63  ;;  %v1554_v63 = vld [vmem:[#allocation6 + $0x36] ss:$8 sm:$0x3] }
 0x18c   :  { %v1425_v16 = vmul.f32 %v1418_v15, %v1404_v19  ;;  %v1426_v25 = vmul.f32 %v1422_v23, %v1405_v1  ;;  %2066 = vrot.lane.b32.xlu1 %v2827_v3, %s2742_s30  ;;  %v1407_v31 = vpop.permute.xlu0 %1406  ;;  %v1533_v15 = vrot.slane %v1524_v47, %v3018_v51 }
 0x18e   :  { %v1427_v44 = vadd.f32 %v1425_v16, %v1397_v11  ;;  %v1428_v62 = vadd.f32 %v1426_v25, %v1398_v61  ;;  %v1409_v17 = vpop.permute.xlu1 %1408  ;;  %2104 = vrot.lane.b32.xlu0 %v2812_v52, %s2743_s4  ;;  %v1563_v16 = vrot.slane %v1554_v63, %v3018_v51 }
 0x18f   :  { %v1410_v38 = vsel %vm1403_vm12, %v1407_v31, %v1409_v17  ;;  %v1411_v40 = vsel %vm1403_vm12, %v1409_v17, %v1407_v31  ;;  %vm2155_vm12 = vcmp.lt.s32.totalorder %v3012_v49, 82 }
 0x190   :  { %v1442_v53 = vmul.f32 %v1435_v36, %v1410_v38  ;;  %v1443_v35 = vmul.f32 %v1439_v20, %v1411_v40  ;;  %2106 = vrot.lane.b32.xlu1 %v2821_v0, %s2743_s4  ;;  %v1447_v12 = vpop.permute.xlu0 %1446  ;;  %v1559_v36 = vrot.slane %v1554_v63, %v3015_v50  ;;  %v1571_v20 = vld [vmem:[#allocation6 + $0x97] ss:$8 sm:$0x3] }
 0x192   :  { %v1444_v55 = vadd.f32 %v1442_v53, %v1427_v44  ;;  %v1445_v45 = vadd.f32 %v1443_v35, %v1428_v62  ;;  %v1449_v7 = vpop.permute.xlu1 %1448  ;;  %2111 = vrot.lane.b32.xlu0 %v2816_v59, %s2743_s4  ;;  %v1576_v53 = vrot.slane %v1571_v20, %v3015_v50  ;;  %v1580_v35 = vrot.slane %v1571_v20, %v3018_v51 }
 0x193   :  { %v1451_v43 = vsel %vm1450_vm13, %v1447_v12, %v1449_v7  ;;  %v1452_v46 = vsel %vm1450_vm13, %v1449_v7, %v1447_v12 }
 0x194   :  { %v1472_v2 = vmul.f32 %v1465_v26, %v1451_v43  ;;  %v1473_v34 = vmul.f32 %v1469_v10, %v1452_v46  ;;  %2113 = vrot.lane.b32.xlu1 %v2827_v3, %s2743_s4  ;;  %v1454_v58 = vpop.permute.xlu0 %1453  ;;  %v1601_v10 = vld [vmem:[#allocation6 + $0x37] ss:$8 sm:$0x3] }
 0x196   :  { %v1474_v9 = vadd.f32 %v1472_v2, %v1444_v55  ;;  %v1475_v41 = vadd.f32 %v1473_v34, %v1445_v45  ;;  %v1456_v24 = vpop.permute.xlu1 %1455  ;;  %2151 = vrot.lane.b32.xlu0 %v2812_v52, %s2744_s5  ;;  %v1606_v2 = vrot.slane %v1601_v10, %v3015_v50  ;;  %v1610_v34 = vrot.slane %v1601_v10, %v3018_v51 }
 0x197   :  { %v1457_v33 = vsel %vm1450_vm13, %v1454_v58, %v1456_v24  ;;  %v1458_v8 = vsel %vm1450_vm13, %v1456_v24, %v1454_v58  ;;  %vm2202_vm13 = vcmp.lt.s32.totalorder %v3012_v49, 81 }
 0x198   :  { %v1489_v29 = vmul.f32 %v1482_v14, %v1457_v33  ;;  %v1490_v60 = vmul.f32 %v1486_v57, %v1458_v8  ;;  %2153 = vrot.lane.b32.xlu1 %v2821_v0, %s2744_s5  ;;  %v1494_v48 = vpop.permute.xlu0 %1493  ;;  %v1618_v57 = vld [vmem:[#allocation6 + $0xa0] ss:$8 sm:$0x3] }
 0x19a   :  { %v1491_v4 = vadd.f32 %v1489_v29, %v1474_v9  ;;  %v1492_v18 = vadd.f32 %v1490_v60, %v1475_v41  ;;  %v1496_v37 = vpop.permute.xlu1 %1495  ;;  %2158 = vrot.lane.b32.xlu0 %v2816_v59, %s2744_s5  ;;  %v1623_v29 = vrot.slane %v1618_v57, %v3015_v50  ;;  %v1627_v60 = vrot.slane %v1618_v57, %v3018_v51 }
 0x19b   :  { %v1498_v5 = vsel %vm1497_vm14, %v1494_v48, %v1496_v37  ;;  %v1499_v56 = vsel %vm1497_vm14, %v1496_v37, %v1494_v48 }
 0x19c   :  { %v1519_v30 = vmul.f32 %v1512_v54, %v1498_v5  ;;  %v1520_v6 = vmul.f32 %v1516_v39, %v1499_v56  ;;  %2160 = vrot.lane.b32.xlu1 %v2827_v3, %s2744_s5  ;;  %v1501_v23 = vpop.permute.xlu0 %1500  ;;  %v1648_v39 = vld [vmem:[#allocation6 + $0x40] ss:$8 sm:$0x3] }
 0x19e   :  { %v1521_v42 = vadd.f32 %v1519_v30, %v1491_v4  ;;  %v1522_v11 = vadd.f32 %v1520_v6, %v1492_v18  ;;  %v1503_v61 = vpop.permute.xlu1 %1502  ;;  %2198 = vrot.lane.b32.xlu0 %v2812_v52, %s2745_s6  ;;  %v1653_v30 = vrot.slane %v1648_v39, %v3015_v50  ;;  %v1657_v6 = vrot.slane %v1648_v39, %v3018_v51  ;;  %v1712_v39 = vld [vmem:[#allocation6 + $0xa2] ss:$8 sm:$0x3] }
 0x19f   :  { %v1504_v13 = vsel %vm1497_vm14, %v1501_v23, %v1503_v61  ;;  %v1505_v27 = vsel %vm1497_vm14, %v1503_v61, %v1501_v23  ;;  %vm2249_vm14 = vcmp.lt.s32.totalorder %v3012_v49, 80 }
 0x1a0   :  { %v1536_v19 = vmul.f32 %v1529_v32, %v1504_v13  ;;  %v1537_v1 = vmul.f32 %v1533_v15, %v1505_v27  ;;  %2200 = vrot.lane.b32.xlu1 %v2821_v0, %s2745_s6  ;;  %v1541_v25 = vpop.permute.xlu0 %1540  ;;  %v1665_v15 = vld [vmem:[#allocation6 + $0xa1] ss:$8 sm:$0x3] }
 0x1a2   :  { %v1538_v31 = vadd.f32 %v1536_v19, %v1521_v42  ;;  %v1539_v21 = vadd.f32 %v1537_v1, %v1522_v11  ;;  %v1543_v44 = vpop.permute.xlu1 %1542  ;;  %2205 = vrot.lane.b32.xlu0 %v2816_v59, %s2745_s6  ;;  %v1670_v19 = vrot.slane %v1665_v15, %v3015_v50  ;;  %v1674_v1 = vrot.slane %v1665_v15, %v3018_v51 }
 0x1a3   :  { %v1545_v62 = vsel %vm1544_vm15, %v1541_v25, %v1543_v44  ;;  %v1546_v17 = vsel %vm1544_vm15, %v1543_v44, %v1541_v25 }
 0x1a4   :  { %v1566_v38 = vmul.f32 %v1559_v36, %v1545_v62  ;;  %v1567_v40 = vmul.f32 %v1563_v16, %v1546_v17  ;;  %2207 = vrot.lane.b32.xlu1 %v2827_v3, %s2745_s6  ;;  %v1548_v26 = vpop.permute.xlu0 %1547 }
 0x1a6   :  { %v1568_v12 = vadd.f32 %v1566_v38, %v1538_v31  ;;  %v1569_v22 = vadd.f32 %v1567_v40, %v1539_v21  ;;  %v1550_v55 = vpop.permute.xlu1 %1549  ;;  %2245 = vrot.lane.b32.xlu0 %v2812_v52, %s2746_s7 }
 0x1a7   :  { %v1551_v45 = vsel %vm1544_vm15, %v1548_v26, %v1550_v55  ;;  %v1552_v7 = vsel %vm1544_vm15, %v1550_v55, %v1548_v26  ;;  %vm2296_vm15 = vcmp.lt.s32.totalorder %v3012_v49, 79 }
 0x1a8   :  { %v1583_v43 = vmul.f32 %v1576_v53, %v1551_v45  ;;  %v1584_v46 = vmul.f32 %v1580_v35, %v1552_v7  ;;  %2247 = vrot.lane.b32.xlu1 %v2821_v0, %s2746_s7  ;;  %v1588_v14 = vpop.permute.xlu0 %1587 }
 0x1aa   :  { %v1585_v58 = vadd.f32 %v1583_v43, %v1568_v12  ;;  %v1586_v28 = vadd.f32 %v1584_v46, %v1569_v22  ;;  %v1590_v9 = vpop.permute.xlu1 %1589  ;;  %2252 = vrot.lane.b32.xlu0 %v2816_v59, %s2746_s7 }
 0x1ab   :  { %v1592_v41 = vsel %vm1591_vm0, %v1588_v14, %v1590_v9  ;;  %v1593_v24 = vsel %vm1591_vm0, %v1590_v9, %v1588_v14 }
 0x1ac   :  { %v1613_v33 = vmul.f32 %v1606_v2, %v1592_v41  ;;  %v1614_v8 = vmul.f32 %v1610_v34, %v1593_v24  ;;  %2254 = vrot.lane.b32.xlu1 %v2827_v3, %s2746_s7  ;;  %v1595_v54 = vpop.permute.xlu0 %1594 }
 0x1ae   :  { %v1615_v48 = vadd.f32 %v1613_v33, %v1585_v58  ;;  %v1616_v47 = vadd.f32 %v1614_v8, %v1586_v28  ;;  %v1597_v4 = vpop.permute.xlu1 %1596  ;;  %2292 = vrot.lane.b32.xlu0 %v2812_v52, %s2747_s8 }
 0x1af   :  { %v1598_v18 = vsel %vm1591_vm0, %v1595_v54, %v1597_v4  ;;  %v1599_v37 = vsel %vm1591_vm0, %v1597_v4, %v1595_v54  ;;  %vm2343_vm0 = vcmp.lt.s32.totalorder %v3012_v49, 78 }
 0x1b0   :  { %v1630_v5 = vmul.f32 %v1623_v29, %v1598_v18  ;;  %v1631_v56 = vmul.f32 %v1627_v60, %v1599_v37  ;;  %2294 = vrot.lane.b32.xlu1 %v2821_v0, %s2747_s8  ;;  %v1635_v32 = vpop.permute.xlu0 %1634  ;;  %v1695_v60 = vld [vmem:[#allocation6 + $0x41] ss:$8 sm:$0x3] }
 0x1b1   :  { %v1700_v18 = vrot.slane %v1695_v60, %v3015_v50  ;;  %v1704_v37 = vrot.slane %v1695_v60, %v3018_v51 }
 0x1b2   :  { %v1632_v23 = vadd.f32 %v1630_v5, %v1615_v48  ;;  %v1633_v63 = vadd.f32 %v1631_v56, %v1616_v47  ;;  %v1637_v42 = vpop.permute.xlu1 %1636  ;;  %2299 = vrot.lane.b32.xlu0 %v2816_v59, %s2747_s8  ;;  %v1742_v48 = vld [vmem:[#allocation6 + $0x42] ss:$8 sm:$0x3]  ;;  %v1759_v47 = vld [vmem:[#allocation6 + $0xa3] ss:$8 sm:$0x3]  ;;  %v1717_v56 = vrot.slane %v1712_v39, %v3015_v50 }
 0x1b3   :  { %v1639_v11 = vsel %vm1638_vm1, %v1635_v32, %v1637_v42  ;;  %v1640_v61 = vsel %vm1638_vm1, %v1637_v42, %v1635_v32  ;;  %v4153_v5 = vld [vmem:[#allocation6 + $0x43] ss:$8 sm:$0x3]  ;;  %v4159_v32 = vld [vmem:[#allocation6 + $0xa4] ss:$8 sm:$0x3]  ;;  %v1751_v42 = vrot.slane %v1742_v48, %v3018_v51 }
 0x1b4   :  { %v1660_v13 = vmul.f32 %v1653_v30, %v1639_v11  ;;  %v1661_v27 = vmul.f32 %v1657_v6, %v1640_v61  ;;  %2301 = vrot.lane.b32.xlu1 %v2827_v3, %s2747_s8  ;;  %v1642_v36 = vpop.permute.xlu0 %1641  ;;  %v1721_v30 = vrot.slane %v1712_v39, %v3018_v51  ;;  %v1747_v6 = vrot.slane %v1742_v48, %v3015_v50  ;;  %v4169_v61 = vld [vmem:[#allocation6 + $0x44] ss:$8 sm:$0x3] }
 0x1b5   :  { %v1764_v11 = vrot.slane %v1759_v47, %v3015_v50  ;;  %v1845_v60 = vrot.slane %v4169_v61, %v3018_v51  ;;  %s2539_s13 = spop %2538 }
 0x1b6   :  { %v1662_v16 = vadd.f32 %v1660_v13, %v1632_v23  ;;  %v1663_v25 = vadd.f32 %v1661_v27, %v1633_v63  ;;  %v1644_v20 = vpop.permute.xlu1 %1643  ;;  %2339 = vrot.lane.b32.xlu0 %v2812_v52, %s2748_s0  ;;  %v1768_v13 = vrot.slane %v1759_v47, %v3018_v51  ;;  %v1794_v27 = vrot.slane %v4153_v5, %v3015_v50 }
 0x1b7   :  { %v1645_v31 = vsel %vm1638_vm1, %v1642_v36, %v1644_v20  ;;  %v1646_v21 = vsel %vm1638_vm1, %v1644_v20, %v1642_v36  ;;  %v1811_v20 = vrot.slane %v4159_v32, %v3015_v50  ;;  %vm2390_vm1 = vcmp.lt.s32.totalorder %v3012_v49, 77 }
 0x1b8   :  { %v1677_v44 = vmul.f32 %v1670_v19, %v1645_v31  ;;  %v1678_v62 = vmul.f32 %v1674_v1, %v1646_v21  ;;  %2341 = vrot.lane.b32.xlu1 %v2821_v0, %s2748_s0  ;;  %v1682_v17 = vpop.permute.xlu0 %1681  ;;  %v1798_v19 = vrot.slane %v4153_v5, %v3018_v51  ;;  %v4177_v1 = vld [vmem:[#allocation6 + $0xa5] ss:$8 sm:$0x3]  ;;  %v1815_v31 = vrot.slane %v4159_v32, %v3018_v51 }
 0x1b9   :  { %v1858_v39 = vrot.slane %v4177_v1, %v3015_v50 }
 0x1ba   :  { %v4088_v38 = vadd.f32 %v1677_v44, %v1662_v16  ;;  %v4090_v40 = vadd.f32 %v1678_v62, %v1663_v25  ;;  %v1684_v53 = vpop.permute.xlu1 %1683  ;;  %2346 = vrot.lane.b32.xlu0 %v2816_v59, %s2748_s0  ;;  %v1841_v62 = vrot.slane %v4169_v61, %v3015_v50 }
 0x1bb   :  { %v1686_v23 = vsel %vm1685_vm2, %v1682_v17, %v1684_v53  ;;  %v1687_v63 = vsel %vm1685_vm2, %v1684_v53, %v1682_v17  ;;  %v4192_v17 = vld [vmem:[#allocation6 + $0x45] ss:$8 sm:$0x3] }
 0x1bc   :  { %2348 = vrot.lane.b32.xlu1 %v2827_v3, %s2748_s0  ;;  %v1689_v35 = vpop.permute.xlu0 %1688  ;;  %v1707_v21 = vmul.f32 %v1700_v18, %v1686_v23  ;;  %v1708_v44 = vmul.f32 %v1704_v37, %v1687_v63  ;;  %v1862_v18 = vrot.slane %v4177_v1, %v3018_v51  ;;  %v4211_v37 = vld [vmem:[#allocation6 + $0xa6] ss:$8 sm:$0x3] }
 0x1be   :  { %v1691_v26 = vpop.permute.xlu1 %1690  ;;  %2386 = vrot.lane.b32.xlu0 %v2812_v52, %s2749_s9  ;;  %v1709_v32 = vadd.f32 %v1707_v21, %v4088_v38  ;;  %v1710_v23 = vadd.f32 %v1708_v44, %v4090_v40  ;;  %v1905_v38 = vrot.slane %v4211_v37, %v3015_v50 }
 0x1bf   :  { %v1692_v16 = vsel %vm1685_vm2, %v1689_v35, %v1691_v26  ;;  %v1693_v25 = vsel %vm1685_vm2, %v1691_v26, %v1689_v35 }
 0x1c0   :  { %2388 = vrot.lane.b32.xlu1 %v2821_v0, %s2749_s9  ;;  %v4096_v10 = vpop.permute.xlu0 %1728  ;;  %v1724_v48 = vmul.f32 %v1717_v56, %v1692_v16  ;;  %v1725_v47 = vmul.f32 %v1721_v30, %v1693_v25  ;;  %v1888_v56 = vrot.slane %v4192_v17, %v3015_v50  ;;  %v1892_v30 = vrot.slane %v4192_v17, %v3018_v51  ;;  %v4229_v16 = vld [vmem:[#allocation6 + $0x46] ss:$8 sm:$0x3] }
 0x1c2   :  { %v4098_v12 = vpop.permute.xlu1 %1730  ;;  %2393 = vrot.lane.b32.xlu0 %v2816_v59, %s2749_s9 }
 0x1c3   :  { %v1733_v35 = vsel %vm1732_vm3, %v4096_v10, %v4098_v12  ;;  %v1734_v26 = vsel %vm1732_vm3, %v4098_v12, %v4096_v10 }
 0x1c4   :  { %2395 = vrot.lane.b32.xlu1 %v2827_v3, %s2749_s9  ;;  %v4102_v22 = vpop.permute.xlu0 %1735  ;;  %v1754_v63 = vmul.f32 %v1747_v6, %v1733_v35  ;;  %v1755_v61 = vmul.f32 %v1751_v42, %v1734_v26  ;;  %v1726_v6 = vadd.f32 %v1724_v48, %v1709_v32  ;;  %v1727_v42 = vadd.f32 %v1725_v47, %v1710_v23  ;;  %v4246_v35 = vld [vmem:[#allocation6 + $0xa7] ss:$8 sm:$0x3] }
 0x1c5   :  { %v4262_v32 = vld [vmem:[#allocation6 + $0x47] ss:$8 sm:$0x3] }
 0x1c6   :  { %v4104_v55 = vpop.permute.xlu1 %1737  ;;  %v1756_v48 = vadd.f32 %v1754_v63, %v1726_v6  ;;  %v1757_v47 = vadd.f32 %v1755_v61, %v1727_v42 }
 0x1c7   :  { %v1739_v10 = vsel %vm1732_vm3, %v4102_v22, %v4104_v55  ;;  %v1740_v12 = vsel %vm1732_vm3, %v4104_v55, %v4102_v22 }
 0x1c8   :  { %v4106_v45 = vpop.permute.xlu0 %1775  ;;  %v1771_v21 = vmul.f32 %v1764_v11, %v1739_v10  ;;  %v1772_v44 = vmul.f32 %v1768_v13, %v1740_v12  ;;  %v1935_v11 = vrot.slane %v4229_v16, %v3015_v50  ;;  %v1939_v13 = vrot.slane %v4229_v16, %v3018_v51 }
 0x1ca   :  { %v4108_v7 = vpop.permute.xlu1 %1777  ;;  %v1774_v63 = vadd.f32 %v1772_v44, %v1757_v47 }
 0x1cb   :  { %v1780_v22 = vsel %vm1779_vm4, %v4106_v45, %v4108_v7  ;;  %v1781_v55 = vsel %vm1779_vm4, %v4108_v7, %v4106_v45 }
 0x1cc   :  { %v4110_v43 = vpop.permute.xlu0 %1782  ;;  %v1801_v10 = vmul.f32 %v1794_v27, %v1780_v22  ;;  %v1802_v12 = vmul.f32 %v1798_v19, %v1781_v55  ;;  %v1956_v27 = vrot.slane %v4246_v35, %v3018_v51  ;;  %v1773_v19 = vadd.f32 %v1771_v21, %v1756_v48  ;;  %v4279_v55 = vld [vmem:[#allocation6 + $0xb0] ss:$8 sm:$0x3] }
 0x1ce   :  { %v4112_v52 = vpop.permute.xlu1 %1784  ;;  %v1803_v42 = vadd.f32 %v1801_v10, %v1773_v19  ;;  %v1804_v21 = vadd.f32 %v1802_v12, %v1774_v63 }
 0x1cf   :  { %v1786_v45 = vsel %vm1779_vm4, %v4110_v43, %v4112_v52  ;;  %v1787_v7 = vsel %vm1779_vm4, %v4112_v52, %v4110_v43  ;;  %v1952_v52 = vrot.slane %v4246_v35, %v3015_v50 }
 0x1d0   :  { %v4114_v0 = vpop.permute.xlu0 %1822  ;;  %v1818_v61 = vmul.f32 %v1811_v20, %v1786_v45  ;;  %v1819_v22 = vmul.f32 %v1815_v31, %v1787_v7  ;;  %v1982_v20 = vrot.slane %v4262_v32, %v3015_v50  ;;  %v1986_v31 = vrot.slane %v4262_v32, %v3018_v51  ;;  %v4295_v7 = vld [vmem:[#allocation6 + $0x50] ss:$8 sm:$0x3] }
 0x1d1   :  { %v2029_v1 = vrot.slane %v4295_v7, %v3015_v50 }
 0x1d2   :  { %v4116_v46 = vpop.permute.xlu1 %1824 }
 0x1d3   :  { %v1827_v40 = vsel %vm1826_vm5, %v4114_v0, %v4116_v46  ;;  %v1828_v43 = vsel %vm1826_vm5, %v4116_v46, %v4114_v0 }
 0x1d4   :  { %v4118_v2 = vpop.permute.xlu0 %1829  ;;  %v1848_v44 = vmul.f32 %v1841_v62, %v1827_v40  ;;  %v1849_v45 = vmul.f32 %v1845_v60, %v1828_v43  ;;  %v2003_v62 = vrot.slane %v4279_v55, %v3018_v51  ;;  %v1820_v60 = vadd.f32 %v1818_v61, %v1803_v42  ;;  %v4318_v43 = vld [vmem:[#allocation6 + $0xb1] ss:$8 sm:$0x3] }
 0x1d5   :  { %v1821_v40 = vadd.f32 %v1819_v22, %v1804_v21  ;;  %v2050_v17 = vrot.slane %v4318_v43, %v3018_v51 }
 0x1d6   :  { %v4120_v59 = vpop.permute.xlu1 %1831  ;;  %v1850_v19 = vadd.f32 %v1848_v44, %v1820_v60  ;;  %v4681_v44 = vrot.slane %v4211_v37, %v3018_v51 }
 0x1d7   :  { %v1833_v0 = vsel %vm1826_vm5, %v4118_v2, %v4120_v59  ;;  %v1834_v46 = vsel %vm1826_vm5, %v4120_v59, %v4118_v2  ;;  %v1999_v59 = vrot.slane %v4279_v55, %v3015_v50  ;;  %v1851_v63 = vadd.f32 %v1849_v45, %v1821_v40 }
 0x1d8   :  { %v4122_v3 = vpop.permute.xlu0 %1869  ;;  %v1865_v10 = vmul.f32 %v1858_v39, %v1833_v0  ;;  %v1866_v12 = vmul.f32 %v1862_v18, %v1834_v46  ;;  %v2033_v18 = vrot.slane %v4295_v7, %v3018_v51  ;;  %v4340_v0 = vld [vmem:[#allocation6 + $0x51] ss:$8 sm:$0x3] }
 0x1d9   :  { %v2076_v37 = vrot.slane %v4340_v0, %v3015_v50 }
 0x1da   :  { %v4124_v34 = vpop.permute.xlu1 %1871  ;;  %v1868_v42 = vadd.f32 %v1866_v12, %v1851_v63  ;;  %v4403_v63 = vld [vmem:[#allocation6 + $0x52] ss:$8 sm:$0x3] }
 0x1db   :  { %v1874_v47 = vsel %vm1873_vm6, %v4122_v3, %v4124_v34  ;;  %v1875_v2 = vsel %vm1873_vm6, %v4124_v34, %v4122_v3  ;;  %v2127_v32 = vrot.slane %v4403_v63, %v3018_v51 }
 0x1dc   :  { %v4126_v14 = vpop.permute.xlu0 %1876  ;;  %v1895_v61 = vmul.f32 %v1888_v56, %v1874_v47  ;;  %v1896_v22 = vmul.f32 %v1892_v30, %v1875_v2  ;;  %v2046_v56 = vrot.slane %v4318_v43, %v3015_v50  ;;  %v1867_v30 = vadd.f32 %v1865_v10, %v1850_v19  ;;  %v4362_v47 = vld [vmem:[#allocation6 + $0xb2] ss:$8 sm:$0x3] }
 0x1de   :  { %v4128_v57 = vpop.permute.xlu1 %1878  ;;  %v1898_v60 = vadd.f32 %v1896_v22, %v1868_v42 }
 0x1df   :  { %v1880_v34 = vsel %vm1873_vm6, %v4126_v14, %v4128_v57  ;;  %v1881_v39 = vsel %vm1873_vm6, %v4128_v57, %v4126_v14 }
 0x1e0   :  { %v4130_v58 = vpop.permute.xlu0 %1916  ;;  %v1912_v21 = vmul.f32 %v1905_v38, %v1880_v34  ;;  %v1913_v45 = vmul.f32 %v4681_v44, %v1881_v39  ;;  %v1897_v38 = vadd.f32 %v1895_v61, %v1867_v30  ;;  %v2080_v34 = vrot.slane %v4340_v0, %v3018_v51  ;;  %v4446_v44 = vld [vmem:[#allocation6 + $0x53] ss:$8 sm:$0x3] }
 0x1e1   :  { %v2170_v7 = vrot.slane %v4446_v44, %v3015_v50 }
 0x1e2   :  { %v4132_v28 = vpop.permute.xlu1 %1918  ;;  %v1914_v16 = vadd.f32 %v1912_v21, %v1897_v38  ;;  %v4468_v38 = vld [vmem:[#allocation6 + $0xb4] ss:$8 sm:$0x3] }
 0x1e3   :  { %v1921_v14 = vsel %vm1920_vm7, %v4130_v58, %v4132_v28  ;;  %v1922_v57 = vsel %vm1920_vm7, %v4132_v28, %v4130_v58 }
 0x1e4   :  { %v4134_v9 = vpop.permute.xlu0 %1923  ;;  %v1942_v40 = vmul.f32 %v1935_v11, %v1921_v14  ;;  %v1943_v10 = vmul.f32 %v1939_v13, %v1922_v57  ;;  %v2093_v11 = vrot.slane %v4362_v47, %v3015_v50  ;;  %v1915_v13 = vadd.f32 %v1913_v45, %v1898_v60  ;;  %v4424_v14 = vld [vmem:[#allocation6 + $0xb3] ss:$8 sm:$0x3] }
 0x1e5   :  { %v2144_v55 = vrot.slane %v4424_v14, %v3018_v51 }
 0x1e6   :  { %v4136_v41 = vpop.permute.xlu1 %1925  ;;  %v1944_v35 = vadd.f32 %v1942_v40, %v1914_v16 }
 0x1e7   :  { %v1927_v58 = vsel %vm1920_vm7, %v4134_v9, %v4136_v41  ;;  %v1928_v28 = vsel %vm1920_vm7, %v4136_v41, %v4134_v9 }
 0x1e8   :  { %v4138_v24 = vpop.permute.xlu0 %1963  ;;  %v1959_v39 = vmul.f32 %v1952_v52, %v1927_v58  ;;  %v1960_v19 = vmul.f32 %v1956_v27, %v1928_v28  ;;  %v2097_v52 = vrot.slane %v4362_v47, %v3018_v51  ;;  %v1945_v27 = vadd.f32 %v1943_v10, %v1915_v13 }
 0x1ea   :  { %v4140_v33 = vpop.permute.xlu1 %1965  ;;  %v1962_v30 = vadd.f32 %v1960_v19, %v1945_v27 }
 0x1eb   :  { %v1968_v9 = vsel %vm1967_vm8, %v4138_v24, %v4140_v33  ;;  %v1969_v41 = vsel %vm1967_vm8, %v4140_v33, %v4138_v24 }
 0x1ec   :  { %v4142_v8 = vpop.permute.xlu0 %1970  ;;  %v1989_v22 = vmul.f32 %v1982_v20, %v1968_v9  ;;  %v1990_v0 = vmul.f32 %v1986_v31, %v1969_v41  ;;  %v2123_v20 = vrot.slane %v4403_v63, %v3015_v50  ;;  %v1961_v31 = vadd.f32 %v1959_v39, %v1944_v35  ;;  %v2212_v39 = vld [vmem:[#allocation6 + $0x54] ss:$8 sm:$0x3]  ;;  %v2229_v35 = vld [vmem:[#allocation6 + $0xb5] ss:$8 sm:$0x3] }
 0x1ed   :  { %v2174_v41 = vrot.slane %v4446_v44, %v3018_v51 }
 0x1ee   :  { %v4144_v29 = vpop.permute.xlu1 %1972  ;;  %v1992_v47 = vadd.f32 %v1990_v0, %v1962_v30  ;;  %v2221_v0 = vrot.slane %v2212_v39, %v3018_v51 }
 0x1ef   :  { %v1974_v24 = vsel %vm1967_vm8, %v4142_v8, %v4144_v29  ;;  %v1975_v33 = vsel %vm1967_vm8, %v4144_v29, %v4142_v8 }
 0x1f0   :  { %v4146_v54 = vpop.permute.xlu0 %2010  ;;  %v2006_v42 = vmul.f32 %v1999_v59, %v1974_v24  ;;  %v2007_v21 = vmul.f32 %v2003_v62, %v1975_v33  ;;  %v2140_v59 = vrot.slane %v4424_v14, %v3015_v50  ;;  %v1991_v62 = vadd.f32 %v1989_v22, %v1961_v31 }
 0x1f2   :  { %v4149_v4 = vpop.permute.xlu1 %2012 }
 0x1f3   :  { %v2015_v8 = vsel %vm2014_vm9, %v4146_v54, %v4149_v4  ;;  %v2016_v29 = vsel %vm2014_vm9, %v4149_v4, %v4146_v54 }
 0x1f4   :  { %v4161_v15 = vpop.permute.xlu0 %2017  ;;  %v2036_v58 = vmul.f32 %v2029_v1, %v2015_v8  ;;  %v2037_v28 = vmul.f32 %v2033_v18, %v2016_v29  ;;  %v2008_v1 = vadd.f32 %v2006_v42, %v1991_v62  ;;  %v2009_v18 = vadd.f32 %v2007_v21, %v1992_v47  ;;  %v2259_v29 = vld [vmem:[#allocation6 + $0x55] ss:$8 sm:$0x3] }
 0x1f5   :  { %v2238_v42 = vrot.slane %v2229_v35, %v3018_v51 }
 0x1f6   :  { %v4179_v36 = vpop.permute.xlu1 %2019  ;;  %v2038_v16 = vadd.f32 %v2036_v58, %v2008_v1  ;;  %v2039_v43 = vadd.f32 %v2037_v28, %v2009_v18 }
 0x1f7   :  { %v2021_v54 = vsel %vm2014_vm9, %v4161_v15, %v4179_v36  ;;  %v2022_v4 = vsel %vm2014_vm9, %v4179_v36, %v4161_v15 }
 0x1f8   :  { %v4194_v53 = vpop.permute.xlu0 %2057  ;;  %v2053_v40 = vmul.f32 %v2046_v56, %v2021_v54  ;;  %v2054_v10 = vmul.f32 %v2050_v17, %v2022_v4  ;;  %v2187_v56 = vrot.slane %v4468_v38, %v3015_v50  ;;  %v2276_v4 = vld [vmem:[#allocation6 + $0xb6] ss:$8 sm:$0x3] }
 0x1fa   :  { %v4213_v5 = vpop.permute.xlu1 %2059  ;;  %v2055_v24 = vadd.f32 %v2053_v40, %v2038_v16 }
 0x1fb   :  { %v2062_v15 = vsel %vm2061_vm10, %v4194_v53, %v4213_v5  ;;  %v2063_v36 = vsel %vm2061_vm10, %v4213_v5, %v4194_v53 }
 0x1fc   :  { %v4231_v25 = vpop.permute.xlu0 %2064  ;;  %v2083_v17 = vmul.f32 %v2076_v37, %v2062_v15  ;;  %v2084_v13 = vmul.f32 %v2080_v34, %v2063_v36  ;;  %v2056_v37 = vadd.f32 %v2054_v10, %v2039_v43  ;;  %v2306_v10 = vld [vmem:[#allocation6 + $0x56] ss:$8 sm:$0x3] }
 0x1fe   :  { %v4248_v26 = vpop.permute.xlu1 %2066  ;;  %v2085_v14 = vadd.f32 %v2083_v17, %v2055_v24  ;;  %v2086_v8 = vadd.f32 %v2084_v13, %v2056_v37 }
 0x1ff   :  { %v2068_v53 = vsel %vm2061_vm10, %v4231_v25, %v4248_v26  ;;  %v2069_v5 = vsel %vm2061_vm10, %v4248_v26, %v4231_v25  ;;  %v2191_v26 = vrot.slane %v4468_v38, %v3018_v51 }
 0x200   :  { %v4264_v23 = vpop.permute.xlu0 %2104  ;;  %v2100_v34 = vmul.f32 %v2093_v11, %v2068_v53  ;;  %v2101_v33 = vmul.f32 %v2097_v52, %v2069_v5 }
 0x202   :  { %v4281_v6 = vpop.permute.xlu1 %2106  ;;  %v2102_v21 = vadd.f32 %v2100_v34, %v2085_v14  ;;  %v2103_v44 = vadd.f32 %v2101_v33, %v2086_v8  ;;  %v2353_v34 = vld [vmem:[#allocation6 + $0x57] ss:$8 sm:$0x3]  ;;  %v2370_v8 = vld [vmem:[#allocation6 + $0xc0] ss:$8 sm:$0x3] }
 0x203   :  { %v2109_v63 = vsel %vm2108_vm11, %v4264_v23, %v4281_v6  ;;  %v2110_v25 = vsel %vm2108_vm11, %v4281_v6, %v4264_v23  ;;  %v2217_v6 = vrot.slane %v2212_v39, %v3015_v50 }
 0x204   :  { %v4297_v48 = vpop.permute.xlu0 %2111  ;;  %v2130_v11 = vmul.f32 %v2123_v20, %v2109_v63  ;;  %v2131_v52 = vmul.f32 %v2127_v32, %v2110_v25  ;;  %v2311_v63 = vrot.slane %v2306_v10, %v3015_v50 }
 0x206   :  { %v4320_v3 = vpop.permute.xlu1 %2113  ;;  %v2132_v47 = vadd.f32 %v2130_v11, %v2102_v21  ;;  %v2133_v58 = vadd.f32 %v2131_v52, %v2103_v44 }
 0x207   :  { %v2115_v22 = vsel %vm2108_vm11, %v4297_v48, %v4320_v3  ;;  %v2116_v23 = vsel %vm2108_vm11, %v4320_v3, %v4297_v48  ;;  %v2234_v3 = vrot.slane %v2229_v35, %v3015_v50 }
 0x208   :  { %v4342_v46 = vpop.permute.xlu0 %2151  ;;  %v2147_v20 = vmul.f32 %v2140_v59, %v2115_v22  ;;  %v2148_v32 = vmul.f32 %v2144_v55, %v2116_v23 }
 0x20a   :  { %v4364_v2 = vpop.permute.xlu1 %2153  ;;  %v2149_v36 = vadd.f32 %v2147_v20, %v2132_v47  ;;  %v2150_v1 = vadd.f32 %v2148_v32, %v2133_v58  ;;  %v2362_v20 = vrot.slane %v2353_v34, %v3018_v51  ;;  %v2375_v32 = vrot.slane %v2370_v8, %v3015_v50  ;;  %v2400_v47 = vld [vmem:[#allocation6 + $0x60] ss:$8 sm:$0x3] }
 0x20b   :  { %v2156_v30 = vsel %vm2155_vm12, %v4342_v46, %v4364_v2  ;;  %v2157_v48 = vsel %vm2155_vm12, %v4364_v2, %v4342_v46  ;;  %v2264_v2 = vrot.slane %v2259_v29, %v3015_v50 }
 0x20c   :  { %v4383_v12 = vpop.permute.xlu0 %2158  ;;  %v2177_v59 = vmul.f32 %v2170_v7, %v2156_v30  ;;  %v2178_v55 = vmul.f32 %v2174_v41, %v2157_v48 }
 0x20e   :  { %v4405_v61 = vpop.permute.xlu1 %2160  ;;  %v2180_v41 = vadd.f32 %v2178_v55, %v2150_v1  ;;  %v2379_v55 = vrot.slane %v2370_v8, %v3018_v51 }
 0x20f   :  { %v2162_v62 = vsel %vm2155_vm12, %v4383_v12, %v4405_v61  ;;  %v2163_v46 = vsel %vm2155_vm12, %v4405_v61, %v4383_v12  ;;  %v2268_v12 = vrot.slane %v2259_v29, %v3018_v51  ;;  %v2281_v61 = vrot.slane %v2276_v4, %v3015_v50 }
 0x210   :  { %v4426_v57 = vpop.permute.xlu0 %2198  ;;  %v2194_v18 = vmul.f32 %v2187_v56, %v2162_v62  ;;  %v2195_v7 = vmul.f32 %v2191_v26, %v2163_v46  ;;  %v2323_v56 = vld [vmem:[#allocation6 + $0xb7] ss:$8 sm:$0x3]  ;;  %v2358_v29 = vrot.slane %v2353_v34, %v3015_v50 }
 0x211   :  { %v2328_v22 = vrot.slane %v2323_v56, %v3015_v50 }
 0x212   :  { %v4448_v45 = vpop.permute.xlu1 %2200  ;;  %v2197_v25 = vadd.f32 %v2195_v7, %v2180_v41  ;;  %v2409_v7 = vrot.slane %v2400_v47, %v3018_v51 }
 0x213   :  { %v2203_v38 = vsel %vm2202_vm13, %v4426_v57, %v4448_v45  ;;  %v2204_v15 = vsel %vm2202_vm13, %v4448_v45, %v4426_v57  ;;  %v2285_v57 = vrot.slane %v2276_v4, %v3018_v51  ;;  %v2179_v45 = vadd.f32 %v2177_v59, %v2149_v36 }
 0x214   :  { %v4470_v60 = vpop.permute.xlu0 %2205  ;;  %v2224_v16 = vmul.f32 %v2217_v6, %v2203_v38  ;;  %v2225_v43 = vmul.f32 %v2221_v0, %v2204_v15 }
 0x216   :  { %v2208_v9 = vpop.permute.xlu1 %2207  ;;  %v2227_v23 = vadd.f32 %v2225_v43, %v2197_v25 }
 0x217   :  { %v2209_v53 = vsel %vm2202_vm13, %v4470_v60, %v2208_v9  ;;  %v2210_v5 = vsel %vm2202_vm13, %v2208_v9, %v4470_v60  ;;  %v2315_v60 = vrot.slane %v2306_v10, %v3018_v51  ;;  %v2196_v9 = vadd.f32 %v2194_v18, %v2179_v45  ;;  %v2417_v45 = vld [vmem:[#allocation6 + $0xc1] ss:$8 sm:$0x3] }
 0x218   :  { %v2246_v19 = vpop.permute.xlu0 %2245  ;;  %v2241_v26 = vmul.f32 %v2234_v3, %v2209_v53  ;;  %v2242_v24 = vmul.f32 %v2238_v42, %v2210_v5  ;;  %v2405_v18 = vrot.slane %v2400_v47, %v3015_v50  ;;  %v2750_v47 = vmov 1966171168  }
 0x21a   :  { %v2248_v27 = vpop.permute.xlu1 %2247  ;;  %v2244_v30 = vadd.f32 %v2242_v24, %v2227_v23 }
 0x21b   :  { %v2250_v13 = vsel %vm2249_vm14, %v2246_v19, %v2248_v27  ;;  %v2251_v39 = vsel %vm2249_vm14, %v2248_v27, %v2246_v19  ;;  %v2332_v19 = vrot.slane %v2323_v56, %v3018_v51  ;;  %v2226_v27 = vadd.f32 %v2224_v16, %v2196_v9 }
 0x21c   :  { %v2253_v31 = vpop.permute.xlu0 %2252  ;;  %v2271_v6 = vmul.f32 %v2264_v2, %v2250_v13  ;;  %v2272_v0 = vmul.f32 %v2268_v12, %v2251_v39 }
 0x21e   :  { %v2255_v54 = vpop.permute.xlu1 %2254  ;;  %v2274_v4 = vadd.f32 %v2272_v0, %v2244_v30  ;;  %v2447_v30 = vstv %s2433_s11 }
 0x21f   :  { %v2256_v33 = vsel %vm2249_vm14, %v2253_v31, %v2255_v54  ;;  %v2257_v35 = vsel %vm2249_vm14, %v2255_v54, %v2253_v31  ;;  %v2243_v31 = vadd.f32 %v2241_v26, %v2226_v27 }
 0x220   :  { %v2293_v28 = vpop.permute.xlu0 %2292  ;;  %v2288_v48 = vmul.f32 %v2281_v61, %v2256_v33  ;;  %v2289_v3 = vmul.f32 %v2285_v57, %v2257_v35 }
 0x221   :  { %v2273_v54 = vadd.f32 %v2271_v6, %v2243_v31 }
 0x222   :  { %v2295_v40 = vpop.permute.xlu1 %2294  ;;  %v2291_v38 = vadd.f32 %v2289_v3, %v2274_v4 }
 0x223   :  { %v2297_v11 = vsel %vm2296_vm15, %v2293_v28, %v2295_v40  ;;  %v2298_v52 = vsel %vm2296_vm15, %v2295_v40, %v2293_v28  ;;  %v2290_v28 = vadd.f32 %v2288_v48, %v2273_v54 }
 0x224   :  { %v2300_v17 = vpop.permute.xlu0 %2299  ;;  %v2318_v62 = vmul.f32 %v2311_v63, %v2297_v11  ;;  %v2319_v46 = vmul.f32 %v2315_v60, %v2298_v52  ;;  %v2422_v63 = vrot.slane %v2417_v45, %v3015_v50  ;;  %v2426_v60 = vrot.slane %v2417_v45, %v3018_v51  ;;  %v2608_v45 = vld [vmem:[#allocation2] sm:$0xff] }
 0x225   :  { %v2444_v52 = vstv %s2539_s13 }
 0x226   :  { %v2302_v37 = vpop.permute.xlu1 %2301  ;;  %v2320_v40 = vadd.f32 %v2318_v62, %v2290_v28  ;;  %v2321_v10 = vadd.f32 %v2319_v46, %v2291_v38  ;;  %v4682_v28 = vld [vmem:[#allocation14_spill] sm:$0xff] }
 0x227   :  { %v2303_v21 = vsel %vm2296_vm15, %v2300_v17, %v2302_v37  ;;  %v2304_v44 = vsel %vm2296_vm15, %v2302_v37, %v2300_v17 }
 0x228   :  { %v2340_v14 = vpop.permute.xlu0 %2339  ;;  %v2335_v15 = vmul.f32 %v2328_v22, %v2303_v21  ;;  %v2336_v12 = vmul.f32 %v2332_v19, %v2304_v44 }
 0x22a   :  { %v2342_v42 = vpop.permute.xlu1 %2341  ;;  %v2337_v41 = vadd.f32 %v2335_v15, %v2320_v40  ;;  %v2338_v16 = vadd.f32 %v2336_v12, %v2321_v10 }
 0x22b   :  { %v2344_v58 = vsel %vm2343_vm0, %v2340_v14, %v2342_v42  ;;  %v2345_v59 = vsel %vm2343_vm0, %v2342_v42, %v2340_v14  ;;  %v2437_v14 = vstv %s4596_s10  ;;  %v2450_v42 = vstv %s2533_s12 }
 0x22c   :  { %v2347_v2 = vpop.permute.xlu0 %2346  ;;  %v2365_v53 = vmul.f32 %v2358_v29, %v2344_v58  ;;  %v2366_v5 = vmul.f32 %v2362_v20, %v2345_v59  ;;  %v2469_v58 = vunpack.c.l.s4 %v2750_v47 }
 0x22e   :  { %v2349_v61 = vpop.permute.xlu1 %2348  ;;  %v2367_v9 = vadd.f32 %v2365_v53, %v2337_v41  ;;  %v2368_v25 = vadd.f32 %v2366_v5, %v2338_v16  ;;  %v2470_v59 = vunpack.c.0.s8 %v2469_v58  ;;  %v2609_v16 = vld [vmem:[#allocation2 + $0x8] sm:$0xff] }
 0x22f   :  { %v2350_v36 = vsel %vm2343_vm0, %v2347_v2, %v2349_v61  ;;  %v2351_v1 = vsel %vm2343_vm0, %v2349_v61, %v2347_v2 }
 0x230   :  { %v2387_v57 = vpop.permute.xlu0 %2386  ;;  %v2382_v43 = vmul.f32 %v2375_v32, %v2350_v36  ;;  %v2383_v56 = vmul.f32 %v2379_v55, %v2351_v1  ;;  %v2473_v38 = vsub.s32 %v2470_v59, %v4682_v28 }
 0x232   :  { %v2389_v17 = vpop.permute.xlu1 %2388  ;;  %v2384_v34 = vadd.f32 %v2382_v43, %v2367_v9  ;;  %v2385_v33 = vadd.f32 %v2383_v56, %v2368_v25 }
 0x233   :  { %v2391_v13 = vsel %vm2390_vm1, %v2387_v57, %v2389_v17  ;;  %v2392_v39 = vsel %vm2390_vm1, %v2389_v17, %v2387_v57 }
 0x234   :  { %v2412_v26 = vmul.f32 %v2405_v18, %v2391_v13  ;;  %v2413_v24 = vmul.f32 %v2409_v7, %v2392_v39  ;;  %v2394_v37 = vpop.permute.xlu0 %2393 }
 0x236   :  { %v2396_v35 = vpop.permute.xlu1 %2395  ;;  %v2414_v27 = vadd.f32 %v2412_v26, %v2384_v34  ;;  %v2415_v23 = vadd.f32 %v2413_v24, %v2385_v33 }
 0x237   :  { %v2397_v22 = vsel %vm2390_vm1, %v2394_v37, %v2396_v35  ;;  %v2398_v19 = vsel %vm2390_vm1, %v2396_v35, %v2394_v37 }
 0x238   :  { %v2429_v6 = vmul.f32 %v2422_v63, %v2397_v22  ;;  %v2430_v0 = vmul.f32 %v2426_v60, %v2398_v19 }
 0x23a   :  { %v2431_v8 = vadd.f32 %v2429_v6, %v2414_v27  ;;  %v2432_v11 = vadd.f32 %v2430_v0, %v2415_v23 }
 0x23c   :  { %v2438_v29 = vsub.f32 %v2431_v8, %v2437_v14  ;;  %v2439_v31 = vsub.f32 %v2432_v11, %v2437_v14 }
 0x23e   :  { %v2445_v48 = vmul.f32 %v2444_v52, %v2438_v29  ;;  %v2446_v3 = vmul.f32 %v2444_v52, %v2439_v31 }
 0x240   :  { %v2448_v21 = vmul.f32 %v2447_v30, %v2445_v48  ;;  %v2449_v44 = vmul.f32 %v2447_v30, %v2446_v3 }
 0x242   :  { %v2451_v49 = vadd.f32 %v2450_v42, %v2448_v21  ;;  %v2452_v20 = vadd.f32 %v2450_v42, %v2449_v44 }
 0x244   :  { %v2536_v32 = vmul.f32 -1.442695, %v2451_v49  ;;  %v2537_v54 = vmul.f32 -1.442695, %v2452_v20 }
 0x246   :  { %2600 = vpow2.f32 %v2536_v32 }
 0x247   :  { %2602 = vpow2.f32 %v2537_v54 }
 0x250   :  { %v2601_v4 = vpop.eup %2600 }
 0x251   :  { %v2603_v62 = vpop.eup %2602  ;;  %v2459_v46 = vadd.f32 1.0, %v2601_v4 }
 0x252   :  { %v2460_v2 = vadd.f32 1.0, %v2603_v62 }
 0x253   :  { %2604 = vrcp.f32 %v2459_v46 }
 0x254   :  { %2606 = vrcp.f32 %v2460_v2 }
 0x25d   :  { %v2605_v55 = vpop.eup %2604 }
 0x25e   :  { %v2607_v15 = vpop.eup %2606 }
 0x25f   :  { %v2467_v12 = vcombine.low %v2605_v55, %v2607_v15 }
 0x261   :  { %v2474_v61 = vrot.slane %v2467_v12, %v2473_v38 }
 0x263   :  { %v2475_v36 = vcombine.high %v2474_v61, %v2474_v61  ;;  %v2482_v1 = vrot.slane %v2474_v61, %v2473_v38 }
 0x265   :  { %v2489_v18 = vrot.slane %v2475_v36, %v2473_v38  ;;  %v2493_v7 = vrot.slane %v2482_v1, %v3015_v50  ;;  %v2497_v40 = vrot.slane %v2482_v1, %v3018_v51 }
 0x267   :  { %v2501_v10 = vrot.slane %v2489_v18, %v3015_v50  ;;  %v2505_v53 = vrot.slane %v2489_v18, %v3018_v51  ;;  %v2506_v5 = vcombine.low %v2493_v7, %v2497_v40 }
 0x269   :  { %v2507_v57 = vcombine.low %v2501_v10, %v2505_v53  ;;  %v2510_v41 = vmul.f32 %v2608_v45, %v2506_v5 }
 0x26b   :  { %v2511_v43 = vmul.f32 %v2609_v16, %v2507_v57  ;;  %2512 = vst [vmem:[#allocation9] sm:$0xff] %v2510_v41 }
 0x26d   :  { %2513 = vst [vmem:[#allocation9 + $0x8] sm:$0xff] %v2511_v43 }
 0x26e   :  { %2677 = shalt.err (!%p2674_p11)
}
 0x26f   :  { %s2678_s17 = scalar_lea.hbm %s4632_s3, 256 }
 0x270   :  { %p2679_p12 = scmp.ne.s32.totalorder %s4632_s3, %s2678_s17  ;;  %p2682_p13 = scmp.lt.u32.totalorder %s2678_s17, %s4632_s3 }
 0x272   :  { %p2684_p0 = pnand %p2682_p13, %p2679_p12 }
 0x274   :  { %2687 = shalt.err (!%p2684_p0)
}
 0x275   :  { %2525 = dma.vmem_to_hbm [thread:$0]  %s2520_s15, 256, %s4632_s3, [#allocation4], %s2697_s22, %s2697_s22, %s2698_s23  }
 0x276   :  { %2694 = dma.done.wait [#allocation4], 256  }
 0x277   :  { %2695 = vsyncadd [#allocation4], 4294967040 }
 0x278   :  { %2529 = vsyncpa [#allocation3], 1 }
 0x279   :  { %2530 = vsyncpa [#allocation7], 1 }
 0x27a   :  { %2531 = vsyncpa [#allocation4], 1 }
 0x27b   :  { %2532 = vsyncpa [#allocation5], 1 }

</bundles_post_ra>
